<compile_context>
chip_gen: v7x
topology: tpu7x:2x2x1
jax: 0.10.0
libtpu: 0.0.40
codegen_flags: <defaults>
</compile_context>

<pallas_src>
import jax
import jax.numpy as jnp
from jax import lax
from jax.experimental import pallas as pl
from jax.experimental.pallas import tpu as pltpu


# ---------------------------------------------------------------------------
# Pallas kernels
# ---------------------------------------------------------------------------
def _conv_relu_pool_kernel(p_ref, w_ref, b_ref, o_ref):
    """Fused 3x3 conv + bias + ReLU + 2x2 maxpool (phase-stacked matmul).

    p_ref: (1, 16*Cin, tm)     bf16  stride-2 4x4-window patches (lanes = spatial)
    w_ref: (4*Cout, 16*Cin)    bf16  4 pooling-phase weight matrices stacked on rows
    b_ref: (Cout, 1)           f32
    o_ref: (1, Cout, tm)       bf16  pooled activation (lanes = pooled spatial)
    """
    cout = o_ref.shape[1]
    p = p_ref[0]                                                   # (16*Cin, tm)
    # One MXU matmul for all 4 pooling phases: (4*Cout, tm) f32.
    z4 = jnp.dot(w_ref[...], p, preferred_element_type=jnp.float32)
    # 2x2 max-pool == elementwise max over the four Cout-row groups (VPU).
    z = jnp.maximum(jnp.maximum(z4[0 * cout:1 * cout], z4[1 * cout:2 * cout]),
                    jnp.maximum(z4[2 * cout:3 * cout], z4[3 * cout:4 * cout]))
    # Bias + ReLU after the max is valid: per-channel bias, monotonic ReLU.
    o_ref[0] = jnp.maximum(z + b_ref[...], 0.0).astype(o_ref.dtype)


def _mlp_head_kernel(x_ref, w1_ref, b1_ref, w2_ref, o_ref, acc_ref):
    """Fused fc1 (K-tiled, bf16 operands, f32 acc) + ReLU + fc2 epilogue.

    Grid = (n_half, k_tile); n_half splits the 128 hidden units into two
    64-wide halves ("parallel" axis -> both v7x TensorCores get work).
    Each half writes a partial-logit slab; halves are summed outside.
    """
    k = pl.program_id(1)

    @pl.when(k == 0)
    def _():
        acc_ref[...] = jnp.zeros_like(acc_ref)

    acc_ref[...] += jnp.dot(x_ref[...], w1_ref[0],
                            preferred_element_type=jnp.float32)

    @pl.when(k == pl.num_programs(1) - 1)
    def _():
        h = jnp.maximum(acc_ref[...] + b1_ref[0], 0.0)             # (B, 64) f32
        o_ref[0] = jnp.dot(h, w2_ref[0], preferred_element_type=jnp.float32)


# ---------------------------------------------------------------------------
# XLA glue: patch extraction and weight re-layout (one-time / tiny)
# ---------------------------------------------------------------------------
def pool_patches(x_nchw, dtype=jnp.bfloat16):
    """Stride-2, 4x4-window im2col of a zero-padded NCHW tensor.

    (B, C, H, W) -> (B, 16*C, (H//2)*(W//2)); row order is (dy, dx, ci) with
    dy, dx in [0, 4); element [(dy,dx,ci), oh*Wo+ow] = xpad[ci, 2*oh+dy, 2*ow+dx].
    """
    B, C, H, W = x_nchw.shape
    Ho, Wo = H // 2, W // 2
    xp = jnp.pad(x_nchw, ((0, 0), (0, 0), (1, 1), (1, 1)))
    slabs = [xp[:, :, a:a + H:2, b:b + W:2] for a in range(4) for b in range(4)]
    p = jnp.stack(slabs, axis=1)                  # (B, 16, C, Ho, Wo)
    return p.reshape(B, 16 * C, Ho * Wo).astype(dtype)


def make_phase_weights(w_oihw):
    """PyTorch conv weight (Cout, Cin, 3, 3) -> stacked (4*Cout, 16*Cin).

    Phase p = (ph, pw) of the 2x2 pooling window gets the 3x3 taps embedded at
    offsets (ph+kh, pw+kw) inside a zero 4x4 tap grid, matching pool_patches
    row order (dy, dx, ci). Rows [p*Cout:(p+1)*Cout] belong to phase p.
    """
    Cout, Cin = w_oihw.shape[0], w_oihw.shape[1]
    w_t = jnp.transpose(w_oihw, (0, 2, 3, 1))     # (Cout, 3, 3, Cin)
    wp = jnp.zeros((4, Cout, 4, 4, Cin), w_oihw.dtype)
    for ph in range(2):
        for pw in range(2):
            wp = wp.at[ph * 2 + pw, :, ph:ph + 3, pw:pw + 3, :].set(w_t)
    return wp.reshape(4 * Cout, 16 * Cin)


# ---------------------------------------------------------------------------
# Pallas wrappers
# ---------------------------------------------------------------------------
def conv3x3_relu_pool(x_nchw, w_stacked, bias, *, tm):
    """maxpool2(relu(conv3x3(x)+b)); returns (B, Cout, Ho*Wo) bf16."""
    B, Cin, H, W = x_nchw.shape
    assert H % 2 == 0 and W % 2 == 0
    Ho, Wo = H // 2, W // 2
    M = Ho * Wo
    C4, K16 = w_stacked.shape
    Cout = C4 // 4
    assert K16 == 16 * Cin and M % tm == 0 and tm % 128 == 0 and Cout % 8 == 0

    patches = pool_patches(x_nchw)                # (B, 16*Cin, M) bf16
    bias2d = bias.reshape(Cout, 1).astype(jnp.float32)

    return pl.pallas_call(
        _conv_relu_pool_kernel,
        out_shape=jax.ShapeDtypeStruct((B, Cout, M), jnp.bfloat16),
        grid=(B, M // tm),
        in_specs=[
            pl.BlockSpec((1, K16, tm), lambda b, m: (b, 0, m)),
            pl.BlockSpec((C4, K16), lambda b, m: (0, 0)),
            pl.BlockSpec((Cout, 1), lambda b, m: (0, 0)),
        ],
        out_specs=pl.BlockSpec((1, Cout, tm), lambda b, m: (b, 0, m)),
        compiler_params=pltpu.CompilerParams(
            dimension_semantics=("parallel", "parallel")),
    )(patches, w_stacked, bias2d)


def mlp_head(x_bf16, w1_split, b1_split, w2_split, b2, *, tk):
    """logits = relu(x @ w1 + b1) @ w2 + b2.

    w1_split: (2, K, 64) bf16   b1_split: (2, 1, 64) f32   w2_split: (2, 64, C) f32
    fc1 is K-tiled (f32 VMEM acc); the hidden dim is split into two halves on a
    parallel grid axis; per-half partial logits are summed (+ b2) in XLA glue.
    """
    M, K = x_bf16.shape
    NS, K2, NH = w1_split.shape
    NS2, NH2, C = w2_split.shape
    assert K == K2 and NH == NH2 and NS == NS2 == 2 and K % tk == 0

    partials = pl.pallas_call(
        _mlp_head_kernel,
        out_shape=jax.ShapeDtypeStruct((NS, M, C), jnp.float32),
        grid_spec=pltpu.PrefetchScalarGridSpec(
            num_scalar_prefetch=0,
            grid=(NS, K // tk),
            in_specs=[
                pl.BlockSpec((M, tk), lambda n, k: (0, k)),
                pl.BlockSpec((1, tk, NH), lambda n, k: (n, k, 0)),
                pl.BlockSpec((1, 1, NH), lambda n, k: (n, 0, 0)),
                pl.BlockSpec((1, NH, C), lambda n, k: (n, 0, 0)),
            ],
            out_specs=pl.BlockSpec((1, M, C), lambda n, k: (n, 0, 0)),
            scratch_shapes=[pltpu.VMEM((M, NH), jnp.float32)],
        ),
        compiler_params=pltpu.CompilerParams(
            dimension_semantics=("parallel", "arbitrary")),
    )(x_bf16, w1_split, b1_split, w2_split)
    return partials[0] + partials[1] + b2.reshape(1, C)


# ---------------------------------------------------------------------------
# Model
# ---------------------------------------------------------------------------
def init_params(num_classes, key):
    ks = jax.random.split(key, 8)
    K = 32 * 32 * 32
    raw = {
        "w1": jax.random.normal(ks[0], (16, 3, 3, 3), jnp.float32) * 0.1,
        "b1": jax.random.normal(ks[1], (16,), jnp.float32) * 0.1,
        "w2": jax.random.normal(ks[2], (32, 16, 3, 3), jnp.float32) * 0.05,
        "b2": jax.random.normal(ks[3], (32,), jnp.float32) * 0.05,
        "wfc1": jax.random.normal(ks[4], (128, K), jnp.float32) * 0.01,
        "bfc1": jax.random.normal(ks[5], (128,), jnp.float32) * 0.01,
        "wfc2": jax.random.normal(ks[6], (num_classes, 128), jnp.float32) * 0.05,
        "bfc2": jax.random.normal(ks[7], (num_classes,), jnp.float32) * 0.05,
    }
    wfc1_t = jnp.transpose(raw["wfc1"])                            # (K, 128)
    wfc2_t = jnp.transpose(raw["wfc2"])                            # (128, C)
    params = {
        "w1p": make_phase_weights(raw["w1"]).astype(jnp.bfloat16),     # (64, 48)
        "b1": raw["b1"],
        "w2p": make_phase_weights(raw["w2"]).astype(jnp.bfloat16),     # (128, 256)
        "b2": raw["b2"],
        # fc1 weight split into two 64-wide hidden halves: (2, K, 64) bf16.
        "wfc1": wfc1_t.reshape(K, 2, 64).transpose(1, 0, 2).astype(jnp.bfloat16),
        "bfc1": raw["bfc1"].reshape(2, 1, 64),
        "wfc2": wfc2_t.reshape(2, 64, num_classes),                    # (2, 64, C) f32
        "bfc2": raw["bfc2"],
    }
    return params, raw


def laryngeal_cnn_forward(x_nchw, params):
    B = x_nchw.shape[0]
    # Conv(3->16) + ReLU + MaxPool2: (B, 16, 64*64) bf16
    y1 = conv3x3_relu_pool(x_nchw, params["w1p"], params["b1"], tm=2048)
    y1 = y1.reshape(B, 16, 64, 64)
    # TODO(synk): fold this inter-layer pool_patches (16x patch expansion) into
    # the conv1 kernel epilogue / a pl.ANY halo DMA to cut ~2 MiB of HBM glue.
    # Conv(16->32) + ReLU + MaxPool2: (B, 32, 32*32) bf16
    y2 = conv3x3_relu_pool(y1, params["w2p"], params["b2"], tm=1024)
    # Flatten in NCHW (C,H,W) order == nn.Flatten on NCHW; already bf16.
    flat = y2.reshape(B, 32 * 32 * 32)
    # fc1 + ReLU + fc2 in one kernel (N split across two TensorCores on v7x).
    return mlp_head(flat, params["wfc1"], params["bfc1"],
                    params["wfc2"], params["bfc2"], tk=4096)


# ---------------------------------------------------------------------------
# Pure-JAX reference (f32, straight PyTorch semantics) for a sanity check
# ---------------------------------------------------------------------------
def _maxpool2_ref(y):
    return jnp.maximum(jnp.maximum(y[:, :, 0::2, 0::2], y[:, :, 0::2, 1::2]),
                       jnp.maximum(y[:, :, 1::2, 0::2], y[:, :, 1::2, 1::2]))


def reference_forward(x, raw):
    dn = ("NCHW", "OIHW", "NCHW")
    y = lax.conv_general_dilated(x, raw["w1"], (1, 1), "SAME",
                                 dimension_numbers=dn)
    y = _maxpool2_ref(jnp.maximum(y + raw["b1"][None, :, None, None], 0.0))
    y = lax.conv_general_dilated(y, raw["w2"], (1, 1), "SAME",
                                 dimension_numbers=dn)
    y = _maxpool2_ref(jnp.maximum(y + raw["b2"][None, :, None, None], 0.0))
    flat = y.reshape(y.shape[0], -1)
    h = jnp.maximum(flat @ raw["wfc1"].T + raw["bfc1"], 0.0)
    return h @ raw["wfc2"].T + raw["bfc2"]


if __name__ == "__main__":
    num_classes = 4
    key = jax.random.PRNGKey(0)
    k_x, k_p = jax.random.split(key)

    # nn.Linear(32*32*32, 128) after two 2x pools implies a 128x128 input.
    x = jax.random.normal(k_x, (2, 3, 128, 128), dtype=jnp.float32)
    params, raw = init_params(num_classes, k_p)

    logits = jax.block_until_ready(jax.jit(laryngeal_cnn_forward)(x, params))
    assert logits.shape == (2, num_classes), logits.shape
    assert bool(jnp.all(jnp.isfinite(logits)))

    ref = jax.block_until_ready(jax.jit(reference_forward)(x, raw))
    err = float(jnp.max(jnp.abs(logits - ref)))
    assert err < 5e-2, f"max abs error vs f32 reference: {err}"

    print("KERNEL_OK")
</pallas_src>

<mosaic_0001>
module attributes {stable_mosaic.version = 11 : i64} {
  func.func @_conv_relu_pool_kernel(%arg0: i32, %arg1: i32, %arg2: memref<1x48x2048xbf16, #tpu.memory_space<vmem>>, %arg3: memref<64x48xbf16, #tpu.memory_space<vmem>>, %arg4: memref<16x1xf32, #tpu.memory_space<vmem>>, %arg5: memref<1x16x2048xbf16, #tpu.memory_space<vmem>>) attributes {dimension_semantics = [#tpu.dimension_semantics<parallel>, #tpu.dimension_semantics<parallel>], iteration_bounds = array<i64: 2, 2>, scalar_prefetch = 0 : i64, scratch_operands = 0 : i64, tpu.core_type = #tpu.core_type<tc>, window_params = [{transform_indices = @transform_0, window_bounds = array<i64: 1, 48, 2048>}, {pipeline_mode = #tpu.pipeline_mode<synchronous>, transform_indices = @transform_1, window_bounds = array<i64: 64, 48>}, {pipeline_mode = #tpu.pipeline_mode<synchronous>, transform_indices = @transform_2, window_bounds = array<i64: 16, 1>}, {transform_indices = @transform_3, window_bounds = array<i64: 1, 16, 2048>}]} {
    %c0 = arith.constant 0 : index
    %c0_0 = arith.constant 0 : index
    %c0_1 = arith.constant 0 : index
    %0 = vector.load %arg2[%c0, %c0_0, %c0_1] : memref<1x48x2048xbf16, #tpu.memory_space<vmem>>, vector<1x48x2048xbf16>
    %1 = vector.shape_cast %0 : vector<1x48x2048xbf16> to vector<48x2048xbf16>
    %c0_2 = arith.constant 0 : index
    %c0_3 = arith.constant 0 : index
    %2 = vector.load %arg3[%c0_2, %c0_3] : memref<64x48xbf16, #tpu.memory_space<vmem>>, vector<64x48xbf16>
    %cst = arith.constant dense<0.000000e+00> : vector<64x2048xf32>
    %3 = tpu.matmul %2, %1, %cst {dimension_numbers = #tpu.dot_dimension_numbers<[1], [0], [0], [1], [0, 0, 1, 1], [], []>} : vector<64x48xbf16>, vector<48x2048xbf16>, vector<64x2048xf32> -> vector<64x2048xf32>
    %4 = vector.extract_strided_slice %3 {offsets = [0, 0], sizes = [16, 2048], strides = [1, 1]} : vector<64x2048xf32> to vector<16x2048xf32>
    %5 = vector.extract_strided_slice %3 {offsets = [16, 0], sizes = [16, 2048], strides = [1, 1]} : vector<64x2048xf32> to vector<16x2048xf32>
    %6 = arith.maximumf %4, %5 : vector<16x2048xf32>
    %7 = vector.extract_strided_slice %3 {offsets = [32, 0], sizes = [16, 2048], strides = [1, 1]} : vector<64x2048xf32> to vector<16x2048xf32>
    %8 = vector.extract_strided_slice %3 {offsets = [48, 0], sizes = [16, 2048], strides = [1, 1]} : vector<64x2048xf32> to vector<16x2048xf32>
    %9 = arith.maximumf %7, %8 : vector<16x2048xf32>
    %10 = arith.maximumf %6, %9 : vector<16x2048xf32>
    %c0_4 = arith.constant 0 : index
    %c0_5 = arith.constant 0 : index
    %11 = vector.load %arg4[%c0_4, %c0_5] : memref<16x1xf32, #tpu.memory_space<vmem>>, vector<16x1xf32>
    %12 = vector.broadcast %11 : vector<16x1xf32> to vector<16x2048xf32>
    %13 = arith.addf %10, %12 : vector<16x2048xf32>
    %cst_6 = arith.constant 0.000000e+00 : f32
    %14 = vector.broadcast %cst_6 : f32 to vector<16x2048xf32>
    %15 = arith.maximumf %13, %14 : vector<16x2048xf32>
    %16 = arith.truncf %15 : vector<16x2048xf32> to vector<16x2048xbf16>
    %c0_7 = arith.constant 0 : index
    %c0_8 = arith.constant 0 : index
    %c0_9 = arith.constant 0 : index
    %17 = vector.load %arg5[%c0_7, %c0_8, %c0_9] : memref<1x16x2048xbf16, #tpu.memory_space<vmem>>, vector<1x16x2048xbf16>
    %18 = vector.shape_cast %17 : vector<1x16x2048xbf16> to vector<16x2048xbf16>
    %19 = vector.shape_cast %16 : vector<16x2048xbf16> to vector<1x16x2048xbf16>
    tpu.vector_store %arg5[%c0_7, %c0_8, %c0_9], %19 {strides = array<i32>} : memref<1x16x2048xbf16, #tpu.memory_space<vmem>>, vector<1x16x2048xbf16>,
    return
  }
  func.func @transform_0(%arg0: i32, %arg1: i32) -> (i32, i32, i32) {
    %c0_i32 = arith.constant 0 : i32
    %c0_i32_0 = arith.constant 0 : i32
    return %arg0, %c0_i32, %arg1 : i32, i32, i32
  }
  func.func @transform_1(%arg0: i32, %arg1: i32) -> (i32, i32) {
    %c0_i32 = arith.constant 0 : i32
    %c0_i32_0 = arith.constant 0 : i32
    %c0_i32_1 = arith.constant 0 : i32
    return %c0_i32, %c0_i32_0 : i32, i32
  }
  func.func @transform_2(%arg0: i32, %arg1: i32) -> (i32, i32) {
    %c0_i32 = arith.constant 0 : i32
    %c0_i32_0 = arith.constant 0 : i32
    %c0_i32_1 = arith.constant 0 : i32
    return %c0_i32, %c0_i32_0 : i32, i32
  }
  func.func @transform_3(%arg0: i32, %arg1: i32) -> (i32, i32, i32) {
    %c0_i32 = arith.constant 0 : i32
    %c0_i32_0 = arith.constant 0 : i32
    return %arg0, %c0_i32, %arg1 : i32, i32, i32
  }
}

module attributes {stable_mosaic.version = 11 : i64} {
  func.func @_conv_relu_pool_kernel(%arg0: i32, %arg1: i32, %arg2: memref<1x256x1024xbf16, #tpu.memory_space<vmem>>, %arg3: memref<128x256xbf16, #tpu.memory_space<vmem>>, %arg4: memref<32x1xf32, #tpu.memory_space<vmem>>, %arg5: memref<1x32x1024xbf16, #tpu.memory_space<vmem>>) attributes {dimension_semantics = [#tpu.dimension_semantics<parallel>, #tpu.dimension_semantics<parallel>], iteration_bounds = array<i64: 2, 1>, scalar_prefetch = 0 : i64, scratch_operands = 0 : i64, tpu.core_type = #tpu.core_type<tc>, window_params = [{transform_indices = @transform_0, window_bounds = array<i64: 1, 256, 1024>}, {pipeline_mode = #tpu.pipeline_mode<synchronous>, transform_indices = @transform_1, window_bounds = array<i64: 128, 256>}, {pipeline_mode = #tpu.pipeline_mode<synchronous>, transform_indices = @transform_2, window_bounds = array<i64: 32, 1>}, {transform_indices = @transform_3, window_bounds = array<i64: 1, 32, 1024>}]} {
    %c0 = arith.constant 0 : index
    %c0_0 = arith.constant 0 : index
    %c0_1 = arith.constant 0 : index
    %0 = vector.load %arg2[%c0, %c0_0, %c0_1] : memref<1x256x1024xbf16, #tpu.memory_space<vmem>>, vector<1x256x1024xbf16>
    %1 = vector.shape_cast %0 : vector<1x256x1024xbf16> to vector<256x1024xbf16>
    %c0_2 = arith.constant 0 : index
    %c0_3 = arith.constant 0 : index
    %2 = vector.load %arg3[%c0_2, %c0_3] : memref<128x256xbf16, #tpu.memory_space<vmem>>, vector<128x256xbf16>
    %cst = arith.constant dense<0.000000e+00> : vector<128x1024xf32>
    %3 = tpu.matmul %2, %1, %cst {dimension_numbers = #tpu.dot_dimension_numbers<[1], [0], [0], [1], [0, 0, 1, 1], [], []>} : vector<128x256xbf16>, vector<256x1024xbf16>, vector<128x1024xf32> -> vector<128x1024xf32>
    %4 = vector.extract_strided_slice %3 {offsets = [0, 0], sizes = [32, 1024], strides = [1, 1]} : vector<128x1024xf32> to vector<32x1024xf32>
    %5 = vector.extract_strided_slice %3 {offsets = [32, 0], sizes = [32, 1024], strides = [1, 1]} : vector<128x1024xf32> to vector<32x1024xf32>
    %6 = arith.maximumf %4, %5 : vector<32x1024xf32>
    %7 = vector.extract_strided_slice %3 {offsets = [64, 0], sizes = [32, 1024], strides = [1, 1]} : vector<128x1024xf32> to vector<32x1024xf32>
    %8 = vector.extract_strided_slice %3 {offsets = [96, 0], sizes = [32, 1024], strides = [1, 1]} : vector<128x1024xf32> to vector<32x1024xf32>
    %9 = arith.maximumf %7, %8 : vector<32x1024xf32>
    %10 = arith.maximumf %6, %9 : vector<32x1024xf32>
    %c0_4 = arith.constant 0 : index
    %c0_5 = arith.constant 0 : index
    %11 = vector.load %arg4[%c0_4, %c0_5] : memref<32x1xf32, #tpu.memory_space<vmem>>, vector<32x1xf32>
    %12 = vector.broadcast %11 : vector<32x1xf32> to vector<32x1024xf32>
    %13 = arith.addf %10, %12 : vector<32x1024xf32>
    %cst_6 = arith.constant 0.000000e+00 : f32
    %14 = vector.broadcast %cst_6 : f32 to vector<32x1024xf32>
    %15 = arith.maximumf %13, %14 : vector<32x1024xf32>
    %16 = arith.truncf %15 : vector<32x1024xf32> to vector<32x1024xbf16>
    %c0_7 = arith.constant 0 : index
    %c0_8 = arith.constant 0 : index
    %c0_9 = arith.constant 0 : index
    %17 = vector.load %arg5[%c0_7, %c0_8, %c0_9] : memref<1x32x1024xbf16, #tpu.memory_space<vmem>>, vector<1x32x1024xbf16>
    %18 = vector.shape_cast %17 : vector<1x32x1024xbf16> to vector<32x1024xbf16>
    %19 = vector.shape_cast %16 : vector<32x1024xbf16> to vector<1x32x1024xbf16>
    tpu.vector_store %arg5[%c0_7, %c0_8, %c0_9], %19 {strides = array<i32>} : memref<1x32x1024xbf16, #tpu.memory_space<vmem>>, vector<1x32x1024xbf16>,
    return
  }
  func.func @transform_0(%arg0: i32, %arg1: i32) -> (i32, i32, i32) {
    %c0_i32 = arith.constant 0 : i32
    %c0_i32_0 = arith.constant 0 : i32
    return %arg0, %c0_i32, %arg1 : i32, i32, i32
  }
  func.func @transform_1(%arg0: i32, %arg1: i32) -> (i32, i32) {
    %c0_i32 = arith.constant 0 : i32
    %c0_i32_0 = arith.constant 0 : i32
    %c0_i32_1 = arith.constant 0 : i32
    return %c0_i32, %c0_i32_0 : i32, i32
  }
  func.func @transform_2(%arg0: i32, %arg1: i32) -> (i32, i32) {
    %c0_i32 = arith.constant 0 : i32
    %c0_i32_0 = arith.constant 0 : i32
    %c0_i32_1 = arith.constant 0 : i32
    return %c0_i32, %c0_i32_0 : i32, i32
  }
  func.func @transform_3(%arg0: i32, %arg1: i32) -> (i32, i32, i32) {
    %c0_i32 = arith.constant 0 : i32
    %c0_i32_0 = arith.constant 0 : i32
    return %arg0, %c0_i32, %arg1 : i32, i32, i32
  }
}

module attributes {stable_mosaic.version = 11 : i64} {
  func.func @_mlp_head_kernel(%arg0: i32, %arg1: i32, %arg2: memref<2x4096xbf16, #tpu.memory_space<vmem>>, %arg3: memref<1x4096x64xbf16, #tpu.memory_space<vmem>>, %arg4: memref<1x1x64xf32, #tpu.memory_space<vmem>>, %arg5: memref<1x64x4xf32, #tpu.memory_space<vmem>>, %arg6: memref<1x2x4xf32, #tpu.memory_space<vmem>>, %arg7: memref<2x64xf32, #tpu.memory_space<vmem>>) attributes {dimension_semantics = [#tpu.dimension_semantics<parallel>, #tpu.dimension_semantics<arbitrary>], iteration_bounds = array<i64: 2, 8>, scalar_prefetch = 0 : i64, scratch_operands = 1 : i64, tpu.core_type = #tpu.core_type<tc>, window_params = [{transform_indices = @transform_0, window_bounds = array<i64: 2, 4096>}, {transform_indices = @transform_1, window_bounds = array<i64: 1, 4096, 64>}, {transform_indices = @transform_2, window_bounds = array<i64: 1, 1, 64>}, {transform_indices = @transform_3, window_bounds = array<i64: 1, 64, 4>}, {transform_indices = @transform_4, window_bounds = array<i64: 1, 2, 4>}]} {
    %c0_i32 = arith.constant 0 : i32
    %0 = arith.cmpi eq, %arg1, %c0_i32 : i32
    %1 = arith.extui %0 : i1 to i32
    %c0_i32_0 = arith.constant 0 : i32
    %2 = arith.cmpi ne, %1, %c0_i32_0 : i32
    scf.if %2 {
      %cst_10 = arith.constant 0.000000e+00 : f32
      %13 = vector.broadcast %cst_10 : f32 to vector<2x64xf32>
      %c0_11 = arith.constant 0 : index
      %c0_12 = arith.constant 0 : index
      %14 = vector.load %arg7[%c0_11, %c0_12] : memref<2x64xf32, #tpu.memory_space<vmem>>, vector<2x64xf32>
      tpu.vector_store %arg7[%c0_11, %c0_12], %13 {strides = array<i32>} : memref<2x64xf32, #tpu.memory_space<vmem>>, vector<2x64xf32>,
    } else {
    }
    %c0 = arith.constant 0 : index
    %c0_1 = arith.constant 0 : index
    %3 = vector.load %arg7[%c0, %c0_1] : memref<2x64xf32, #tpu.memory_space<vmem>>, vector<2x64xf32>
    %c0_2 = arith.constant 0 : index
    %c0_3 = arith.constant 0 : index
    %4 = vector.load %arg2[%c0_2, %c0_3] : memref<2x4096xbf16, #tpu.memory_space<vmem>>, vector<2x4096xbf16>
    %c0_4 = arith.constant 0 : index
    %c0_5 = arith.constant 0 : index
    %c0_6 = arith.constant 0 : index
    %5 = vector.load %arg3[%c0_4, %c0_5, %c0_6] : memref<1x4096x64xbf16, #tpu.memory_space<vmem>>, vector<1x4096x64xbf16>
    %6 = vector.shape_cast %5 : vector<1x4096x64xbf16> to vector<4096x64xbf16>
    %cst = arith.constant dense<0.000000e+00> : vector<2x64xf32>
    %7 = tpu.matmul %4, %6, %cst {dimension_numbers = #tpu.dot_dimension_numbers<[1], [0], [0], [1], [0, 0, 1, 1], [], []>} : vector<2x4096xbf16>, vector<4096x64xbf16>, vector<2x64xf32> -> vector<2x64xf32>
    %8 = arith.addf %3, %7 : vector<2x64xf32>
    %c0_7 = arith.constant 0 : index
    %c0_8 = arith.constant 0 : index
    %9 = vector.load %arg7[%c0_7, %c0_8] : memref<2x64xf32, #tpu.memory_space<vmem>>, vector<2x64xf32>
    tpu.vector_store %arg7[%c0_7, %c0_8], %8 {strides = array<i32>} : memref<2x64xf32, #tpu.memory_space<vmem>>, vector<2x64xf32>,
    %c7_i32 = arith.constant 7 : i32
    %10 = arith.cmpi eq, %arg1, %c7_i32 : i32
    %11 = arith.extui %10 : i1 to i32
    %c0_i32_9 = arith.constant 0 : i32
    %12 = arith.cmpi ne, %11, %c0_i32_9 : i32
    scf.if %12 {
      %c0_10 = arith.constant 0 : index
      %c0_11 = arith.constant 0 : index
      %13 = vector.load %arg7[%c0_10, %c0_11] : memref<2x64xf32, #tpu.memory_space<vmem>>, vector<2x64xf32>
      %c0_12 = arith.constant 0 : index
      %c0_13 = arith.constant 0 : index
      %c0_14 = arith.constant 0 : index
      %14 = vector.load %arg4[%c0_12, %c0_13, %c0_14] : memref<1x1x64xf32, #tpu.memory_space<vmem>>, vector<1x1x64xf32>
      %15 = vector.shape_cast %14 : vector<1x1x64xf32> to vector<1x64xf32>
      %16 = vector.broadcast %15 : vector<1x64xf32> to vector<2x64xf32>
      %17 = arith.addf %13, %16 : vector<2x64xf32>
      %cst_15 = arith.constant 0.000000e+00 : f32
      %18 = vector.broadcast %cst_15 : f32 to vector<2x64xf32>
      %19 = arith.maximumf %17, %18 : vector<2x64xf32>
      %c0_16 = arith.constant 0 : index
      %c0_17 = arith.constant 0 : index
      %c0_18 = arith.constant 0 : index
      %20 = vector.load %arg5[%c0_16, %c0_17, %c0_18] : memref<1x64x4xf32, #tpu.memory_space<vmem>>, vector<1x64x4xf32>
      %21 = vector.shape_cast %20 : vector<1x64x4xf32> to vector<64x4xf32>
      %cst_19 = arith.constant dense<0.000000e+00> : vector<2x4xf32>
      %22 = tpu.matmul %19, %21, %cst_19 {dimension_numbers = #tpu.dot_dimension_numbers<[1], [0], [0], [1], [0, 0, 1, 1], [], []>} : vector<2x64xf32>, vector<64x4xf32>, vector<2x4xf32> -> vector<2x4xf32>
      %c0_20 = arith.constant 0 : index
      %c0_21 = arith.constant 0 : index
      %c0_22 = arith.constant 0 : index
      %23 = vector.load %arg6[%c0_20, %c0_21, %c0_22] : memref<1x2x4xf32, #tpu.memory_space<vmem>>, vector<1x2x4xf32>
      %24 = vector.shape_cast %23 : vector<1x2x4xf32> to vector<2x4xf32>
      %25 = vector.shape_cast %22 : vector<2x4xf32> to vector<1x2x4xf32>
      tpu.vector_store %arg6[%c0_20, %c0_21, %c0_22], %25 {strides = array<i32>} : memref<1x2x4xf32, #tpu.memory_space<vmem>>, vector<1x2x4xf32>,
    } else {
    }
    return
  }
  func.func @transform_0(%arg0: i32, %arg1: i32) -> (i32, i32) {
    %c0_i32 = arith.constant 0 : i32
    %c0_i32_0 = arith.constant 0 : i32
    return %c0_i32, %arg1 : i32, i32
  }
  func.func @transform_1(%arg0: i32, %arg1: i32) -> (i32, i32, i32) {
    %c0_i32 = arith.constant 0 : i32
    %c0_i32_0 = arith.constant 0 : i32
    return %arg0, %arg1, %c0_i32 : i32, i32, i32
  }
  func.func @transform_2(%arg0: i32, %arg1: i32) -> (i32, i32, i32) {
    %c0_i32 = arith.constant 0 : i32
    %c0_i32_0 = arith.constant 0 : i32
    %c0_i32_1 = arith.constant 0 : i32
    return %arg0, %c0_i32, %c0_i32_0 : i32, i32, i32
  }
  func.func @transform_3(%arg0: i32, %arg1: i32) -> (i32, i32, i32) {
    %c0_i32 = arith.constant 0 : i32
    %c0_i32_0 = arith.constant 0 : i32
    %c0_i32_1 = arith.constant 0 : i32
    return %arg0, %c0_i32, %c0_i32_0 : i32, i32, i32
  }
  func.func @transform_4(%arg0: i32, %arg1: i32) -> (i32, i32, i32) {
    %c0_i32 = arith.constant 0 : i32
    %c0_i32_0 = arith.constant 0 : i32
    %c0_i32_1 = arith.constant 0 : i32
    return %arg0, %c0_i32, %c0_i32_0 : i32, i32, i32
  }
}

</mosaic_0001>

<bundles_post_ra>
// kernel: laryngeal_cnn_forward.3
= control target key start
LH: loop header
LB: loop body
LE: loop exit
PB: predicated region body
PF: predicated region fallthrough
CT: control target
= control target key end

     0   :  { %s1902_s12 = smov 0   ;;  %s1904_s13 = smov 0   ;;  %s2345_s0 = inlined_call_operand.vmem [shape: bf16[2,48,4096], index: 0, kind: input, shape index: {}]   ;;  %s2346_s1 = inlined_call_operand.vmem [shape: bf16[64,48], index: 1, kind: input, shape index: {}]   ;;  %s2347_s2 = inlined_call_operand.vmem [shape: f32[16,1], index: 2, kind: input, shape index: {}]   ;;  %s2348_s3 = inlined_call_operand.vmem [shape: bf16[2,16,4096], index: 3, kind: output, shape index: {}]  }
   0x1   :  { %s1906_s14 = smov 0   ;;  %s1908_s15 = smov 0  }
   0x2   :  { %s1910_s16 = smov 0   ;;  %s1912_s17 = smov 0  }
   0x3   :  { %s1914_s18 = smov 0  }
   0x4 LB: > { %s22_s19 = sadd.s32 1, %s1871_s16  ;;  %s25_s20 = sadd.s32 1, %s1875_s17  ;;  %s1879_s18 = sphi %s1914_s18, %s13_s18   ;;  %s1875_s17 = sphi %s1912_s17, %s2355_s17   ;;  %s1871_s16 = sphi %s1910_s16, %s2354_s16   ;;  %s1867_s15 = sphi %s1908_s15, %s2353_s15   ;;  %s1863_s14 = sphi %s1906_s14, %s2352_s14   ;;  %s1859_s13 = sphi %s1904_s13, %s2351_s13   ;;  %s1855_s12 = sphi %s1902_s12, %s2350_s12  }
   0x5   : > { %p23_p0 = scmp.ge.s32.totalorder %s22_s19, 2  ;;  %s1630_s21 = sadd.s32 4294967295, %s1879_s18  }
   0x6   : > { %p41_p1 = scmp.ne.s32.totalorder %s1859_s13, %s1855_s12  ;;  %p42_p2 = scmp.eq.s32.totalorder %s1879_s18, 0 }
   0x7   : > { %s2357_s19 = smov (%p23_p0, %s22_s19), 0  ;;  %s2359_s20 = smov (!%p23_p0, %s25_s20), %s1875_s17 }
   0x8   : > { %p27_p3 = scmp.ge.s32.totalorder %s2359_s20, 2  ;;  %p115_p4 = scmp.eq.s32.totalorder %s1630_s21, 3 }
   0x9   : > { %s30_s22 = ssub.s32 %s1871_s16, %s2357_s19  ;;  %p43_p5 = por %p42_p2, %p41_p1 }
   0xa   : > { %s2361_s20 = smov (%p27_p3, %s2359_s20), 0  ;;  %p1950_p6 = por %p115_p4, %p41_p1 }
   0xb   : > { %s29_s24 = ssub.s32 %s1875_s17, %s2361_s20  ;;  %s34_s26 = sadd.s32 1, %s1859_s13 }
   0xc   : > { %s31_s25 = sor.u32 %s30_s22, %s29_s24  ;;  %p1633_p8 = scmp.ge.s32.totalorder %s1879_s18, 4 }
   0xd   : > { %p32_p7 = scmp.eq.s32.totalorder %s31_s25, 0 }
   0xe   : > { %143 = sbr.rel (%p1633_p8) target bundleno = 53 (0x35), region = 24 }
   0xf   : > { %s1958_s27 = scalar_select %p32_p7, %s1859_s13, %s34_s26  }
  0x15   : > { %146 = sbr.rel (!%p43_p5) target bundleno = 53 (0x35), region = 28  ;;  %s148_s28 = sand.u32 (%p43_p5), 1, %s1859_s13  }
  0x16   : > { %s1760_s29 = smul.u32 (%p43_p5), 384, %s148_s28  ;;  %s1634_s30 = sshll.u32 (%p43_p5), %s1871_s16, 4 }
  0x17   : > { %s1761_s4 = smul.u32 (%p43_p5), 192, %s1875_s17 }
  0x18   : > { %s1972_s10 = scalar_lea.vmem (%p43_p5), [#allocation2], %s1760_s29 }
  0x19   : > { %s153_s5 = sadd.s32 (%p43_p5), %s1761_s4, %s1634_s30 }
  0x1a   : > { %s1635_s6 = sshll.u32 (%p43_p5), %s153_s5, 2 }
  0x1b   : > { %s1967_s9 = scalar_lea.vmem (%p43_p5), %s2345_s0, %s1635_s6 }
  0x1c   : > { %v168_v0 = vld [vmem:[%s1967_s9] sm:$0xff]  ;;  %v170_v1 = vld [vmem:[%s1967_s9 + $0x8] sm:$0xff]  ;;  %v172_v2 = vld [vmem:[%s1967_s9 + $0x10] sm:$0xff] }
  0x1d   : > { %169 = vst [vmem:[%s1972_s10] sm:$0xff] %v168_v0  ;;  %171 = vst [vmem:[%s1972_s10 + $0x8] sm:$0xff] %v170_v1  ;;  %v174_v3 = vld [vmem:[%s1967_s9 + $0x18] sm:$0xff]  ;;  %v176_v4 = vld [vmem:[%s1967_s9 + $0x20] sm:$0xff] }
  0x1e   : > { %173 = vst [vmem:[%s1972_s10 + $0x10] sm:$0xff] %v172_v2  ;;  %v178_v5 = vld [vmem:[%s1967_s9 + $0x28] sm:$0xff]  ;;  %175 = vst [vmem:[%s1972_s10 + $0x18] sm:$0xff] %v174_v3  ;;  %v180_v6 = vld [vmem:[%s1967_s9 + $0x30] sm:$0xff] }
  0x1f   : > { %177 = vst [vmem:[%s1972_s10 + $0x20] sm:$0xff] %v176_v4  ;;  %179 = vst [vmem:[%s1972_s10 + $0x28] sm:$0xff] %v178_v5  ;;  %v182_v7 = vld [vmem:[%s1967_s9 + $0x38] sm:$0xff]  ;;  %v184_v8 = vld [vmem:[%s1967_s9 + $0x80] sm:$0xff] }
  0x20   : > { %181 = vst [vmem:[%s1972_s10 + $0x30] sm:$0xff] %v180_v6  ;;  %183 = vst [vmem:[%s1972_s10 + $0x38] sm:$0xff] %v182_v7  ;;  %v186_v9 = vld [vmem:[%s1967_s9 + $0x88] sm:$0xff]  ;;  %v188_v10 = vld [vmem:[%s1967_s9 + $0x90] sm:$0xff] }
  0x21   : > { %185 = vst [vmem:[%s1972_s10 + $0x40] sm:$0xff] %v184_v8  ;;  %v190_v11 = vld [vmem:[%s1967_s9 + $0x98] sm:$0xff]  ;;  %187 = vst [vmem:[%s1972_s10 + $0x48] sm:$0xff] %v186_v9  ;;  %v192_v12 = vld [vmem:[%s1967_s9 + $0xa0] sm:$0xff] }
  0x22   : > { %189 = vst [vmem:[%s1972_s10 + $0x50] sm:$0xff] %v188_v10  ;;  %191 = vst [vmem:[%s1972_s10 + $0x58] sm:$0xff] %v190_v11  ;;  %v194_v13 = vld [vmem:[%s1967_s9 + $0xa8] sm:$0xff]  ;;  %v196_v14 = vld [vmem:[%s1967_s9 + $0xb0] sm:$0xff] }
  0x23   : > { %193 = vst [vmem:[%s1972_s10 + $0x60] sm:$0xff] %v192_v12  ;;  %195 = vst [vmem:[%s1972_s10 + $0x68] sm:$0xff] %v194_v13  ;;  %v198_v15 = vld [vmem:[%s1967_s9 + $0xb8] sm:$0xff]  ;;  %v200_v16 = vld [vmem:[%s1967_s9 + $0x100] sm:$0xff] }
  0x24   : > { %197 = vst [vmem:[%s1972_s10 + $0x70] sm:$0xff] %v196_v14  ;;  %v202_v17 = vld [vmem:[%s1967_s9 + $0x108] sm:$0xff]  ;;  %199 = vst [vmem:[%s1972_s10 + $0x78] sm:$0xff] %v198_v15  ;;  %v204_v18 = vld [vmem:[%s1967_s9 + $0x110] sm:$0xff] }
  0x25   : > { %201 = vst [vmem:[%s1972_s10 + $0x80] sm:$0xff] %v200_v16  ;;  %203 = vst [vmem:[%s1972_s10 + $0x88] sm:$0xff] %v202_v17  ;;  %v206_v19 = vld [vmem:[%s1967_s9 + $0x118] sm:$0xff]  ;;  %v208_v20 = vld [vmem:[%s1967_s9 + $0x120] sm:$0xff] }
  0x26   : > { %205 = vst [vmem:[%s1972_s10 + $0x90] sm:$0xff] %v204_v18  ;;  %207 = vst [vmem:[%s1972_s10 + $0x98] sm:$0xff] %v206_v19  ;;  %v210_v21 = vld [vmem:[%s1967_s9 + $0x128] sm:$0xff]  ;;  %v212_v22 = vld [vmem:[%s1967_s9 + $0x130] sm:$0xff] }
  0x27   : > { %209 = vst [vmem:[%s1972_s10 + $0xa0] sm:$0xff] %v208_v20  ;;  %v214_v23 = vld [vmem:[%s1967_s9 + $0x138] sm:$0xff]  ;;  %211 = vst [vmem:[%s1972_s10 + $0xa8] sm:$0xff] %v210_v21  ;;  %v216_v24 = vld [vmem:[%s1967_s9 + $0x180] sm:$0xff] }
  0x28   : > { %213 = vst [vmem:[%s1972_s10 + $0xb0] sm:$0xff] %v212_v22  ;;  %215 = vst [vmem:[%s1972_s10 + $0xb8] sm:$0xff] %v214_v23  ;;  %v218_v25 = vld [vmem:[%s1967_s9 + $0x188] sm:$0xff]  ;;  %v220_v26 = vld [vmem:[%s1967_s9 + $0x190] sm:$0xff] }
  0x29   : > { %217 = vst [vmem:[%s1972_s10 + $0xc0] sm:$0xff] %v216_v24  ;;  %219 = vst [vmem:[%s1972_s10 + $0xc8] sm:$0xff] %v218_v25  ;;  %v222_v27 = vld [vmem:[%s1967_s9 + $0x198] sm:$0xff]  ;;  %v224_v28 = vld [vmem:[%s1967_s9 + $0x1a0] sm:$0xff] }
  0x2a   : > { %221 = vst [vmem:[%s1972_s10 + $0xd0] sm:$0xff] %v220_v26  ;;  %v226_v29 = vld [vmem:[%s1967_s9 + $0x1a8] sm:$0xff]  ;;  %223 = vst [vmem:[%s1972_s10 + $0xd8] sm:$0xff] %v222_v27  ;;  %v228_v30 = vld [vmem:[%s1967_s9 + $0x1b0] sm:$0xff] }
  0x2b   : > { %225 = vst [vmem:[%s1972_s10 + $0xe0] sm:$0xff] %v224_v28  ;;  %227 = vst [vmem:[%s1972_s10 + $0xe8] sm:$0xff] %v226_v29  ;;  %v230_v31 = vld [vmem:[%s1967_s9 + $0x1b8] sm:$0xff]  ;;  %v232_v32 = vld [vmem:[%s1967_s9 + $0x200] sm:$0xff] }
  0x2c   : > { %229 = vst [vmem:[%s1972_s10 + $0xf0] sm:$0xff] %v228_v30  ;;  %231 = vst [vmem:[%s1972_s10 + $0xf8] sm:$0xff] %v230_v31  ;;  %v234_v33 = vld [vmem:[%s1967_s9 + $0x208] sm:$0xff]  ;;  %v236_v34 = vld [vmem:[%s1967_s9 + $0x210] sm:$0xff] }
  0x2d   : > { %233 = vst [vmem:[%s1972_s10 + $0x100] sm:$0xff] %v232_v32  ;;  %v238_v35 = vld [vmem:[%s1967_s9 + $0x218] sm:$0xff]  ;;  %235 = vst [vmem:[%s1972_s10 + $0x108] sm:$0xff] %v234_v33  ;;  %v240_v36 = vld [vmem:[%s1967_s9 + $0x220] sm:$0xff] }
  0x2e   : > { %237 = vst [vmem:[%s1972_s10 + $0x110] sm:$0xff] %v236_v34  ;;  %239 = vst [vmem:[%s1972_s10 + $0x118] sm:$0xff] %v238_v35  ;;  %v242_v37 = vld [vmem:[%s1967_s9 + $0x228] sm:$0xff]  ;;  %v244_v38 = vld [vmem:[%s1967_s9 + $0x230] sm:$0xff] }
  0x2f   : > { %241 = vst [vmem:[%s1972_s10 + $0x120] sm:$0xff] %v240_v36  ;;  %243 = vst [vmem:[%s1972_s10 + $0x128] sm:$0xff] %v242_v37  ;;  %v246_v39 = vld [vmem:[%s1967_s9 + $0x238] sm:$0xff]  ;;  %v248_v40 = vld [vmem:[%s1967_s9 + $0x280] sm:$0xff] }
  0x30   : > { %245 = vst [vmem:[%s1972_s10 + $0x130] sm:$0xff] %v244_v38  ;;  %v250_v41 = vld [vmem:[%s1967_s9 + $0x288] sm:$0xff]  ;;  %247 = vst [vmem:[%s1972_s10 + $0x138] sm:$0xff] %v246_v39  ;;  %v252_v42 = vld [vmem:[%s1967_s9 + $0x290] sm:$0xff] }
  0x31   : > { %249 = vst [vmem:[%s1972_s10 + $0x140] sm:$0xff] %v248_v40  ;;  %251 = vst [vmem:[%s1972_s10 + $0x148] sm:$0xff] %v250_v41  ;;  %v254_v43 = vld [vmem:[%s1967_s9 + $0x298] sm:$0xff]  ;;  %v256_v44 = vld [vmem:[%s1967_s9 + $0x2a0] sm:$0xff] }
  0x32   : > { %253 = vst [vmem:[%s1972_s10 + $0x150] sm:$0xff] %v252_v42  ;;  %255 = vst [vmem:[%s1972_s10 + $0x158] sm:$0xff] %v254_v43  ;;  %v258_v45 = vld [vmem:[%s1967_s9 + $0x2a8] sm:$0xff]  ;;  %v260_v46 = vld [vmem:[%s1967_s9 + $0x2b0] sm:$0xff] }
  0x33   : > { %257 = vst [vmem:[%s1972_s10 + $0x160] sm:$0xff] %v256_v44  ;;  %v262_v47 = vld [vmem:[%s1967_s9 + $0x2b8] sm:$0xff]  ;;  %259 = vst [vmem:[%s1972_s10 + $0x168] sm:$0xff] %v258_v45 }
  0x34   : > { %261 = vst [vmem:[%s1972_s10 + $0x170] sm:$0xff] %v260_v46  ;;  %263 = vst [vmem:[%s1972_s10 + $0x178] sm:$0xff] %v262_v47 }
  0x35 PF: > { %p1636_p9 = scmp.ge.s32.totalorder %s1879_s18, 1  ;;  %p268_p10 = scmp.lt.s32.totalorder %s1879_s18, 5 }
  0x37   : > { %p269_p11 = pnand %p1636_p9, %p268_p10 }
  0x38   : > { %s275_s11 = sand.u32 (!%p269_p11), 1, %s1855_s12   ;;  %v1881_v48 = vmov (!%p269_p11), 0   ;;  %v2096_v15 = vld [vmem:[%s2346_s1] sm:$0xff] (!%p269_p11)   ;;  %vm616_vm0 = vcmask (!%p269_p11), 392192   ;;  %v2118_v33 = vld [vmem:[%s2346_s1 + $0x8] sm:$0xff] (!%p269_p11)   ;;  %v2136_v43 = vld [vmem:[%s2346_s1 + $0x10] sm:$0xff] (!%p269_p11)  }
  0x39   : > { %272 = sbr.rel (%p269_p11) target bundleno = 431 (0x1af), region = 51  ;;  %661 = vmatprep.mubr.bf16.mxu0 (!%p269_p11), %v1881_v48  ;;  %734 = vmatprep.mubr.bf16.mxu1 (!%p269_p11), %v1881_v48  ;;  %v1309_v29 = vld [vmem:[%s2347_s2] sm:$0xff] (!%p269_p11)  ;;  %v1310_v38 = vld [vmem:[%s2347_s2 + $0x8] sm:$0xff] (!%p269_p11)  ;;  %v2147_v44 = vld [vmem:[%s2346_s1 + $0x18] sm:$0xff] (!%p269_p11)   ;;  %s1637_s10 = sshll.u32 (!%p269_p11), %s275_s11, 7 }
  0x3a   : > { %s1762_s21 = smul.u32 (!%p269_p11), 384, %s275_s11  ;;  %1820 = vset.pattern.permute.xlu0 (!%p269_p11), %v1881_v48  ;;  %s2259_s12 = scalar_lea.vmem (!%p269_p11), [#allocation3], %s1637_s10 }
  0x3b   : > { %1313 = vperm.xlu0 (!%p269_p11), %1820, %v1309_v29  }
  0x3c   : > { %s2075_s22 = scalar_lea.vmem (!%p269_p11), [#allocation2], %s1762_s21 }
  0x3d   : > { %v300_v49 = vld [vmem:[%s2075_s22] sm:$0xff] (!%p269_p11)  ;;  %v301_v51 = vld [vmem:[%s2075_s22 + $0x8] sm:$0xff] (!%p269_p11)  ;;  %v302_v7 = vld [vmem:[%s2075_s22 + $0x10] sm:$0xff] (!%p269_p11) }
  0x3e   : > { %v308_v50 = vld [vmem:[%s2075_s22 + $0x40] sm:$0xff] (!%p269_p11)  ;;  %v309_v53 = vld [vmem:[%s2075_s22 + $0x48] sm:$0xff] (!%p269_p11)  ;;  %v310_v8 = vld [vmem:[%s2075_s22 + $0x50] sm:$0xff] (!%p269_p11) }
  0x3f   : > { %v1643_v52 = vcombine.high (!%p269_p11), %v300_v49, %v308_v50  ;;  %v1642_v54 = vcombine.low (!%p269_p11), %v300_v49, %v308_v50  ;;  %v316_v55 = vld [vmem:[%s2075_s22 + $0x80] sm:$0xff] (!%p269_p11)  ;;  %v1645_v57 = vcombine.high (!%p269_p11), %v301_v51, %v309_v53  ;;  %v1644_v58 = vcombine.low (!%p269_p11), %v301_v51, %v309_v53  ;;  %v317_v60 = vld [vmem:[%s2075_s22 + $0x88] sm:$0xff] (!%p269_p11)  ;;  %v303_v9 = vld [vmem:[%s2075_s22 + $0x18] sm:$0xff] (!%p269_p11)  ;;  %1318 = vperm.xlu0 (!%p269_p11), %1820, %v1310_v38  }
  0x40   : > { %v324_v56 = vld [vmem:[%s2075_s22 + $0xc0] sm:$0xff]  ;;  %v325_v61 = vld [vmem:[%s2075_s22 + $0xc8] sm:$0xff]  ;;  %v311_v10 = vld [vmem:[%s2075_s22 + $0x58] sm:$0xff]  ;;  %v1647_v13 = vcombine.high %v302_v7, %v310_v8  ;;  %v1646_v18 = vcombine.low %v302_v7, %v310_v8  ;;  %s1739_s11 = sshll.u32 (%p1950_p6), %s1863_s14, 4  ;;  %s1740_s21 = sshll.u32 (%p1950_p6), %s1867_s15, 6 }
  0x41   : > { %v1659_v59 = vcombine.high %v316_v55, %v324_v56  ;;  %v332_v62 = vld [vmem:[%s2075_s22 + $0x100] sm:$0xff]  ;;  %629 = vmatprep.subr.bf16.mxu0 %v1643_v52  ;;  %v1661_v63 = vcombine.high %v317_v60, %v325_v61  ;;  %v333_v1 = vld [vmem:[%s2075_s22 + $0x108] sm:$0xff]  ;;  %702 = vmatprep.subr.bf16.mxu1 %v1645_v57  ;;  %v1658_v3 = vcombine.low %v316_v55, %v324_v56  ;;  %v318_v16 = vld [vmem:[%s2075_s22 + $0x90] sm:$0xff]  ;;  %s1506_s23 = sadd.s32 (%p1950_p6), %s1740_s21, %s1739_s11 }
  0x42   : > { %v340_v0 = vld [vmem:[%s2075_s22 + $0x140] sm:$0xff]  ;;  %v341_v2 = vld [vmem:[%s2075_s22 + $0x148] sm:$0xff]  ;;  %630 = vmatpush1.bf16.msra.mxu0 %v1642_v54  ;;  %703 = vmatpush1.bf16.msra.mxu1 %v1644_v58  ;;  %v1660_v4 = vcombine.low %v317_v60, %v325_v61  ;;  %v1649_v14 = vcombine.high %v303_v9, %v311_v10  ;;  %v326_v17 = vld [vmem:[%s2075_s22 + $0xd0] sm:$0xff]  ;;  %v1648_v21 = vcombine.low %v303_v9, %v311_v10 }
  0x43   : > { %631 = vmatprep.subr.bf16.mxu0 %v1659_v59  ;;  %v1675_v5 = vcombine.high %v332_v62, %v340_v0  ;;  %704 = vmatprep.subr.bf16.mxu1 %v1661_v63  ;;  %v1677_v6 = vcombine.high %v333_v1, %v341_v2  ;;  %v1674_v11 = vcombine.low %v332_v62, %v340_v0  ;;  %v319_v19 = vld [vmem:[%s2075_s22 + $0x98] sm:$0xff]  ;;  %v334_v23 = vld [vmem:[%s2075_s22 + $0x110] sm:$0xff]  ;;  %v304_v34 = vld [vmem:[%s2075_s22 + $0x20] sm:$0xff] }
  0x44   : > { %v1676_v12 = vcombine.low %v333_v1, %v341_v2  ;;  %v327_v20 = vld [vmem:[%s2075_s22 + $0xd8] sm:$0xff]  ;;  %v1663_v22 = vcombine.high %v318_v16, %v326_v17  ;;  %v342_v24 = vld [vmem:[%s2075_s22 + $0x150] sm:$0xff]  ;;  %v1662_v28 = vcombine.low %v318_v16, %v326_v17  ;;  %v312_v35 = vld [vmem:[%s2075_s22 + $0x60] sm:$0xff] }
  0x45   : > { %v1665_v25 = vcombine.high %v319_v19, %v327_v20  ;;  %v335_v26 = vld [vmem:[%s2075_s22 + $0x118] sm:$0xff]  ;;  %v1664_v30 = vcombine.low %v319_v19, %v327_v20  ;;  %v1679_v31 = vcombine.high %v334_v23, %v342_v24  ;;  %v305_v36 = vld [vmem:[%s2075_s22 + $0x28] sm:$0xff]  ;;  %v1678_v39 = vcombine.low %v334_v23, %v342_v24  ;;  %v320_v45 = vld [vmem:[%s2075_s22 + $0xa0] sm:$0xff] }
  0x46   : > { %632 = vmatpush1.bf16.msra.mxu0 %v1658_v3  ;;  %705 = vmatpush1.bf16.msra.mxu1 %v1660_v4  ;;  %v343_v27 = vld [vmem:[%s2075_s22 + $0x158] sm:$0xff]  ;;  %v313_v37 = vld [vmem:[%s2075_s22 + $0x68] sm:$0xff]  ;;  %v1651_v41 = vcombine.high %v304_v34, %v312_v35  ;;  %v328_v46 = vld [vmem:[%s2075_s22 + $0xe0] sm:$0xff]  ;;  %v1650_v47 = vcombine.low %v304_v34, %v312_v35 }
  0x47   : > { %633 = vmatprep.subr.bf16.mxu0 %v1675_v5  ;;  %706 = vmatprep.subr.bf16.mxu1 %v1677_v6  ;;  %v1681_v32 = vcombine.high %v335_v26, %v343_v27  ;;  %v1680_v40 = vcombine.low %v335_v26, %v343_v27  ;;  %v1653_v42 = vcombine.high %v305_v36, %v313_v37  ;;  %v321_v49 = vld [vmem:[%s2075_s22 + $0xa8] sm:$0xff]  ;;  %v336_v53 = vld [vmem:[%s2075_s22 + $0x120] sm:$0xff]  ;;  %v306_v62 = vld [vmem:[%s2075_s22 + $0x30] sm:$0xff] }
  0x48   : > { %v329_v50 = vld [vmem:[%s2075_s22 + $0xe8] sm:$0xff]  ;;  %v1652_v51 = vcombine.low %v305_v36, %v313_v37  ;;  %v1667_v52 = vcombine.high %v320_v45, %v328_v46  ;;  %v344_v54 = vld [vmem:[%s2075_s22 + $0x160] sm:$0xff]  ;;  %v1666_v58 = vcombine.low %v320_v45, %v328_v46  ;;  %v314_v63 = vld [vmem:[%s2075_s22 + $0x70] sm:$0xff] }
  0x49   : > { %v1669_v55 = vcombine.high %v321_v49, %v329_v50  ;;  %v337_v56 = vld [vmem:[%s2075_s22 + $0x128] sm:$0xff]  ;;  %v1668_v59 = vcombine.low %v321_v49, %v329_v50  ;;  %v1683_v60 = vcombine.high %v336_v53, %v344_v54  ;;  %v307_v0 = vld [vmem:[%s2075_s22 + $0x38] sm:$0xff]  ;;  %v1682_v2 = vcombine.low %v336_v53, %v344_v54  ;;  %v322_v6 = vld [vmem:[%s2075_s22 + $0xb0] sm:$0xff] }
  0x4a   : > { %634 = vmatpush1.bf16.msra.mxu0 %v1674_v11  ;;  %707 = vmatpush1.bf16.msra.mxu1 %v1676_v12  ;;  %v345_v57 = vld [vmem:[%s2075_s22 + $0x168] sm:$0xff]  ;;  %v315_v1 = vld [vmem:[%s2075_s22 + $0x78] sm:$0xff]  ;;  %v1655_v4 = vcombine.high %v306_v62, %v314_v63  ;;  %v330_v7 = vld [vmem:[%s2075_s22 + $0xf0] sm:$0xff]  ;;  %v1654_v8 = vcombine.low %v306_v62, %v314_v63 }
  0x4b   : > { %775 = vmatprep.subr.bf16.mxu0 %v1647_v13  ;;  %848 = vmatprep.subr.bf16.mxu1 %v1649_v14  ;;  %v1685_v61 = vcombine.high %v337_v56, %v345_v57  ;;  %v1684_v3 = vcombine.low %v337_v56, %v345_v57  ;;  %v1657_v5 = vcombine.high %v307_v0, %v315_v1  ;;  %v323_v9 = vld [vmem:[%s2075_s22 + $0xb8] sm:$0xff]  ;;  %v338_v13 = vld [vmem:[%s2075_s22 + $0x130] sm:$0xff] }
  0x4c   : > { %v331_v10 = vld [vmem:[%s2075_s22 + $0xf8] sm:$0xff]  ;;  %v1656_v11 = vcombine.low %v307_v0, %v315_v1  ;;  %v1671_v12 = vcombine.high %v322_v6, %v330_v7  ;;  %v346_v14 = vld [vmem:[%s2075_s22 + $0x170] sm:$0xff]  ;;  %v1670_v19 = vcombine.low %v322_v6, %v330_v7 }
  0x4d   : > { %1690 = vmatmul.mubr.msk.bf16.vlgmr.msra.gmra.mrb[0].mxu0 %vm616_vm0, %v2096_v15  ;;  %1694 = vmatmul.mubr.msk.bf16.vlgmr.msra.gmra.mrb[0].mxu1 %vm616_vm0, %v2096_v15  ;;  %v1673_v16 = vcombine.high %v323_v9, %v331_v10  ;;  %v339_v17 = vld [vmem:[%s2075_s22 + $0x138] sm:$0xff]  ;;  %v1672_v20 = vcombine.low %v323_v9, %v331_v10  ;;  %v1686_v23 = vcombine.low %v338_v13, %v346_v14 }
  0x4e   : > { %776 = vmatpush1.bf16.msra.mxu0 %v1646_v18  ;;  %849 = vmatpush1.bf16.msra.mxu1 %v1648_v21  ;;  %v347_v18 = vld [vmem:[%s2075_s22 + $0x178] sm:$0xff]  ;;  %v1687_v21 = vcombine.high %v338_v13, %v346_v14  ;;  %s1741_s22 = sshll.u32 (%p1950_p6), %s1506_s23, 2 }
  0x4f   : > { %671 = vmatprep.mubr.bf16.mxu0 %v1881_v48  ;;  %744 = vmatprep.mubr.bf16.mxu1 %v1881_v48  ;;  %v1688_v24 = vcombine.low %v339_v17, %v347_v18  ;;  %s1508_s26 = scalar_lea.vmem (%p1950_p6), %s2348_s3, %s1741_s22 }
  0x50   : > { %777 = vmatprep.subr.bf16.mxu0 %v1663_v22  ;;  %850 = vmatprep.subr.bf16.mxu1 %v1665_v25  ;;  %v1689_v22 = vcombine.high %v339_v17, %v347_v18 }
  0x52   : > { %778 = vmatpush1.bf16.msra.mxu0 %v1662_v28  ;;  %851 = vmatpush1.bf16.msra.mxu1 %v1664_v30 }
  0x53   : > { %779 = vmatprep.subr.bf16.mxu0 %v1679_v31  ;;  %852 = vmatprep.subr.bf16.mxu1 %v1681_v32 }
  0x55   : > { %1691 = vmatmul.mubr.msk.bf16.gmra.mrb[4].mxu0 %vm616_vm0, %v2118_v33  ;;  %1695 = vmatmul.mubr.msk.bf16.gmra.mrb[4].mxu1 %vm616_vm0, %v2118_v33 }
  0x56   : > { %681 = vmatprep.mubr.bf16.mxu0 %v1881_v48  ;;  %754 = vmatprep.mubr.bf16.mxu1 %v1881_v48 }
  0x57   : > { %780 = vmatpush1.bf16.msra.mxu0 %v1678_v39  ;;  %853 = vmatpush1.bf16.msra.mxu1 %v1680_v40 }
  0x58   : > { %921 = vmatprep.subr.bf16.mxu0 %v1651_v41  ;;  %994 = vmatprep.subr.bf16.mxu1 %v1653_v42 }
  0x5d   : > { %1692 = vmatmul.mubr.msk.bf16.gmra.mrb[8].mxu0 %vm616_vm0, %v2136_v43  ;;  %1696 = vmatmul.mubr.msk.bf16.gmra.mrb[8].mxu1 %vm616_vm0, %v2136_v43 }
  0x5e   : > { %691 = vmatprep.mubr.bf16.mxu0 %v1881_v48  ;;  %764 = vmatprep.mubr.bf16.mxu1 %v1881_v48 }
  0x65   : > { %1693 = vmatmul.mubr.msk.bf16.gmra.mrb[12].mxu0 %vm616_vm0, %v2147_v44  ;;  %1697 = vmatmul.mubr.msk.bf16.gmra.mrb[12].mxu1 %vm616_vm0, %v2147_v44 }
  0x66   : > { %807 = vmatprep.mubr.bf16.mxu0 %v1881_v48  ;;  %880 = vmatprep.mubr.bf16.mxu1 %v1881_v48 }
  0x6d   : > { %1698 = vmatmul.mubr.msk.bf16.vlgmr.msra.gmra.mrb[16].mxu0 %vm616_vm0, %v2096_v15  ;;  %1702 = vmatmul.mubr.msk.bf16.vlgmr.msra.gmra.mrb[16].mxu1 %vm616_vm0, %v2096_v15 }
  0x6e   : > { %922 = vmatpush1.bf16.msra.mxu0 %v1650_v47  ;;  %995 = vmatpush1.bf16.msra.mxu1 %v1652_v51 }
  0x6f   : > { %817 = vmatprep.mubr.bf16.mxu0 %v1881_v48  ;;  %890 = vmatprep.mubr.bf16.mxu1 %v1881_v48 }
  0x70   : > { %923 = vmatprep.subr.bf16.mxu0 %v1667_v52  ;;  %996 = vmatprep.subr.bf16.mxu1 %v1669_v55 }
  0x72   : > { %924 = vmatpush1.bf16.msra.mxu0 %v1666_v58  ;;  %997 = vmatpush1.bf16.msra.mxu1 %v1668_v59 }
  0x73   : > { %925 = vmatprep.subr.bf16.mxu0 %v1683_v60  ;;  %998 = vmatprep.subr.bf16.mxu1 %v1685_v61 }
  0x75   : > { %1699 = vmatmul.mubr.msk.bf16.gmra.mrb[20].mxu0 %vm616_vm0, %v2118_v33  ;;  %1703 = vmatmul.mubr.msk.bf16.gmra.mrb[20].mxu1 %vm616_vm0, %v2118_v33 }
  0x76   : > { %827 = vmatprep.mubr.bf16.mxu0 %v1881_v48  ;;  %900 = vmatprep.mubr.bf16.mxu1 %v1881_v48 }
  0x77   : > { %926 = vmatpush1.bf16.msra.mxu0 %v1682_v2  ;;  %999 = vmatpush1.bf16.msra.mxu1 %v1684_v3 }
  0x78   : > { %1067 = vmatprep.subr.bf16.mxu0 %v1655_v4  ;;  %1140 = vmatprep.subr.bf16.mxu1 %v1657_v5 }
  0x7d   : > { %1700 = vmatmul.mubr.msk.bf16.gmra.mrb[24].mxu0 %vm616_vm0, %v2136_v43  ;;  %1704 = vmatmul.mubr.msk.bf16.gmra.mrb[24].mxu1 %vm616_vm0, %v2136_v43 }
  0x7e   : > { %837 = vmatprep.mubr.bf16.mxu0 %v1881_v48  ;;  %910 = vmatprep.mubr.bf16.mxu1 %v1881_v48 }
  0x85   : > { %1701 = vmatmul.mubr.msk.bf16.gmra.mrb[28].mxu0 %vm616_vm0, %v2147_v44  ;;  %1705 = vmatmul.mubr.msk.bf16.gmra.mrb[28].mxu1 %vm616_vm0, %v2147_v44 }
  0x86   : > { %953 = vmatprep.mubr.bf16.mxu0 %v1881_v48  ;;  %1026 = vmatprep.mubr.bf16.mxu1 %v1881_v48 }
  0x8d   : > { %1706 = vmatmul.mubr.msk.bf16.vlgmr.msra.gmra.mrb[32].mxu0 %vm616_vm0, %v2096_v15  ;;  %1710 = vmatmul.mubr.msk.bf16.vlgmr.msra.gmra.mrb[32].mxu1 %vm616_vm0, %v2096_v15 }
  0x8e   : > { %1068 = vmatpush1.bf16.msra.mxu0 %v1654_v8  ;;  %1141 = vmatpush1.bf16.msra.mxu1 %v1656_v11 }
  0x8f   : > { %963 = vmatprep.mubr.bf16.mxu0 %v1881_v48  ;;  %1036 = vmatprep.mubr.bf16.mxu1 %v1881_v48 }
  0x90   : > { %1069 = vmatprep.subr.bf16.mxu0 %v1671_v12  ;;  %1142 = vmatprep.subr.bf16.mxu1 %v1673_v16 }
  0x92   : > { %1070 = vmatpush1.bf16.msra.mxu0 %v1670_v19  ;;  %1143 = vmatpush1.bf16.msra.mxu1 %v1672_v20 }
  0x93   : > { %1071 = vmatprep.subr.bf16.mxu0 %v1687_v21  ;;  %1144 = vmatprep.subr.bf16.mxu1 %v1689_v22 }
  0x95   : > { %1707 = vmatmul.mubr.msk.bf16.gmra.mrb[36].mxu0 %vm616_vm0, %v2118_v33  ;;  %1711 = vmatmul.mubr.msk.bf16.gmra.mrb[36].mxu1 %vm616_vm0, %v2118_v33 }
  0x96   : > { %973 = vmatprep.mubr.bf16.mxu0 %v1881_v48  ;;  %1046 = vmatprep.mubr.bf16.mxu1 %v1881_v48 }
  0x97   : > { %1072 = vmatpush1.bf16.msra.mxu0 %v1686_v23  ;;  %1145 = vmatpush1.bf16.msra.mxu1 %v1688_v24 }
  0x9d   : > { %1708 = vmatmul.mubr.msk.bf16.gmra.mrb[40].mxu0 %vm616_vm0, %v2136_v43  ;;  %1712 = vmatmul.mubr.msk.bf16.gmra.mrb[40].mxu1 %vm616_vm0, %v2136_v43 }
  0x9e   : > { %983 = vmatprep.mubr.bf16.mxu0 %v1881_v48  ;;  %1056 = vmatprep.mubr.bf16.mxu1 %v1881_v48 }
  0xa5   : > { %1709 = vmatmul.mubr.msk.bf16.gmra.mrb[44].mxu0 %vm616_vm0, %v2147_v44  ;;  %1713 = vmatmul.mubr.msk.bf16.gmra.mrb[44].mxu1 %vm616_vm0, %v2147_v44 }
  0xa6   : > { %1099 = vmatprep.mubr.bf16.mxu0 %v1881_v48  ;;  %1172 = vmatprep.mubr.bf16.mxu1 %v1881_v48 }
  0xad   : > { %1714 = vmatmul.mubr.msk.bf16.vlgmr.msra.gmra.mrb[48].mxu0 %vm616_vm0, %v2096_v15  ;;  %1718 = vmatmul.mubr.msk.bf16.vlgmr.msra.gmra.mrb[48].mxu1 %vm616_vm0, %v2096_v15 }
  0xae   : > { %1109 = vmatprep.mubr.bf16.mxu0 %v1881_v48  ;;  %1182 = vmatprep.mubr.bf16.mxu1 %v1881_v48 }
  0xb5   : > { %1715 = vmatmul.mubr.msk.bf16.gmra.mrb[52].mxu0 %vm616_vm0, %v2118_v33  ;;  %1719 = vmatmul.mubr.msk.bf16.gmra.mrb[52].mxu1 %vm616_vm0, %v2118_v33 }
  0xb6   : > { %1119 = vmatprep.mubr.bf16.mxu0 %v1881_v48  ;;  %1192 = vmatprep.mubr.bf16.mxu1 %v1881_v48 }
  0xba   : > { %v2245_v56 = vpop.permute.xlu0 %1313 }
  0xbd   : > { %1716 = vmatmul.mubr.msk.bf16.gmra.mrb[56].mxu0 %vm616_vm0, %v2136_v43  ;;  %1720 = vmatmul.mubr.msk.bf16.gmra.mrb[56].mxu1 %vm616_vm0, %v2136_v43 }
  0xbe   : > { %1129 = vmatprep.mubr.bf16.mxu0 %v1881_v48  ;;  %1202 = vmatprep.mubr.bf16.mxu1 %v1881_v48  ;;  %v2247_v11 = vpop.permute.xlu0 %1318 }
  0xc5   : > { %1717 = vmatmul.mubr.msk.bf16.gmra.mrb[60].mxu0 %vm616_vm0, %v2147_v44  ;;  %1721 = vmatmul.mubr.msk.bf16.gmra.mrb[60].mxu1 %vm616_vm0, %v2147_v44 }
 0x120   : > { %v663_v15 = vpop.f32.mrb[0].mxu0  ;;  %v736_v25 = vpop.f32.mrb[0].mxu1 }
 0x121   : > { %v665_v26 = vpop.f32.mrb[1].mxu0  ;;  %v738_v27 = vpop.f32.mrb[1].mxu1 }
 0x122   : > { %v667_v28 = vpop.f32.mrb[2].mxu0  ;;  %v740_v29 = vpop.f32.mrb[2].mxu1 }
 0x123   : > { %v669_v30 = vpop.f32.mrb[3].mxu0  ;;  %v742_v31 = vpop.f32.mrb[3].mxu1 }
 0x128   : > { %v673_v32 = vpop.f32.mrb[4].mxu0  ;;  %v746_v34 = vpop.f32.mrb[4].mxu1 }
 0x129   : > { %v1213_v33 = vmax.f32 %v663_v15, %v673_v32  ;;  %v675_v35 = vpop.f32.mrb[5].mxu0  ;;  %v1215_v36 = vmax.f32 %v736_v25, %v746_v34  ;;  %v748_v37 = vpop.f32.mrb[5].mxu1 }
 0x12a   : > { %v1214_v48 = vmax.f32 %v665_v26, %v675_v35  ;;  %v677_v38 = vpop.f32.mrb[6].mxu0  ;;  %v1216_v39 = vmax.f32 %v738_v27, %v748_v37  ;;  %v750_v41 = vpop.f32.mrb[6].mxu1 }
 0x12b   : > { %v1229_v40 = vmax.f32 %v667_v28, %v677_v38  ;;  %v679_v42 = vpop.f32.mrb[7].mxu0  ;;  %v1231_v43 = vmax.f32 %v740_v29, %v750_v41  ;;  %v752_v45 = vpop.f32.mrb[7].mxu1 }
 0x12c   : > { %v1230_v44 = vmax.f32 %v669_v30, %v679_v42  ;;  %v1232_v46 = vmax.f32 %v742_v31, %v752_v45 }
 0x130   : > { %v683_v47 = vpop.f32.mrb[8].mxu0  ;;  %v756_v49 = vpop.f32.mrb[8].mxu1 }
 0x131   : > { %v685_v50 = vpop.f32.mrb[9].mxu0  ;;  %v758_v51 = vpop.f32.mrb[9].mxu1 }
 0x132   : > { %v687_v52 = vpop.f32.mrb[10].mxu0  ;;  %v760_v53 = vpop.f32.mrb[10].mxu1 }
 0x133   : > { %v689_v54 = vpop.f32.mrb[11].mxu0  ;;  %v762_v55 = vpop.f32.mrb[11].mxu1 }
 0x138   : > { %v693_v57 = vpop.f32.mrb[12].mxu0  ;;  %v766_v59 = vpop.f32.mrb[12].mxu1 }
 0x139   : > { %v1245_v58 = vmax.f32 %v683_v47, %v693_v57  ;;  %v695_v60 = vpop.f32.mrb[13].mxu0  ;;  %v1247_v61 = vmax.f32 %v756_v49, %v766_v59  ;;  %v768_v63 = vpop.f32.mrb[13].mxu1 }
 0x13a   : > { %v1246_v62 = vmax.f32 %v685_v50, %v695_v60  ;;  %v697_v0 = vpop.f32.mrb[14].mxu0  ;;  %v1248_v2 = vmax.f32 %v758_v51, %v768_v63  ;;  %v770_v4 = vpop.f32.mrb[14].mxu1 }
 0x13b   : > { %v1277_v1 = vmax.f32 %v1213_v33, %v1245_v58  ;;  %v1261_v3 = vmax.f32 %v687_v52, %v697_v0  ;;  %v699_v5 = vpop.f32.mrb[15].mxu0  ;;  %v1279_v6 = vmax.f32 %v1215_v36, %v1247_v61  ;;  %v1263_v8 = vmax.f32 %v760_v53, %v770_v4  ;;  %v772_v10 = vpop.f32.mrb[15].mxu1 }
 0x13c   : > { %v1278_v7 = vmax.f32 %v1214_v48, %v1246_v62  ;;  %v1262_v9 = vmax.f32 %v689_v54, %v699_v5  ;;  %v1280_v12 = vmax.f32 %v1216_v39, %v1248_v2  ;;  %v1264_v16 = vmax.f32 %v762_v55, %v772_v10 }
 0x13d   : > { %v1321_v13 = vadd.f32 %v2245_v56, %v1277_v1  ;;  %v1293_v14 = vmax.f32 %v1229_v40, %v1261_v3  ;;  %v1323_v18 = vadd.f32 %v2245_v56, %v1279_v6  ;;  %v1295_v19 = vmax.f32 %v1231_v43, %v1263_v8 }
 0x13e   : > { %v1322_v17 = vadd.f32 %v2245_v56, %v1278_v7  ;;  %v1294_v20 = vmax.f32 %v1230_v44, %v1262_v9  ;;  %v1324_v21 = vadd.f32 %v2245_v56, %v1280_v12  ;;  %v1296_v23 = vmax.f32 %v1232_v46, %v1264_v16 }
 0x13f   : > { %v1353_v22 = vmax.f32 %v1321_v13, 0.0  ;;  %v1337_v24 = vadd.f32 %v2247_v11, %v1293_v14  ;;  %v1355_v25 = vmax.f32 %v1323_v18, 0.0  ;;  %v1339_v27 = vadd.f32 %v2247_v11, %v1295_v19 }
 0x140   : > { %v1354_v15 = vmax.f32 %v1322_v17, 0.0  ;;  %v1338_v26 = vadd.f32 %v2247_v11, %v1294_v20  ;;  %v809_v28 = vpop.f32.mrb[16].mxu0  ;;  %v1356_v29 = vmax.f32 %v1324_v21, 0.0  ;;  %v1340_v30 = vadd.f32 %v2247_v11, %v1296_v23  ;;  %v882_v32 = vpop.f32.mrb[16].mxu1 }
 0x141   : > { %v1369_v31 = vmax.f32 %v1337_v24, 0.0  ;;  %v811_v33 = vpop.f32.mrb[17].mxu0  ;;  %v1371_v36 = vmax.f32 %v1339_v27, 0.0  ;;  %v884_v48 = vpop.f32.mrb[17].mxu1 }
 0x142   : > { %v1744_v34 = vpack.c.bf16 %v1354_v15, %v1353_v22  ;;  %v1370_v35 = vmax.f32 %v1338_v26, 0.0  ;;  %v813_v37 = vpop.f32.mrb[18].mxu0  ;;  %v1745_v38 = vpack.c.bf16 %v1356_v29, %v1355_v25  ;;  %v1372_v39 = vmax.f32 %v1340_v30, 0.0  ;;  %v886_v40 = vpop.f32.mrb[18].mxu1 }
 0x143   : > { %v815_v41 = vpop.f32.mrb[19].mxu0  ;;  %v888_v43 = vpop.f32.mrb[19].mxu1 }
 0x144   : > { %v1752_v42 = vpack.c.bf16 %v1370_v35, %v1369_v31  ;;  %1481 = vst [vmem:[%s2259_s12] sm:$0xff] %v1744_v34  ;;  %v1753_v44 = vpack.c.bf16 %v1372_v39, %v1371_v36  ;;  %1482 = vst [vmem:[%s2259_s12 + $0x8] sm:$0xff] %v1745_v38 }
 0x146   : > { %1489 = vst [vmem:[%s2259_s12 + $0x40] sm:$0xff] %v1752_v42  ;;  %1490 = vst [vmem:[%s2259_s12 + $0x48] sm:$0xff] %v1753_v44 }
 0x148   : > { %v819_v45 = vpop.f32.mrb[20].mxu0  ;;  %v892_v47 = vpop.f32.mrb[20].mxu1 }
 0x149   : > { %v1217_v46 = vmax.f32 %v809_v28, %v819_v45  ;;  %v821_v49 = vpop.f32.mrb[21].mxu0  ;;  %v1219_v50 = vmax.f32 %v882_v32, %v892_v47  ;;  %v894_v52 = vpop.f32.mrb[21].mxu1 }
 0x14a   : > { %v1218_v51 = vmax.f32 %v811_v33, %v821_v49  ;;  %v823_v53 = vpop.f32.mrb[22].mxu0  ;;  %v1220_v54 = vmax.f32 %v884_v48, %v894_v52  ;;  %v896_v57 = vpop.f32.mrb[22].mxu1 }
 0x14b   : > { %v1233_v55 = vmax.f32 %v813_v37, %v823_v53  ;;  %v825_v58 = vpop.f32.mrb[23].mxu0  ;;  %v1235_v59 = vmax.f32 %v886_v40, %v896_v57  ;;  %v898_v61 = vpop.f32.mrb[23].mxu1 }
 0x14c   : > { %v1234_v60 = vmax.f32 %v815_v41, %v825_v58  ;;  %v1236_v62 = vmax.f32 %v888_v43, %v898_v61 }
 0x150   : > { %v829_v63 = vpop.f32.mrb[24].mxu0  ;;  %v902_v0 = vpop.f32.mrb[24].mxu1 }
 0x151   : > { %v831_v1 = vpop.f32.mrb[25].mxu0  ;;  %v904_v2 = vpop.f32.mrb[25].mxu1 }
 0x152   : > { %v833_v3 = vpop.f32.mrb[26].mxu0  ;;  %v906_v4 = vpop.f32.mrb[26].mxu1 }
 0x153   : > { %v835_v5 = vpop.f32.mrb[27].mxu0  ;;  %v908_v6 = vpop.f32.mrb[27].mxu1 }
 0x158   : > { %v839_v7 = vpop.f32.mrb[28].mxu0  ;;  %v912_v9 = vpop.f32.mrb[28].mxu1 }
 0x159   : > { %v1249_v8 = vmax.f32 %v829_v63, %v839_v7  ;;  %v841_v10 = vpop.f32.mrb[29].mxu0  ;;  %v1251_v12 = vmax.f32 %v902_v0, %v912_v9  ;;  %v914_v14 = vpop.f32.mrb[29].mxu1 }
 0x15a   : > { %v1250_v13 = vmax.f32 %v831_v1, %v841_v10  ;;  %v843_v16 = vpop.f32.mrb[30].mxu0  ;;  %v1252_v18 = vmax.f32 %v904_v2, %v914_v14  ;;  %v916_v20 = vpop.f32.mrb[30].mxu1 }
 0x15b   : > { %v1281_v17 = vmax.f32 %v1217_v46, %v1249_v8  ;;  %v1265_v19 = vmax.f32 %v833_v3, %v843_v16  ;;  %v845_v21 = vpop.f32.mrb[31].mxu0  ;;  %v1283_v22 = vmax.f32 %v1219_v50, %v1251_v12  ;;  %v1267_v24 = vmax.f32 %v906_v4, %v916_v20  ;;  %v918_v25 = vpop.f32.mrb[31].mxu1 }
 0x15c   : > { %v1282_v23 = vmax.f32 %v1218_v51, %v1250_v13  ;;  %v1266_v15 = vmax.f32 %v835_v5, %v845_v21  ;;  %v1284_v27 = vmax.f32 %v1220_v54, %v1252_v18  ;;  %v1268_v29 = vmax.f32 %v908_v6, %v918_v25 }
 0x15d   : > { %v1325_v26 = vadd.f32 %v2245_v56, %v1281_v17  ;;  %v1297_v28 = vmax.f32 %v1233_v55, %v1265_v19  ;;  %v1327_v30 = vadd.f32 %v2245_v56, %v1283_v22  ;;  %v1299_v32 = vmax.f32 %v1235_v59, %v1267_v24 }
 0x15e   : > { %v1326_v31 = vadd.f32 %v2245_v56, %v1282_v23  ;;  %v1298_v33 = vmax.f32 %v1234_v60, %v1266_v15  ;;  %v1328_v35 = vadd.f32 %v2245_v56, %v1284_v27  ;;  %v1300_v48 = vmax.f32 %v1236_v62, %v1268_v29 }
 0x15f   : > { %v1357_v34 = vmax.f32 %v1325_v26, 0.0  ;;  %v1341_v36 = vadd.f32 %v2247_v11, %v1297_v28  ;;  %v1359_v37 = vmax.f32 %v1327_v30, 0.0  ;;  %v1343_v39 = vadd.f32 %v2247_v11, %v1299_v32 }
 0x160   : > { %v1358_v38 = vmax.f32 %v1326_v31, 0.0  ;;  %v1342_v40 = vadd.f32 %v2247_v11, %v1298_v33  ;;  %v955_v41 = vpop.f32.mrb[32].mxu0  ;;  %v1360_v42 = vmax.f32 %v1328_v35, 0.0  ;;  %v1344_v44 = vadd.f32 %v2247_v11, %v1300_v48  ;;  %v1028_v45 = vpop.f32.mrb[32].mxu1 }
 0x161   : > { %v1373_v43 = vmax.f32 %v1341_v36, 0.0  ;;  %v957_v46 = vpop.f32.mrb[33].mxu0  ;;  %v1375_v49 = vmax.f32 %v1343_v39, 0.0  ;;  %v1030_v51 = vpop.f32.mrb[33].mxu1 }
 0x162   : > { %v1746_v47 = vpack.c.bf16 %v1358_v38, %v1357_v34  ;;  %v1374_v50 = vmax.f32 %v1342_v40, 0.0  ;;  %v959_v52 = vpop.f32.mrb[34].mxu0  ;;  %v1747_v53 = vpack.c.bf16 %v1360_v42, %v1359_v37  ;;  %v1376_v54 = vmax.f32 %v1344_v44, 0.0  ;;  %v1032_v55 = vpop.f32.mrb[34].mxu1 }
 0x163   : > { %v961_v57 = vpop.f32.mrb[35].mxu0  ;;  %v1034_v59 = vpop.f32.mrb[35].mxu1 }
 0x164   : > { %1483 = vst [vmem:[%s2259_s12 + $0x10] sm:$0xff] %v1746_v47  ;;  %v1754_v58 = vpack.c.bf16 %v1374_v50, %v1373_v43  ;;  %1484 = vst [vmem:[%s2259_s12 + $0x18] sm:$0xff] %v1747_v53  ;;  %v1755_v60 = vpack.c.bf16 %v1376_v54, %v1375_v49 }
 0x166   : > { %1491 = vst [vmem:[%s2259_s12 + $0x50] sm:$0xff] %v1754_v58  ;;  %1492 = vst [vmem:[%s2259_s12 + $0x58] sm:$0xff] %v1755_v60 }
 0x168   : > { %v965_v61 = vpop.f32.mrb[36].mxu0  ;;  %v1038_v63 = vpop.f32.mrb[36].mxu1 }
 0x169   : > { %v1221_v62 = vmax.f32 %v955_v41, %v965_v61  ;;  %v967_v0 = vpop.f32.mrb[37].mxu0  ;;  %v1223_v1 = vmax.f32 %v1028_v45, %v1038_v63  ;;  %v1040_v3 = vpop.f32.mrb[37].mxu1 }
 0x16a   : > { %v1222_v2 = vmax.f32 %v957_v46, %v967_v0  ;;  %v969_v4 = vpop.f32.mrb[38].mxu0  ;;  %v1224_v5 = vmax.f32 %v1030_v51, %v1040_v3  ;;  %v1042_v7 = vpop.f32.mrb[38].mxu1 }
 0x16b   : > { %v1237_v6 = vmax.f32 %v959_v52, %v969_v4  ;;  %v971_v8 = vpop.f32.mrb[39].mxu0  ;;  %v1239_v9 = vmax.f32 %v1032_v55, %v1042_v7  ;;  %v1044_v12 = vpop.f32.mrb[39].mxu1 }
 0x16c   : > { %v1238_v10 = vmax.f32 %v961_v57, %v971_v8  ;;  %v1240_v13 = vmax.f32 %v1034_v59, %v1044_v12 }
 0x170   : > { %v975_v14 = vpop.f32.mrb[40].mxu0  ;;  %v1048_v16 = vpop.f32.mrb[40].mxu1 }
 0x171   : > { %v977_v17 = vpop.f32.mrb[41].mxu0  ;;  %v1050_v18 = vpop.f32.mrb[41].mxu1 }
 0x172   : > { %v979_v19 = vpop.f32.mrb[42].mxu0  ;;  %v1052_v20 = vpop.f32.mrb[42].mxu1 }
 0x173   : > { %v981_v21 = vpop.f32.mrb[43].mxu0  ;;  %v1054_v22 = vpop.f32.mrb[43].mxu1 }
 0x178   : > { %v985_v23 = vpop.f32.mrb[44].mxu0  ;;  %v1058_v15 = vpop.f32.mrb[44].mxu1 }
 0x179   : > { %v1253_v24 = vmax.f32 %v975_v14, %v985_v23  ;;  %v987_v25 = vpop.f32.mrb[45].mxu0  ;;  %v1255_v26 = vmax.f32 %v1048_v16, %v1058_v15  ;;  %v1060_v28 = vpop.f32.mrb[45].mxu1 }
 0x17a   : > { %v1254_v27 = vmax.f32 %v977_v17, %v987_v25  ;;  %v989_v29 = vpop.f32.mrb[46].mxu0  ;;  %v1256_v31 = vmax.f32 %v1050_v18, %v1060_v28  ;;  %v1062_v33 = vpop.f32.mrb[46].mxu1 }
 0x17b   : > { %v1285_v30 = vmax.f32 %v1221_v62, %v1253_v24  ;;  %v1269_v32 = vmax.f32 %v979_v19, %v989_v29  ;;  %v991_v34 = vpop.f32.mrb[47].mxu0  ;;  %v1287_v35 = vmax.f32 %v1223_v1, %v1255_v26  ;;  %v1271_v48 = vmax.f32 %v1052_v20, %v1062_v33  ;;  %v1064_v38 = vpop.f32.mrb[47].mxu1 }
 0x17c   : > { %v1286_v36 = vmax.f32 %v1222_v2, %v1254_v27  ;;  %v1270_v37 = vmax.f32 %v981_v21, %v991_v34  ;;  %v1288_v40 = vmax.f32 %v1224_v5, %v1256_v31  ;;  %v1272_v42 = vmax.f32 %v1054_v22, %v1064_v38 }
 0x17d   : > { %v1329_v39 = vadd.f32 %v2245_v56, %v1285_v30  ;;  %v1301_v41 = vmax.f32 %v1237_v6, %v1269_v32  ;;  %v1331_v43 = vadd.f32 %v2245_v56, %v1287_v35  ;;  %v1303_v45 = vmax.f32 %v1239_v9, %v1271_v48 }
 0x17e   : > { %v1330_v44 = vadd.f32 %v2245_v56, %v1286_v36  ;;  %v1302_v46 = vmax.f32 %v1238_v10, %v1270_v37  ;;  %v1332_v49 = vadd.f32 %v2245_v56, %v1288_v40  ;;  %v1304_v51 = vmax.f32 %v1240_v13, %v1272_v42 }
 0x17f   : > { %v1361_v47 = vmax.f32 %v1329_v39, 0.0  ;;  %v1345_v50 = vadd.f32 %v2247_v11, %v1301_v41  ;;  %v1363_v52 = vmax.f32 %v1331_v43, 0.0  ;;  %v1347_v54 = vadd.f32 %v2247_v11, %v1303_v45 }
 0x180   : > { %v1362_v53 = vmax.f32 %v1330_v44, 0.0  ;;  %v1346_v55 = vadd.f32 %v2247_v11, %v1302_v46  ;;  %v1101_v57 = vpop.f32.mrb[48].mxu0  ;;  %v1364_v58 = vmax.f32 %v1332_v49, 0.0  ;;  %v1348_v60 = vadd.f32 %v2247_v11, %v1304_v51  ;;  %v1174_v61 = vpop.f32.mrb[48].mxu1 }
 0x181   : > { %v1377_v59 = vmax.f32 %v1345_v50, 0.0  ;;  %v1103_v62 = vpop.f32.mrb[49].mxu0  ;;  %v1379_v0 = vmax.f32 %v1347_v54, 0.0  ;;  %v1176_v2 = vpop.f32.mrb[49].mxu1 }
 0x182   : > { %v1748_v63 = vpack.c.bf16 %v1362_v53, %v1361_v47  ;;  %v1378_v1 = vmax.f32 %v1346_v55, 0.0  ;;  %v1105_v3 = vpop.f32.mrb[50].mxu0  ;;  %v1749_v4 = vpack.c.bf16 %v1364_v58, %v1363_v52  ;;  %v1380_v5 = vmax.f32 %v1348_v60, 0.0  ;;  %v1178_v6 = vpop.f32.mrb[50].mxu1 }
 0x183   : > { %v1107_v7 = vpop.f32.mrb[51].mxu0  ;;  %v1180_v9 = vpop.f32.mrb[51].mxu1 }
 0x184   : > { %1485 = vst [vmem:[%s2259_s12 + $0x20] sm:$0xff] %v1748_v63  ;;  %v1756_v8 = vpack.c.bf16 %v1378_v1, %v1377_v59  ;;  %1486 = vst [vmem:[%s2259_s12 + $0x28] sm:$0xff] %v1749_v4  ;;  %v1757_v10 = vpack.c.bf16 %v1380_v5, %v1379_v0 }
 0x186   : > { %1493 = vst [vmem:[%s2259_s12 + $0x60] sm:$0xff] %v1756_v8  ;;  %1494 = vst [vmem:[%s2259_s12 + $0x68] sm:$0xff] %v1757_v10 }
 0x188   : > { %v1111_v12 = vpop.f32.mrb[52].mxu0  ;;  %v1184_v14 = vpop.f32.mrb[52].mxu1 }
 0x189   : > { %v1225_v13 = vmax.f32 %v1101_v57, %v1111_v12  ;;  %v1113_v16 = vpop.f32.mrb[53].mxu0  ;;  %v1227_v17 = vmax.f32 %v1174_v61, %v1184_v14  ;;  %v1186_v19 = vpop.f32.mrb[53].mxu1 }
 0x18a   : > { %v1226_v18 = vmax.f32 %v1103_v62, %v1113_v16  ;;  %v1115_v20 = vpop.f32.mrb[54].mxu0  ;;  %v1228_v21 = vmax.f32 %v1176_v2, %v1186_v19  ;;  %v1188_v23 = vpop.f32.mrb[54].mxu1  ;;  %v1525_v19 = vld [vmem:[%s2259_s12 + $0x10] sm:$0xff] (%p1950_p6) }
 0x18b   : > { %v1241_v22 = vmax.f32 %v1105_v3, %v1115_v20  ;;  %v1117_v24 = vpop.f32.mrb[55].mxu0  ;;  %v1243_v15 = vmax.f32 %v1178_v6, %v1188_v23  ;;  %v1190_v26 = vpop.f32.mrb[55].mxu1  ;;  %v1527_v20 = vld [vmem:[%s2259_s12 + $0x18] sm:$0xff] (%p1950_p6)  ;;  %1526 = vst [vmem:[%s1508_s26 + $0x10] sm:$0xff] (%p1950_p6), %v1525_v19 }
 0x18c   : > { %v1242_v25 = vmax.f32 %v1107_v7, %v1117_v24  ;;  %v1244_v27 = vmax.f32 %v1180_v9, %v1190_v26  ;;  %v1541_v26 = vld [vmem:[%s2259_s12 + $0x50] sm:$0xff] (%p1950_p6)  ;;  %1528 = vst [vmem:[%s1508_s26 + $0x18] sm:$0xff] (%p1950_p6), %v1527_v20 }
 0x18d   : > { %1542 = vst [vmem:[%s1508_s26 + $0x90] sm:$0xff] (%p1950_p6), %v1541_v26 }
 0x190   : > { %v1121_v28 = vpop.f32.mrb[56].mxu0  ;;  %v1194_v29 = vpop.f32.mrb[56].mxu1 }
 0x191   : > { %v1123_v30 = vpop.f32.mrb[57].mxu0  ;;  %v1196_v31 = vpop.f32.mrb[57].mxu1 }
 0x192   : > { %v1125_v32 = vpop.f32.mrb[58].mxu0  ;;  %v1198_v33 = vpop.f32.mrb[58].mxu1 }
 0x193   : > { %v1127_v34 = vpop.f32.mrb[59].mxu0  ;;  %v1200_v35 = vpop.f32.mrb[59].mxu1 }
 0x198   : > { %v1131_v36 = vpop.f32.mrb[60].mxu0  ;;  %v1204_v37 = vpop.f32.mrb[60].mxu1 }
 0x199   : > { %v1257_v48 = vmax.f32 %v1121_v28, %v1131_v36  ;;  %v1133_v38 = vpop.f32.mrb[61].mxu0  ;;  %v1259_v39 = vmax.f32 %v1194_v29, %v1204_v37  ;;  %v1206_v41 = vpop.f32.mrb[61].mxu1  ;;  %v1545_v28 = vld [vmem:[%s2259_s12 + $0x60] sm:$0xff] (%p1950_p6)  ;;  %v1547_v29 = vld [vmem:[%s2259_s12 + $0x68] sm:$0xff] (%p1950_p6) }
 0x19a   : > { %v1258_v40 = vmax.f32 %v1123_v30, %v1133_v38  ;;  %v1135_v42 = vpop.f32.mrb[62].mxu0  ;;  %v1260_v44 = vmax.f32 %v1196_v31, %v1206_v41  ;;  %v1208_v46 = vpop.f32.mrb[62].mxu1  ;;  %1546 = vst [vmem:[%s1508_s26 + $0xa0] sm:$0xff] (%p1950_p6), %v1545_v28  ;;  %1548 = vst [vmem:[%s1508_s26 + $0xa8] sm:$0xff] (%p1950_p6), %v1547_v29 }
 0x19b   : > { %v1289_v43 = vmax.f32 %v1225_v13, %v1257_v48  ;;  %v1273_v45 = vmax.f32 %v1125_v32, %v1135_v42  ;;  %v1137_v47 = vpop.f32.mrb[63].mxu0  ;;  %v1291_v49 = vmax.f32 %v1227_v17, %v1259_v39  ;;  %v1275_v51 = vmax.f32 %v1198_v33, %v1208_v46  ;;  %v1210_v53 = vpop.f32.mrb[63].mxu1 }
 0x19c   : > { %v1290_v50 = vmax.f32 %v1226_v18, %v1258_v40  ;;  %v1274_v52 = vmax.f32 %v1127_v34, %v1137_v47  ;;  %v1292_v55 = vmax.f32 %v1228_v21, %v1260_v44  ;;  %v1276_v58 = vmax.f32 %v1200_v35, %v1210_v53  ;;  %v1523_v18 = vld [vmem:[%s2259_s12 + $0x8] sm:$0xff] (%p1950_p6)  ;;  %v1529_v21 = vld [vmem:[%s2259_s12 + $0x20] sm:$0xff] (%p1950_p6) }
 0x19d   : > { %v1333_v54 = vadd.f32 %v2245_v56, %v1289_v43  ;;  %v1305_v57 = vmax.f32 %v1241_v22, %v1273_v45  ;;  %v1335_v59 = vadd.f32 %v2245_v56, %v1291_v49  ;;  %v1307_v61 = vmax.f32 %v1243_v15, %v1275_v51  ;;  %v1531_v22 = vld [vmem:[%s2259_s12 + $0x28] sm:$0xff] (%p1950_p6)  ;;  %v1537_v15 = vld [vmem:[%s2259_s12 + $0x40] sm:$0xff] (%p1950_p6)  ;;  %1524 = vst [vmem:[%s1508_s26 + $0x8] sm:$0xff] (%p1950_p6), %v1523_v18 }
 0x19e   : > { %v1334_v60 = vadd.f32 %v2245_v56, %v1290_v50  ;;  %v1306_v62 = vmax.f32 %v1242_v25, %v1274_v52  ;;  %v1336_v0 = vadd.f32 %v2245_v56, %v1292_v55  ;;  %v1308_v2 = vmax.f32 %v1244_v27, %v1276_v58  ;;  %v1539_v25 = vld [vmem:[%s2259_s12 + $0x48] sm:$0xff] (%p1950_p6)  ;;  %v1543_v27 = vld [vmem:[%s2259_s12 + $0x58] sm:$0xff] (%p1950_p6)  ;;  %1530 = vst [vmem:[%s1508_s26 + $0x20] sm:$0xff] (%p1950_p6), %v1529_v21 }
 0x19f   : > { %v1365_v63 = vmax.f32 %v1333_v54, 0.0  ;;  %v1349_v1 = vadd.f32 %v2247_v11, %v1305_v57  ;;  %v1367_v3 = vmax.f32 %v1335_v59, 0.0  ;;  %v1351_v5 = vadd.f32 %v2247_v11, %v1307_v61  ;;  %1532 = vst [vmem:[%s1508_s26 + $0x28] sm:$0xff] (%p1950_p6), %v1531_v22  ;;  %1538 = vst [vmem:[%s1508_s26 + $0x80] sm:$0xff] (%p1950_p6), %v1537_v15 }
 0x1a0   : > { %v1366_v4 = vmax.f32 %v1334_v60, 0.0  ;;  %v1350_v6 = vadd.f32 %v2247_v11, %v1306_v62  ;;  %v1368_v7 = vmax.f32 %v1336_v0, 0.0  ;;  %v1352_v9 = vadd.f32 %v2247_v11, %v1308_v2  ;;  %1503 = sbr.rel (!%p1950_p6) target bundleno = 431 (0x1af), region = 59  ;;  %v1521_v11 = vld [vmem:[%s2259_s12] sm:$0xff] (%p1950_p6)  ;;  %1540 = vst [vmem:[%s1508_s26 + $0x88] sm:$0xff] (%p1950_p6), %v1539_v25  ;;  %1544 = vst [vmem:[%s1508_s26 + $0x98] sm:$0xff] (%p1950_p6), %v1543_v27 }
 0x1a1   : > { %v1381_v8 = vmax.f32 %v1349_v1, 0.0  ;;  %v1383_v12 = vmax.f32 %v1351_v5, 0.0  ;;  %1522 = vst [vmem:[%s1508_s26] sm:$0xff] (%p1950_p6), %v1521_v11 }
 0x1a2   : > { %v1750_v10 = vpack.c.bf16 %v1366_v4, %v1365_v63  ;;  %v1382_v13 = vmax.f32 %v1350_v6, 0.0  ;;  %v1751_v56 = vpack.c.bf16 %v1368_v7, %v1367_v3  ;;  %v1384_v14 = vmax.f32 %v1352_v9, 0.0 }
 0x1a4   : > { %1487 = vst [vmem:[%s2259_s12 + $0x30] sm:$0xff] %v1750_v10  ;;  %v1758_v16 = vpack.c.bf16 %v1382_v13, %v1381_v8  ;;  %1488 = vst [vmem:[%s2259_s12 + $0x38] sm:$0xff] %v1751_v56  ;;  %v1759_v17 = vpack.c.bf16 %v1384_v14, %v1383_v12 }
 0x1a6   : > { %1495 = vst [vmem:[%s2259_s12 + $0x70] sm:$0xff] %v1758_v16  ;;  %1496 = vst [vmem:[%s2259_s12 + $0x78] sm:$0xff] %v1759_v17 }
 0x1ab   : > { %v1533_v23 = vld [vmem:[%s2259_s12 + $0x30] sm:$0xff]  ;;  %v1535_v24 = vld [vmem:[%s2259_s12 + $0x38] sm:$0xff] }
 0x1ac   : > { %1534 = vst [vmem:[%s1508_s26 + $0x30] sm:$0xff] %v1533_v23  ;;  %1536 = vst [vmem:[%s1508_s26 + $0x38] sm:$0xff] %v1535_v24 }
 0x1ad   : > { %v1549_v30 = vld [vmem:[%s2259_s12 + $0x70] sm:$0xff]  ;;  %v1551_v31 = vld [vmem:[%s2259_s12 + $0x78] sm:$0xff] }
 0x1ae   : > { %1550 = vst [vmem:[%s1508_s26 + $0xb0] sm:$0xff] %v1549_v30  ;;  %1552 = vst [vmem:[%s1508_s26 + $0xb8] sm:$0xff] %v1551_v31 }
 0x1af PF: > { %s13_s18 = sadd.s32 1, %s1879_s18   ;;  %s2350_s12 = smov %s1859_s13 }
 0x1b0   : > { %p10_p12 = scmp.ge.s32.totalorder %s13_s18, 6   ;;  %s2351_s13 = smov %s1958_s27 }
 0x1b1   : > { %s2352_s14 = smov %s1871_s16  ;;  %s2353_s15 = smov %s1875_s17 }
 0x1b2   : > { %s2354_s16 = smov %s2357_s19  ;;  %s2355_s17 = smov %s2361_s20 }
 0x1b3   :  { %12 = sbr.rel (!%p10_p12) target bundleno = 4 (0x4), region = 113 }

// kernel: laryngeal_cnn_forward.4
= control target key start
LH: loop header
LB: loop body
LE: loop exit
PB: predicated region body
PF: predicated region fallthrough
CT: control target
= control target key end

     0   :  { %s2194_s12 = smov 0   ;;  %s2196_s13 = smov 0   ;;  %s2839_s0 = inlined_call_operand.vmem [shape: bf16[2,256,1024], index: 0, kind: input, shape index: {}]   ;;  %s2840_s1 = inlined_call_operand.vmem [shape: bf16[128,256], index: 1, kind: input, shape index: {}]   ;;  %s2841_s2 = inlined_call_operand.vmem [shape: f32[32,1], index: 2, kind: input, shape index: {}]   ;;  %s2842_s3 = inlined_call_operand.vmem [shape: bf16[2,32,1024], index: 3, kind: output, shape index: {}]  }
   0x1   :  { %s2198_s14 = smov 0  }
   0x2 LB: > { %s25_s15 = sadd.s32 1, %s2167_s13  ;;  %p1913_p0 = scmp.ge.s32.totalorder %s2171_s14, 1  ;;  %s2171_s14 = sphi %s2198_s14, %s13_s14   ;;  %s2167_s13 = sphi %s2196_s13, %s2862_s13   ;;  %s2163_s12 = sphi %s2194_s12, %s2861_s12  }
   0x3   : > { %p27_p1 = scmp.ge.s32.totalorder %s25_s15, 2  ;;  %p158_p2 = scmp.lt.s32.totalorder %s2171_s14, 3 }
   0x5   : > { %s2864_s15 = smov (%p27_p1, %s25_s15), 0  ;;  %p159_p3 = pnand %p1913_p0, %p158_p2 }
   0x6   : > { %p191_p4 = scmp.lt.s32.totalorder (!%p159_p3), %s2163_s12, 1  ;;  %v2215_v0 = vld [vmem:[%s2840_s1 + $0x4] ss:$8 sps:$4 sm:$0xff] (!%p159_p3)  }
   0x7   : > { %162 = sbr.rel (%p159_p3) target bundleno = 437 (0x1b5), region = 32  ;;  %1106 = vmatprep.mubr.bf16.mxu0 (!%p159_p3), %v2215_v0  ;;  %1219 = vmatprep.mubr.bf16.mxu1 (!%p159_p3), %v2215_v0 }
   0xe   : > { %s2866_s12 = smov (!%p191_p4, %s2163_s12), 1 }
   0xf   : > { %s2080_s18 = sshll.u32 %s2866_s12, 10 }
  0x10   : > { %s2225_s21 = scalar_lea.vmem %s2839_s0, %s2080_s18 }
  0x11   : > { %v210_v1 = vld [vmem:[%s2225_s21] sm:$0xff]  ;;  %v211_v3 = vld [vmem:[%s2225_s21 + $0x8] sm:$0xff] }
  0x12   : > { %v214_v2 = vld [vmem:[%s2225_s21 + $0x20] sm:$0xff]  ;;  %v215_v5 = vld [vmem:[%s2225_s21 + $0x28] sm:$0xff] }
  0x13   : > { %v1935_v4 = vcombine.high %v210_v1, %v214_v2  ;;  %v1934_v6 = vcombine.low %v210_v1, %v214_v2  ;;  %v218_v7 = vld [vmem:[%s2225_s21 + $0x40] sm:$0xff]  ;;  %v1937_v9 = vcombine.high %v211_v3, %v215_v5  ;;  %v1936_v10 = vcombine.low %v211_v3, %v215_v5  ;;  %v219_v12 = vld [vmem:[%s2225_s21 + $0x48] sm:$0xff] }
  0x14   : > { %v222_v8 = vld [vmem:[%s2225_s21 + $0x60] sm:$0xff]  ;;  %v223_v13 = vld [vmem:[%s2225_s21 + $0x68] sm:$0xff] }
  0x15   : > { %v1943_v11 = vcombine.high %v218_v7, %v222_v8  ;;  %v226_v14 = vld [vmem:[%s2225_s21 + $0x80] sm:$0xff]  ;;  %1074 = vmatprep.subr.bf16.mxu0 %v1935_v4  ;;  %v1945_v15 = vcombine.high %v219_v12, %v223_v13  ;;  %v227_v17 = vld [vmem:[%s2225_s21 + $0x88] sm:$0xff]  ;;  %1187 = vmatprep.subr.bf16.mxu1 %v1937_v9  ;;  %v1942_v19 = vcombine.low %v218_v7, %v222_v8 }
  0x16   : > { %v230_v16 = vld [vmem:[%s2225_s21 + $0xa0] sm:$0xff]  ;;  %v231_v18 = vld [vmem:[%s2225_s21 + $0xa8] sm:$0xff]  ;;  %1075 = vmatpush1.bf16.msra.mxu0 %v1934_v6  ;;  %1188 = vmatpush1.bf16.msra.mxu1 %v1936_v10  ;;  %v1944_v20 = vcombine.low %v219_v12, %v223_v13 }
  0x17   : > { %1076 = vmatprep.subr.bf16.mxu0 %v1943_v11  ;;  %v1951_v21 = vcombine.high %v226_v14, %v230_v16  ;;  %1189 = vmatprep.subr.bf16.mxu1 %v1945_v15  ;;  %v1953_v22 = vcombine.high %v227_v17, %v231_v18  ;;  %v234_v23 = vld [vmem:[%s2225_s21 + $0xc0] sm:$0xff]  ;;  %v235_v25 = vld [vmem:[%s2225_s21 + $0xc8] sm:$0xff]  ;;  %v1950_v27 = vcombine.low %v226_v14, %v230_v16 }
  0x18   : > { %v238_v24 = vld [vmem:[%s2225_s21 + $0xe0] sm:$0xff]  ;;  %v239_v26 = vld [vmem:[%s2225_s21 + $0xe8] sm:$0xff]  ;;  %v1952_v28 = vcombine.low %v227_v17, %v231_v18 }
  0x19   : > { %v1959_v29 = vcombine.high %v234_v23, %v238_v24  ;;  %v1961_v30 = vcombine.high %v235_v25, %v239_v26  ;;  %v242_v31 = vld [vmem:[%s2225_s21 + $0x100] sm:$0xff]  ;;  %v243_v33 = vld [vmem:[%s2225_s21 + $0x108] sm:$0xff]  ;;  %v1958_v35 = vcombine.low %v234_v23, %v238_v24  ;;  %v1960_v36 = vcombine.low %v235_v25, %v239_v26 }
  0x1a   : > { %1077 = vmatpush1.bf16.msra.mxu0 %v1942_v19  ;;  %1190 = vmatpush1.bf16.msra.mxu1 %v1944_v20  ;;  %v246_v32 = vld [vmem:[%s2225_s21 + $0x120] sm:$0xff]  ;;  %v247_v34 = vld [vmem:[%s2225_s21 + $0x128] sm:$0xff] }
  0x1b   : > { %1078 = vmatprep.subr.bf16.mxu0 %v1951_v21  ;;  %1191 = vmatprep.subr.bf16.mxu1 %v1953_v22  ;;  %v1967_v37 = vcombine.high %v242_v31, %v246_v32  ;;  %v1969_v38 = vcombine.high %v243_v33, %v247_v34  ;;  %v250_v39 = vld [vmem:[%s2225_s21 + $0x140] sm:$0xff]  ;;  %v251_v41 = vld [vmem:[%s2225_s21 + $0x148] sm:$0xff]  ;;  %v1966_v43 = vcombine.low %v242_v31, %v246_v32 }
  0x1c   : > { %v254_v40 = vld [vmem:[%s2225_s21 + $0x160] sm:$0xff]  ;;  %v255_v42 = vld [vmem:[%s2225_s21 + $0x168] sm:$0xff]  ;;  %v1968_v44 = vcombine.low %v243_v33, %v247_v34 }
  0x1d   : > { %v1975_v45 = vcombine.high %v250_v39, %v254_v40  ;;  %v1977_v46 = vcombine.high %v251_v41, %v255_v42  ;;  %v258_v47 = vld [vmem:[%s2225_s21 + $0x180] sm:$0xff]  ;;  %v259_v49 = vld [vmem:[%s2225_s21 + $0x188] sm:$0xff]  ;;  %v1974_v51 = vcombine.low %v250_v39, %v254_v40  ;;  %v1976_v52 = vcombine.low %v251_v41, %v255_v42 }
  0x1e   : > { %1079 = vmatpush1.bf16.msra.mxu0 %v1950_v27  ;;  %1192 = vmatpush1.bf16.msra.mxu1 %v1952_v28  ;;  %v262_v48 = vld [vmem:[%s2225_s21 + $0x1a0] sm:$0xff]  ;;  %v263_v50 = vld [vmem:[%s2225_s21 + $0x1a8] sm:$0xff] }
  0x1f   : > { %1080 = vmatprep.subr.bf16.mxu0 %v1959_v29  ;;  %1193 = vmatprep.subr.bf16.mxu1 %v1961_v30  ;;  %v1983_v53 = vcombine.high %v258_v47, %v262_v48  ;;  %v1985_v54 = vcombine.high %v259_v49, %v263_v50  ;;  %v266_v55 = vld [vmem:[%s2225_s21 + $0x1c0] sm:$0xff]  ;;  %v267_v57 = vld [vmem:[%s2225_s21 + $0x1c8] sm:$0xff]  ;;  %v1982_v59 = vcombine.low %v258_v47, %v262_v48 }
  0x20   : > { %v270_v56 = vld [vmem:[%s2225_s21 + $0x1e0] sm:$0xff]  ;;  %v271_v58 = vld [vmem:[%s2225_s21 + $0x1e8] sm:$0xff]  ;;  %v1984_v60 = vcombine.low %v259_v49, %v263_v50 }
  0x21   : > { %v1991_v61 = vcombine.high %v266_v55, %v270_v56  ;;  %v1993_v62 = vcombine.high %v267_v57, %v271_v58  ;;  %v274_v63 = vld [vmem:[%s2225_s21 + $0x200] sm:$0xff]  ;;  %v275_v2 = vld [vmem:[%s2225_s21 + $0x208] sm:$0xff]  ;;  %v1990_v4 = vcombine.low %v266_v55, %v270_v56  ;;  %v1992_v5 = vcombine.low %v267_v57, %v271_v58 }
  0x22   : > { %1081 = vmatpush1.bf16.msra.mxu0 %v1958_v35  ;;  %1194 = vmatpush1.bf16.msra.mxu1 %v1960_v36  ;;  %v278_v1 = vld [vmem:[%s2225_s21 + $0x220] sm:$0xff]  ;;  %v279_v3 = vld [vmem:[%s2225_s21 + $0x228] sm:$0xff] }
  0x23   : > { %1082 = vmatprep.subr.bf16.mxu0 %v1967_v37  ;;  %1195 = vmatprep.subr.bf16.mxu1 %v1969_v38  ;;  %v1999_v6 = vcombine.high %v274_v63, %v278_v1  ;;  %v2001_v7 = vcombine.high %v275_v2, %v279_v3  ;;  %v282_v8 = vld [vmem:[%s2225_s21 + $0x240] sm:$0xff]  ;;  %v283_v10 = vld [vmem:[%s2225_s21 + $0x248] sm:$0xff]  ;;  %v1998_v12 = vcombine.low %v274_v63, %v278_v1  ;;  %v212_v1 = vld [vmem:[%s2225_s21 + $0x10] sm:$0xff] }
  0x24   : > { %v286_v9 = vld [vmem:[%s2225_s21 + $0x260] sm:$0xff]  ;;  %v287_v11 = vld [vmem:[%s2225_s21 + $0x268] sm:$0xff]  ;;  %v2000_v13 = vcombine.low %v275_v2, %v279_v3  ;;  %v216_v2 = vld [vmem:[%s2225_s21 + $0x30] sm:$0xff] }
  0x25   : > { %v2007_v14 = vcombine.high %v282_v8, %v286_v9  ;;  %v2009_v15 = vcombine.high %v283_v10, %v287_v11  ;;  %v290_v16 = vld [vmem:[%s2225_s21 + $0x280] sm:$0xff]  ;;  %v291_v18 = vld [vmem:[%s2225_s21 + $0x288] sm:$0xff]  ;;  %v2006_v20 = vcombine.low %v282_v8, %v286_v9  ;;  %v2008_v21 = vcombine.low %v283_v10, %v287_v11  ;;  %v213_v3 = vld [vmem:[%s2225_s21 + $0x18] sm:$0xff] }
  0x26   : > { %1083 = vmatpush1.bf16.msra.mxu0 %v1966_v43  ;;  %1196 = vmatpush1.bf16.msra.mxu1 %v1968_v44  ;;  %v294_v17 = vld [vmem:[%s2225_s21 + $0x2a0] sm:$0xff]  ;;  %v295_v19 = vld [vmem:[%s2225_s21 + $0x2a8] sm:$0xff]  ;;  %v1939_v8 = vcombine.high %v212_v1, %v216_v2  ;;  %v1624_v9 = vld [vmem:[%s2841_s2 + $0x10] sm:$0xff] }
  0x27   : > { %1084 = vmatprep.subr.bf16.mxu0 %v1975_v45  ;;  %1197 = vmatprep.subr.bf16.mxu1 %v1977_v46  ;;  %v2015_v22 = vcombine.high %v290_v16, %v294_v17  ;;  %v2017_v23 = vcombine.high %v291_v18, %v295_v19  ;;  %v298_v24 = vld [vmem:[%s2225_s21 + $0x2c0] sm:$0xff]  ;;  %v299_v26 = vld [vmem:[%s2225_s21 + $0x2c8] sm:$0xff]  ;;  %v2014_v28 = vcombine.low %v290_v16, %v294_v17  ;;  %v220_v11 = vld [vmem:[%s2225_s21 + $0x50] sm:$0xff] }
  0x28   : > { %v302_v25 = vld [vmem:[%s2225_s21 + $0x2e0] sm:$0xff]  ;;  %v303_v27 = vld [vmem:[%s2225_s21 + $0x2e8] sm:$0xff]  ;;  %v2016_v29 = vcombine.low %v291_v18, %v295_v19  ;;  %v225_v16 = vld [vmem:[%s2225_s21 + $0x78] sm:$0xff]  ;;  %v1938_v17 = vcombine.low %v212_v1, %v216_v2 }
  0x29   : > { %v2023_v30 = vcombine.high %v298_v24, %v302_v25  ;;  %v2025_v31 = vcombine.high %v299_v26, %v303_v27  ;;  %v306_v32 = vld [vmem:[%s2225_s21 + $0x300] sm:$0xff]  ;;  %v307_v34 = vld [vmem:[%s2225_s21 + $0x308] sm:$0xff]  ;;  %v2022_v36 = vcombine.low %v298_v24, %v302_v25  ;;  %v2024_v37 = vcombine.low %v299_v26, %v303_v27  ;;  %v232_v24 = vld [vmem:[%s2225_s21 + $0xb0] sm:$0xff] }
  0x2a   : > { %1085 = vmatpush1.bf16.msra.mxu0 %v1974_v51  ;;  %1198 = vmatpush1.bf16.msra.mxu1 %v1976_v52  ;;  %v310_v33 = vld [vmem:[%s2225_s21 + $0x320] sm:$0xff]  ;;  %v311_v35 = vld [vmem:[%s2225_s21 + $0x328] sm:$0xff]  ;;  %v229_v25 = vld [vmem:[%s2225_s21 + $0x98] sm:$0xff] }
  0x2b   : > { %1086 = vmatprep.subr.bf16.mxu0 %v1983_v53  ;;  %1199 = vmatprep.subr.bf16.mxu1 %v1985_v54  ;;  %v2031_v38 = vcombine.high %v306_v32, %v310_v33  ;;  %v2033_v39 = vcombine.high %v307_v34, %v311_v35  ;;  %v314_v40 = vld [vmem:[%s2225_s21 + $0x340] sm:$0xff]  ;;  %v315_v42 = vld [vmem:[%s2225_s21 + $0x348] sm:$0xff]  ;;  %v2030_v44 = vcombine.low %v306_v32, %v310_v33  ;;  %v233_v26 = vld [vmem:[%s2225_s21 + $0xb8] sm:$0xff] }
  0x2c   : > { %v318_v41 = vld [vmem:[%s2225_s21 + $0x360] sm:$0xff]  ;;  %v319_v43 = vld [vmem:[%s2225_s21 + $0x368] sm:$0xff]  ;;  %v2032_v45 = vcombine.low %v307_v34, %v311_v35  ;;  %v236_v32 = vld [vmem:[%s2225_s21 + $0xd0] sm:$0xff] }
  0x2d   : > { %v2039_v46 = vcombine.high %v314_v40, %v318_v41  ;;  %v2041_v47 = vcombine.high %v315_v42, %v319_v43  ;;  %v322_v48 = vld [vmem:[%s2225_s21 + $0x380] sm:$0xff]  ;;  %v323_v50 = vld [vmem:[%s2225_s21 + $0x388] sm:$0xff]  ;;  %v2038_v52 = vcombine.low %v314_v40, %v318_v41  ;;  %v2040_v53 = vcombine.low %v315_v42, %v319_v43  ;;  %v240_v33 = vld [vmem:[%s2225_s21 + $0xf0] sm:$0xff] }
  0x2e   : > { %1087 = vmatpush1.bf16.msra.mxu0 %v1982_v59  ;;  %1200 = vmatpush1.bf16.msra.mxu1 %v1984_v60  ;;  %v326_v49 = vld [vmem:[%s2225_s21 + $0x3a0] sm:$0xff]  ;;  %v327_v51 = vld [vmem:[%s2225_s21 + $0x3a8] sm:$0xff]  ;;  %v2334_v34 = vld [vmem:[%s2840_s1 + $0x10] ss:$8 sps:$4 sm:$0xff]  }
  0x2f   : > { %1088 = vmatprep.subr.bf16.mxu0 %v1991_v61  ;;  %1201 = vmatprep.subr.bf16.mxu1 %v1993_v62  ;;  %v2047_v54 = vcombine.high %v322_v48, %v326_v49  ;;  %v2049_v55 = vcombine.high %v323_v50, %v327_v51  ;;  %v330_v56 = vld [vmem:[%s2225_s21 + $0x3c0] sm:$0xff]  ;;  %v331_v58 = vld [vmem:[%s2225_s21 + $0x3c8] sm:$0xff]  ;;  %v2046_v60 = vcombine.low %v322_v48, %v326_v49  ;;  %v237_v35 = vld [vmem:[%s2225_s21 + $0xd8] sm:$0xff] }
  0x30   : > { %v334_v57 = vld [vmem:[%s2225_s21 + $0x3e0] sm:$0xff]  ;;  %v335_v59 = vld [vmem:[%s2225_s21 + $0x3e8] sm:$0xff]  ;;  %v2048_v61 = vcombine.low %v323_v50, %v327_v51  ;;  %v244_v42 = vld [vmem:[%s2225_s21 + $0x110] sm:$0xff] }
  0x31   : > { %v2055_v62 = vcombine.high %v330_v56, %v334_v57  ;;  %v2057_v63 = vcombine.high %v331_v58, %v335_v59  ;;  %v1623_v18 = vld [vmem:[%s2841_s2 + $0x8] sm:$0xff]  ;;  %v248_v43 = vld [vmem:[%s2225_s21 + $0x130] sm:$0xff] }
  0x32   : > { %1089 = vmatpush1.bf16.msra.mxu0 %v1990_v4  ;;  %1202 = vmatpush1.bf16.msra.mxu1 %v1992_v5  ;;  %v217_v4 = vld [vmem:[%s2225_s21 + $0x38] sm:$0xff]  ;;  %v2054_v5 = vcombine.low %v330_v56, %v334_v57  ;;  %v2341_v41 = vld [vmem:[%s2840_s1 + $0x24] ss:$8 sps:$4 sm:$0xff]   ;;  %v1971_v48 = vcombine.high %v244_v42, %v248_v43  ;;  %v252_v50 = vld [vmem:[%s2225_s21 + $0x150] sm:$0xff] }
  0x33   : > { %1090 = vmatprep.subr.bf16.mxu0 %v1999_v6  ;;  %1203 = vmatprep.subr.bf16.mxu1 %v2001_v7  ;;  %v1622_v6 = vld [vmem:[%s2841_s2] sm:$0xff]  ;;  %v2056_v7 = vcombine.low %v331_v58, %v335_v59  ;;  %v1941_v10 = vcombine.high %v213_v3, %v217_v4  ;;  %v1940_v19 = vcombine.low %v213_v3, %v217_v4  ;;  %v256_v51 = vld [vmem:[%s2225_s21 + $0x170] sm:$0xff] }
  0x34   : > { %v1979_v57 = vcombine.high %v252_v50, %v256_v51  ;;  %v2363_v59 = vld [vmem:[%s2840_s1 + $0x34] ss:$8 sps:$4 sm:$0xff]   ;;  %v1978_v1 = vcombine.low %v252_v50, %v256_v51 }
  0x36   : > { %1091 = vmatpush1.bf16.msra.mxu0 %v1998_v12  ;;  %1204 = vmatpush1.bf16.msra.mxu1 %v2000_v13  ;;  %v224_v12 = vld [vmem:[%s2225_s21 + $0x70] sm:$0xff]  ;;  %v2173_v13 = vmov 0  }
  0x37   : > { %1092 = vmatprep.subr.bf16.mxu0 %v2007_v14  ;;  %1205 = vmatprep.subr.bf16.mxu1 %v2009_v15  ;;  %v2306_v14 = vld [vmem:[%s2840_s1] ss:$8 sps:$4 sm:$0xff]   ;;  %v221_v15 = vld [vmem:[%s2225_s21 + $0x58] sm:$0xff]  ;;  %v1946_v27 = vcombine.low %v220_v11, %v224_v12 }
  0x38   : > { %2123 = vset.pattern.permute.xlu0 %v2173_v13  ;;  %2124 = vset.pattern.permute.xlu1 %v2173_v13 }
  0x39   : > { %1628 = vperm.xlu0 %2123, %v1622_v6   ;;  %1638 = vperm.xlu1 %2124, %v1624_v9   ;;  %v272_v6 = vld [vmem:[%s2225_s21 + $0x1f0] sm:$0xff]  ;;  %v273_v9 = vld [vmem:[%s2225_s21 + $0x1f8] sm:$0xff] }
  0x3a   : > { %1093 = vmatpush1.bf16.msra.mxu0 %v2006_v20  ;;  %1206 = vmatpush1.bf16.msra.mxu1 %v2008_v21  ;;  %v1947_v20 = vcombine.high %v220_v11, %v224_v12  ;;  %v1949_v21 = vcombine.high %v221_v15, %v225_v16 }
  0x3b   : > { %1094 = vmatprep.subr.bf16.mxu0 %v2015_v22  ;;  %1207 = vmatprep.subr.bf16.mxu1 %v2017_v23  ;;  %v2316_v22 = vld [vmem:[%s2840_s1 + $0x14] ss:$8 sps:$4 sm:$0xff]  }
  0x3c   : > { %v228_v23 = vld [vmem:[%s2225_s21 + $0x90] sm:$0xff] }
  0x3d   : > { %1633 = vperm.xlu0 %2123, %v1623_v18   ;;  %v277_v18 = vld [vmem:[%s2225_s21 + $0x218] sm:$0xff] }
  0x3e   : > { %1095 = vmatpush1.bf16.msra.mxu0 %v2014_v28  ;;  %1208 = vmatpush1.bf16.msra.mxu1 %v2016_v29  ;;  %v1625_v28 = vld [vmem:[%s2841_s2 + $0x18] sm:$0xff]  ;;  %v1948_v29 = vcombine.low %v221_v15, %v225_v16  ;;  %v2385_v15 = vld [vmem:[%s2840_s1 + $0x44] ss:$8 sps:$4 sm:$0xff]   ;;  %v276_v16 = vld [vmem:[%s2225_s21 + $0x210] sm:$0xff] }
  0x3f   : > { %1096 = vmatprep.subr.bf16.mxu0 %v2023_v30  ;;  %1209 = vmatprep.subr.bf16.mxu1 %v2025_v31  ;;  %v1955_v30 = vcombine.high %v228_v23, %v232_v24  ;;  %v1957_v31 = vcombine.high %v229_v25, %v233_v26 }
  0x40   : > { %1643 = vperm.xlu1 %2124, %v1625_v28   ;;  %v285_v28 = vld [vmem:[%s2225_s21 + $0x258] sm:$0xff] }
  0x42   : > { %1097 = vmatpush1.bf16.msra.mxu0 %v2022_v36  ;;  %1210 = vmatpush1.bf16.msra.mxu1 %v2024_v37  ;;  %v241_v36 = vld [vmem:[%s2225_s21 + $0xf8] sm:$0xff]  ;;  %v1954_v37 = vcombine.low %v228_v23, %v232_v24 }
  0x43   : > { %1098 = vmatprep.subr.bf16.mxu0 %v2031_v38  ;;  %1211 = vmatprep.subr.bf16.mxu1 %v2033_v39  ;;  %v1956_v38 = vcombine.low %v229_v25, %v233_v26  ;;  %v1963_v39 = vcombine.high %v236_v32, %v240_v33  ;;  %v1965_v40 = vcombine.high %v237_v35, %v241_v36  ;;  %v284_v25 = vld [vmem:[%s2225_s21 + $0x250] sm:$0xff] }
  0x44   : > { %v288_v26 = vld [vmem:[%s2225_s21 + $0x270] sm:$0xff] }
  0x46   : > { %1099 = vmatpush1.bf16.msra.mxu0 %v2030_v44  ;;  %1212 = vmatpush1.bf16.msra.mxu1 %v2032_v45  ;;  %v245_v44 = vld [vmem:[%s2225_s21 + $0x118] sm:$0xff] }
  0x47   : > { %1100 = vmatprep.subr.bf16.mxu0 %v2039_v46  ;;  %1213 = vmatprep.subr.bf16.mxu1 %v2041_v47  ;;  %v249_v45 = vld [vmem:[%s2225_s21 + $0x138] sm:$0xff]  ;;  %v1962_v46 = vcombine.low %v236_v32, %v240_v33  ;;  %v1964_v47 = vcombine.low %v237_v35, %v241_v36  ;;  %v2011_v32 = vcombine.high %v284_v25, %v288_v26  ;;  %v292_v36 = vld [vmem:[%s2225_s21 + $0x290] sm:$0xff] }
  0x48   : > { %v1973_v49 = vcombine.high %v245_v44, %v249_v45  ;;  %v1972_v56 = vcombine.low %v245_v44, %v249_v45  ;;  %v2407_v35 = vld [vmem:[%s2840_s1 + $0x54] ss:$8 sps:$4 sm:$0xff]  }
  0x49   : > { %v300_v45 = vld [vmem:[%s2225_s21 + $0x2d0] sm:$0xff] }
  0x4a   : > { %1101 = vmatpush1.bf16.msra.mxu0 %v2038_v52  ;;  %1214 = vmatpush1.bf16.msra.mxu1 %v2040_v53  ;;  %v2356_v52 = vld [vmem:[%s2840_s1 + $0x20] ss:$8 sps:$4 sm:$0xff]   ;;  %v253_v53 = vld [vmem:[%s2225_s21 + $0x158] sm:$0xff] }
  0x4b   : > { %1102 = vmatprep.subr.bf16.mxu0 %v2047_v54  ;;  %1215 = vmatprep.subr.bf16.mxu1 %v2049_v55  ;;  %v257_v54 = vld [vmem:[%s2225_s21 + $0x178] sm:$0xff]  ;;  %v1970_v55 = vcombine.low %v244_v42, %v248_v43 }
  0x4c   : > { %v1981_v58 = vcombine.high %v253_v53, %v257_v54  ;;  %v1980_v2 = vcombine.low %v253_v53, %v257_v54 }
  0x4e   : > { %1103 = vmatpush1.bf16.msra.mxu0 %v2046_v60  ;;  %1216 = vmatpush1.bf16.msra.mxu1 %v2048_v61  ;;  %v260_v60 = vld [vmem:[%s2225_s21 + $0x190] sm:$0xff] }
  0x4f   : > { %1104 = vmatprep.subr.bf16.mxu0 %v2055_v62  ;;  %1217 = vmatprep.subr.bf16.mxu1 %v2057_v63  ;;  %v264_v61 = vld [vmem:[%s2225_s21 + $0x1b0] sm:$0xff]  ;;  %v261_v62 = vld [vmem:[%s2225_s21 + $0x198] sm:$0xff] }
  0x50   : > { %v265_v63 = vld [vmem:[%s2225_s21 + $0x1b8] sm:$0xff]  ;;  %v1987_v3 = vcombine.high %v260_v60, %v264_v61 }
  0x51   : > { %v1989_v4 = vcombine.high %v261_v62, %v265_v63  ;;  %v1988_v11 = vcombine.low %v261_v62, %v265_v63 }
  0x52   : > { %1105 = vmatpush1.bf16.msra.mxu0 %v2054_v5  ;;  %1218 = vmatpush1.bf16.msra.mxu1 %v2056_v7  ;;  %v268_v5 = vld [vmem:[%s2225_s21 + $0x1d0] sm:$0xff] }
  0x53   : > { %1300 = vmatprep.subr.bf16.mxu0 %v1939_v8  ;;  %1413 = vmatprep.subr.bf16.mxu1 %v1941_v10  ;;  %v2378_v7 = vld [vmem:[%s2840_s1 + $0x30] ss:$8 sps:$4 sm:$0xff]   ;;  %v1986_v10 = vcombine.low %v260_v60, %v264_v61  ;;  %v1995_v12 = vcombine.high %v268_v5, %v272_v6 }
  0x54   : > { %v269_v8 = vld [vmem:[%s2225_s21 + $0x1d8] sm:$0xff] }
  0x55   : > { %1107 = vmatmul.mubr.bf16.vlgmr.msra.gmra.mrb[0].mxu0 %v2306_v14  ;;  %1220 = vmatmul.mubr.bf16.vlgmr.msra.gmra.mrb[0].mxu1 %v2306_v14  ;;  %v1997_v13 = vcombine.high %v269_v8, %v273_v9  ;;  %v313_v60 = vld [vmem:[%s2225_s21 + $0x338] sm:$0xff] }
  0x56   : > { %1301 = vmatpush1.bf16.msra.mxu0 %v1938_v17  ;;  %1414 = vmatpush1.bf16.msra.mxu1 %v1940_v19  ;;  %v280_v17 = vld [vmem:[%s2225_s21 + $0x230] sm:$0xff]  ;;  %v281_v19 = vld [vmem:[%s2225_s21 + $0x238] sm:$0xff] }
  0x57   : > { %1302 = vmatprep.subr.bf16.mxu0 %v1947_v20  ;;  %1415 = vmatprep.subr.bf16.mxu1 %v1949_v21  ;;  %v1994_v20 = vcombine.low %v268_v5, %v272_v6  ;;  %v1996_v21 = vcombine.low %v269_v8, %v273_v9  ;;  %v2003_v23 = vcombine.high %v276_v16, %v280_v17  ;;  %v317_v5 = vld [vmem:[%s2225_s21 + $0x358] sm:$0xff] }
  0x58   : > { %1116 = vmatprep.mubr.bf16.mxu0 %v2316_v22  ;;  %1229 = vmatprep.mubr.bf16.mxu1 %v2316_v22  ;;  %v2005_v24 = vcombine.high %v277_v18, %v281_v19  ;;  %v321_v6 = vld [vmem:[%s2225_s21 + $0x378] sm:$0xff] }
  0x5a   : > { %1303 = vmatpush1.bf16.msra.mxu0 %v1946_v27  ;;  %1416 = vmatpush1.bf16.msra.mxu1 %v1948_v29  ;;  %v2400_v27 = vld [vmem:[%s2840_s1 + $0x40] ss:$8 sps:$4 sm:$0xff]   ;;  %v289_v29 = vld [vmem:[%s2225_s21 + $0x278] sm:$0xff] }
  0x5b   : > { %1304 = vmatprep.subr.bf16.mxu0 %v1955_v30  ;;  %1417 = vmatprep.subr.bf16.mxu1 %v1957_v31  ;;  %v2002_v30 = vcombine.low %v276_v16, %v280_v17  ;;  %v2004_v31 = vcombine.low %v277_v18, %v281_v19  ;;  %v2013_v33 = vcombine.high %v285_v28, %v289_v29  ;;  %v328_v16 = vld [vmem:[%s2225_s21 + $0x3b0] sm:$0xff]  ;;  %v325_v17 = vld [vmem:[%s2225_s21 + $0x398] sm:$0xff] }
  0x5c   : > { %v2012_v42 = vcombine.low %v285_v28, %v289_v29  ;;  %v329_v18 = vld [vmem:[%s2225_s21 + $0x3b8] sm:$0xff] }
  0x5d   : > { %1117 = vmatmul.mubr.bf16.gmra.mrb[4].mxu0 %v2334_v34  ;;  %1230 = vmatmul.mubr.bf16.gmra.mrb[4].mxu1 %v2334_v34  ;;  %v333_v28 = vld [vmem:[%s2225_s21 + $0x3d8] sm:$0xff] }
  0x5e   : > { %1305 = vmatpush1.bf16.msra.mxu0 %v1954_v37  ;;  %1418 = vmatpush1.bf16.msra.mxu1 %v1956_v38  ;;  %v296_v37 = vld [vmem:[%s2225_s21 + $0x2b0] sm:$0xff]  ;;  %v293_v38 = vld [vmem:[%s2225_s21 + $0x298] sm:$0xff] }
  0x5f   : > { %1306 = vmatprep.subr.bf16.mxu0 %v1963_v39  ;;  %1419 = vmatprep.subr.bf16.mxu1 %v1965_v40  ;;  %v297_v39 = vld [vmem:[%s2225_s21 + $0x2b8] sm:$0xff]  ;;  %v2010_v40 = vcombine.low %v284_v25, %v288_v26  ;;  %v2019_v43 = vcombine.high %v292_v36, %v296_v37  ;;  %v2018_v50 = vcombine.low %v292_v36, %v296_v37  ;;  %v336_v25 = vld [vmem:[%s2225_s21 + $0x3f0] sm:$0xff] }
  0x60   : > { %1126 = vmatprep.mubr.bf16.mxu0 %v2341_v41  ;;  %1239 = vmatprep.mubr.bf16.mxu1 %v2341_v41  ;;  %v2021_v44 = vcombine.high %v293_v38, %v297_v39  ;;  %v2020_v51 = vcombine.low %v293_v38, %v297_v39  ;;  %v2148_v26 = vld [vmem:[%s2840_s1 + $0x70] ss:$8 sps:$4 sm:$0xff]  }
  0x61   : > { %v337_v29 = vld [vmem:[%s2225_s21 + $0x3f8] sm:$0xff] }
  0x62   : > { %1307 = vmatpush1.bf16.msra.mxu0 %v1962_v46  ;;  %1420 = vmatpush1.bf16.msra.mxu1 %v1964_v47  ;;  %v304_v46 = vld [vmem:[%s2225_s21 + $0x2f0] sm:$0xff]  ;;  %v2060_v37 = vcombine.low %v333_v28, %v337_v29 }
  0x63   : > { %1308 = vmatprep.subr.bf16.mxu0 %v1971_v48  ;;  %1421 = vmatprep.subr.bf16.mxu1 %v1973_v49  ;;  %v2422_v47 = vld [vmem:[%s2840_s1 + $0x50] ss:$8 sps:$4 sm:$0xff]   ;;  %v2027_v53 = vcombine.high %v300_v45, %v304_v46  ;;  %v2026_v61 = vcombine.low %v300_v45, %v304_v46 }
  0x64   : > { %v301_v48 = vld [vmem:[%s2225_s21 + $0x2d8] sm:$0xff] }
  0x65   : > { %1127 = vmatmul.mubr.bf16.gmra.mrb[8].mxu0 %v2356_v52  ;;  %1240 = vmatmul.mubr.bf16.gmra.mrb[8].mxu1 %v2356_v52  ;;  %v305_v49 = vld [vmem:[%s2225_s21 + $0x2f8] sm:$0xff] }
  0x66   : > { %1309 = vmatpush1.bf16.msra.mxu0 %v1970_v55  ;;  %1422 = vmatpush1.bf16.msra.mxu1 %v1972_v56  ;;  %v2029_v54 = vcombine.high %v301_v48, %v305_v49  ;;  %v2429_v55 = vld [vmem:[%s2840_s1 + $0x64] ss:$8 sps:$4 sm:$0xff]   ;;  %v308_v56 = vld [vmem:[%s2225_s21 + $0x310] sm:$0xff]  ;;  %v2028_v62 = vcombine.low %v301_v48, %v305_v49 }
  0x67   : > { %1310 = vmatprep.subr.bf16.mxu0 %v1979_v57  ;;  %1423 = vmatprep.subr.bf16.mxu1 %v1981_v58  ;;  %v312_v57 = vld [vmem:[%s2225_s21 + $0x330] sm:$0xff]  ;;  %v309_v58 = vld [vmem:[%s2225_s21 + $0x318] sm:$0xff] }
  0x68   : > { %1136 = vmatprep.mubr.bf16.mxu0 %v2363_v59  ;;  %1249 = vmatprep.mubr.bf16.mxu1 %v2363_v59  ;;  %v2035_v63 = vcombine.high %v308_v56, %v312_v57  ;;  %v2034_v8 = vcombine.low %v308_v56, %v312_v57  ;;  %v2036_v9 = vcombine.low %v309_v58, %v313_v60 }
  0x6a   : > { %1311 = vmatpush1.bf16.msra.mxu0 %v1978_v1  ;;  %1424 = vmatpush1.bf16.msra.mxu1 %v1980_v2  ;;  %v2037_v1 = vcombine.high %v309_v58, %v313_v60  ;;  %v316_v2 = vld [vmem:[%s2225_s21 + $0x350] sm:$0xff] }
  0x6b   : > { %1312 = vmatprep.subr.bf16.mxu0 %v1987_v3  ;;  %1425 = vmatprep.subr.bf16.mxu1 %v1989_v4  ;;  %v320_v3 = vld [vmem:[%s2225_s21 + $0x370] sm:$0xff]  ;;  %v2444_v4 = vld [vmem:[%s2840_s1 + $0x60] ss:$8 sps:$4 sm:$0xff]  }
  0x6c   : > { %v2042_v19 = vcombine.low %v316_v2, %v320_v3 }
  0x6d   : > { %1137 = vmatmul.mubr.bf16.gmra.mrb[12].mxu0 %v2378_v7  ;;  %1250 = vmatmul.mubr.bf16.gmra.mrb[12].mxu1 %v2378_v7 }
  0x6e   : > { %1313 = vmatpush1.bf16.msra.mxu0 %v1986_v10  ;;  %1426 = vmatpush1.bf16.msra.mxu1 %v1988_v11  ;;  %v2043_v10 = vcombine.high %v316_v2, %v320_v3  ;;  %v2045_v11 = vcombine.high %v317_v5, %v321_v6 }
  0x6f   : > { %1314 = vmatprep.subr.bf16.mxu0 %v1995_v12  ;;  %1427 = vmatprep.subr.bf16.mxu1 %v1997_v13  ;;  %v2451_v12 = vld [vmem:[%s2840_s1 + $0x74] ss:$8 sps:$4 sm:$0xff]  }
  0x70   : > { %1146 = vmatprep.mubr.bf16.mxu0 %v2385_v15  ;;  %1259 = vmatprep.mubr.bf16.mxu1 %v2385_v15  ;;  %v324_v13 = vld [vmem:[%s2225_s21 + $0x390] sm:$0xff] }
  0x72   : > { %1315 = vmatpush1.bf16.msra.mxu0 %v1994_v20  ;;  %1428 = vmatpush1.bf16.msra.mxu1 %v1996_v21  ;;  %v2044_v20 = vcombine.low %v317_v5, %v321_v6  ;;  %v2051_v21 = vcombine.high %v324_v13, %v328_v16 }
  0x73   : > { %1316 = vmatprep.subr.bf16.mxu0 %v2003_v23  ;;  %1429 = vmatprep.subr.bf16.mxu1 %v2005_v24  ;;  %v2053_v23 = vcombine.high %v325_v17, %v329_v18  ;;  %v332_v24 = vld [vmem:[%s2225_s21 + $0x3d0] sm:$0xff]  ;;  %s2081_s21 = sshll.u32 %s2866_s12, 7 }
  0x74   : > { %v2058_v36 = vcombine.low %v332_v24, %v336_v25  ;;  %s2627_s16 = scalar_lea.vmem %s2842_s3, %s2081_s21 }
  0x75   : > { %1147 = vmatmul.mubr.bf16.gmra.mrb[16].mxu0 %v2400_v27  ;;  %1260 = vmatmul.mubr.bf16.gmra.mrb[16].mxu1 %v2400_v27 }
  0x76   : > { %1317 = vmatpush1.bf16.msra.mxu0 %v2002_v30  ;;  %1430 = vmatpush1.bf16.msra.mxu1 %v2004_v31  ;;  %v2050_v30 = vcombine.low %v324_v13, %v328_v16  ;;  %v2052_v31 = vcombine.low %v325_v17, %v329_v18 }
  0x77   : > { %1318 = vmatprep.subr.bf16.mxu0 %v2011_v32  ;;  %1431 = vmatprep.subr.bf16.mxu1 %v2013_v33  ;;  %v2059_v32 = vcombine.high %v332_v24, %v336_v25  ;;  %v2061_v33 = vcombine.high %v333_v28, %v337_v29 }
  0x78   : > { %1156 = vmatprep.mubr.bf16.mxu0 %v2407_v35  ;;  %1269 = vmatprep.mubr.bf16.mxu1 %v2407_v35 }
  0x7a   : > { %1319 = vmatpush1.bf16.msra.mxu0 %v2010_v40  ;;  %1432 = vmatpush1.bf16.msra.mxu1 %v2012_v42 }
  0x7b   : > { %1320 = vmatprep.subr.bf16.mxu0 %v2019_v43  ;;  %1433 = vmatprep.subr.bf16.mxu1 %v2021_v44 }
  0x7d   : > { %1157 = vmatmul.mubr.bf16.gmra.mrb[20].mxu0 %v2422_v47  ;;  %1270 = vmatmul.mubr.bf16.gmra.mrb[20].mxu1 %v2422_v47 }
  0x7e   : > { %1321 = vmatpush1.bf16.msra.mxu0 %v2018_v50  ;;  %1434 = vmatpush1.bf16.msra.mxu1 %v2020_v51 }
  0x7f   : > { %1322 = vmatprep.subr.bf16.mxu0 %v2027_v53  ;;  %1435 = vmatprep.subr.bf16.mxu1 %v2029_v54 }
  0x80   : > { %1166 = vmatprep.mubr.bf16.mxu0 %v2429_v55  ;;  %1279 = vmatprep.mubr.bf16.mxu1 %v2429_v55 }
  0x82   : > { %1323 = vmatpush1.bf16.msra.mxu0 %v2026_v61  ;;  %1436 = vmatpush1.bf16.msra.mxu1 %v2028_v62 }
  0x83   : > { %1324 = vmatprep.subr.bf16.mxu0 %v2035_v63  ;;  %1437 = vmatprep.subr.bf16.mxu1 %v2037_v1 }
  0x85   : > { %1167 = vmatmul.mubr.bf16.gmra.mrb[24].mxu0 %v2444_v4  ;;  %1280 = vmatmul.mubr.bf16.gmra.mrb[24].mxu1 %v2444_v4 }
  0x86   : > { %1325 = vmatpush1.bf16.msra.mxu0 %v2034_v8  ;;  %1438 = vmatpush1.bf16.msra.mxu1 %v2036_v9 }
  0x87   : > { %1326 = vmatprep.subr.bf16.mxu0 %v2043_v10  ;;  %1439 = vmatprep.subr.bf16.mxu1 %v2045_v11 }
  0x88   : > { %1176 = vmatprep.mubr.bf16.mxu0 %v2451_v12  ;;  %1289 = vmatprep.mubr.bf16.mxu1 %v2451_v12 }
  0x8a   : > { %1327 = vmatpush1.bf16.msra.mxu0 %v2042_v19  ;;  %1440 = vmatpush1.bf16.msra.mxu1 %v2044_v20 }
  0x8b   : > { %1328 = vmatprep.subr.bf16.mxu0 %v2051_v21  ;;  %1441 = vmatprep.subr.bf16.mxu1 %v2053_v23 }
  0x8d   : > { %1177 = vmatmul.mubr.bf16.gmra.mrb[28].mxu0 %v2148_v26  ;;  %1290 = vmatmul.mubr.bf16.gmra.mrb[28].mxu1 %v2148_v26 }
  0x8e   : > { %1329 = vmatpush1.bf16.msra.mxu0 %v2050_v30  ;;  %1442 = vmatpush1.bf16.msra.mxu1 %v2052_v31 }
  0x8f   : > { %1330 = vmatprep.subr.bf16.mxu0 %v2059_v32  ;;  %1443 = vmatprep.subr.bf16.mxu1 %v2061_v33 }
  0x90   : > { %1332 = vmatprep.mubr.bf16.mxu0 %v2215_v0  ;;  %1445 = vmatprep.mubr.bf16.mxu1 %v2215_v0 }
  0x92   : > { %1331 = vmatpush1.bf16.msra.mxu0 %v2058_v36  ;;  %1444 = vmatpush1.bf16.msra.mxu1 %v2060_v37 }
  0x95   : > { %1333 = vmatmul.mubr.bf16.vlgmr.msra.gmra.mrb[32].mxu0 %v2306_v14  ;;  %1446 = vmatmul.mubr.bf16.vlgmr.msra.gmra.mrb[32].mxu1 %v2306_v14 }
  0x96   : > { %1342 = vmatprep.mubr.bf16.mxu0 %v2316_v22  ;;  %1455 = vmatprep.mubr.bf16.mxu1 %v2316_v22 }
  0x9d   : > { %1343 = vmatmul.mubr.bf16.gmra.mrb[36].mxu0 %v2334_v34  ;;  %1456 = vmatmul.mubr.bf16.gmra.mrb[36].mxu1 %v2334_v34 }
  0x9e   : > { %1352 = vmatprep.mubr.bf16.mxu0 %v2341_v41  ;;  %1465 = vmatprep.mubr.bf16.mxu1 %v2341_v41 }
  0xa5   : > { %1353 = vmatmul.mubr.bf16.gmra.mrb[40].mxu0 %v2356_v52  ;;  %1466 = vmatmul.mubr.bf16.gmra.mrb[40].mxu1 %v2356_v52 }
  0xa6   : > { %1362 = vmatprep.mubr.bf16.mxu0 %v2363_v59  ;;  %1475 = vmatprep.mubr.bf16.mxu1 %v2363_v59 }
  0xad   : > { %1363 = vmatmul.mubr.bf16.gmra.mrb[44].mxu0 %v2378_v7  ;;  %1476 = vmatmul.mubr.bf16.gmra.mrb[44].mxu1 %v2378_v7 }
  0xae   : > { %1372 = vmatprep.mubr.bf16.mxu0 %v2385_v15  ;;  %1485 = vmatprep.mubr.bf16.mxu1 %v2385_v15 }
  0xb5   : > { %1373 = vmatmul.mubr.bf16.gmra.mrb[48].mxu0 %v2400_v27  ;;  %1486 = vmatmul.mubr.bf16.gmra.mrb[48].mxu1 %v2400_v27 }
  0xb6   : > { %1382 = vmatprep.mubr.bf16.mxu0 %v2407_v35  ;;  %1495 = vmatprep.mubr.bf16.mxu1 %v2407_v35 }
  0xbd   : > { %1383 = vmatmul.mubr.bf16.gmra.mrb[52].mxu0 %v2422_v47  ;;  %1496 = vmatmul.mubr.bf16.gmra.mrb[52].mxu1 %v2422_v47 }
  0xbe   : > { %1392 = vmatprep.mubr.bf16.mxu0 %v2429_v55  ;;  %1505 = vmatprep.mubr.bf16.mxu1 %v2429_v55 }
  0xc5   : > { %1393 = vmatmul.mubr.bf16.gmra.mrb[56].mxu0 %v2444_v4  ;;  %1506 = vmatmul.mubr.bf16.gmra.mrb[56].mxu1 %v2444_v4 }
  0xc6   : > { %1402 = vmatprep.mubr.bf16.mxu0 %v2451_v12  ;;  %1515 = vmatprep.mubr.bf16.mxu1 %v2451_v12 }
  0xcd   : > { %1403 = vmatmul.mubr.bf16.gmra.mrb[60].mxu0 %v2148_v26  ;;  %1516 = vmatmul.mubr.bf16.gmra.mrb[60].mxu1 %v2148_v26 }
 0x128   : > { %v2498_v0 = vpop.f32.mrb[0].mxu0  ;;  %v2500_v14 = vpop.f32.mrb[0].mxu1 }
 0x129   : > { %v2502_v22 = vpop.f32.mrb[1].mxu0  ;;  %v2504_v34 = vpop.f32.mrb[1].mxu1 }
 0x12a   : > { %v2506_v41 = vpop.f32.mrb[2].mxu0  ;;  %v2508_v52 = vpop.f32.mrb[2].mxu1 }
 0x12b   : > { %v2510_v59 = vpop.f32.mrb[3].mxu0  ;;  %v2512_v7 = vpop.f32.mrb[3].mxu1 }
 0x130   : > { %v2514_v15 = vpop.f32.mrb[4].mxu0  ;;  %v2516_v27 = vpop.f32.mrb[4].mxu1 }
 0x131   : > { %v2518_v35 = vpop.f32.mrb[5].mxu0  ;;  %v2520_v38 = vpop.f32.mrb[5].mxu1 }
 0x132   : > { %v2522_v39 = vpop.f32.mrb[6].mxu0  ;;  %v2524_v40 = vpop.f32.mrb[6].mxu1 }
 0x133   : > { %v2526_v42 = vpop.f32.mrb[7].mxu0  ;;  %v2528_v43 = vpop.f32.mrb[7].mxu1 }
 0x138   : > { %v1128_v44 = vpop.f32.mrb[8].mxu0  ;;  %v1241_v46 = vpop.f32.mrb[8].mxu1 }
 0x139   : > { %v1526_v45 = vmax.f32 %v2498_v0, %v1128_v44  ;;  %v1130_v47 = vpop.f32.mrb[9].mxu0  ;;  %v1528_v48 = vmax.f32 %v2500_v14, %v1241_v46  ;;  %v2533_v50 = vpop.f32.mrb[9].mxu1 }
 0x13a   : > { %v1527_v49 = vmax.f32 %v2502_v22, %v1130_v47  ;;  %v2535_v51 = vpop.f32.mrb[10].mxu0  ;;  %v1529_v53 = vmax.f32 %v2504_v34, %v2533_v50  ;;  %v2541_v55 = vpop.f32.mrb[10].mxu1 }
 0x13b   : > { %v1534_v54 = vmax.f32 %v2506_v41, %v2535_v51  ;;  %v2543_v56 = vpop.f32.mrb[11].mxu0  ;;  %v1536_v57 = vmax.f32 %v2508_v52, %v2541_v55  ;;  %v2549_v60 = vpop.f32.mrb[11].mxu1 }
 0x13c   : > { %v2601_v0 = vpop.permute.xlu0 %1628 }
 0x140   : > { %v2553_v62 = vpop.f32.mrb[12].mxu0  ;;  %v2557_v1 = vpop.f32.mrb[12].mxu1 }
 0x141   : > { %v2559_v2 = vpop.f32.mrb[13].mxu0  ;;  %v2565_v5 = vpop.f32.mrb[13].mxu1 }
 0x142   : > { %v2567_v6 = vpop.f32.mrb[14].mxu0  ;;  %v2573_v10 = vpop.f32.mrb[14].mxu1 }
 0x143   : > { %v2575_v11 = vpop.f32.mrb[15].mxu0  ;;  %v2581_v16 = vpop.f32.mrb[15].mxu1 }
 0x144   : > { %v2603_v58 = vpop.permute.xlu0 %1633 }
 0x148   : > { %v1148_v18 = vpop.f32.mrb[16].mxu0  ;;  %v1261_v19 = vpop.f32.mrb[16].mxu1 }
 0x149   : > { %v1150_v20 = vpop.f32.mrb[17].mxu0  ;;  %v1263_v21 = vpop.f32.mrb[17].mxu1 }
 0x14a   : > { %v1152_v23 = vpop.f32.mrb[18].mxu0  ;;  %v1265_v24 = vpop.f32.mrb[18].mxu1 }
 0x14b   : > { %v1154_v25 = vpop.f32.mrb[19].mxu0  ;;  %v1267_v26 = vpop.f32.mrb[19].mxu1 }
 0x150   : > { %v2585_v28 = vpop.f32.mrb[20].mxu0  ;;  %v2587_v29 = vpop.f32.mrb[20].mxu1 }
 0x151   : > { %v2589_v30 = vpop.f32.mrb[21].mxu0  ;;  %v2591_v31 = vpop.f32.mrb[21].mxu1 }
 0x152   : > { %v2593_v32 = vpop.f32.mrb[22].mxu0  ;;  %v2595_v33 = vpop.f32.mrb[22].mxu1 }
 0x153   : > { %v2597_v36 = vpop.f32.mrb[23].mxu0  ;;  %v2599_v37 = vpop.f32.mrb[23].mxu1 }
 0x158   : > { %v1168_v14 = vpop.f32.mrb[24].mxu0  ;;  %v1281_v34 = vpop.f32.mrb[24].mxu1 }
 0x159   : > { %v1558_v22 = vmax.f32 %v1148_v18, %v1168_v14  ;;  %v1170_v41 = vpop.f32.mrb[25].mxu0  ;;  %v1560_v44 = vmax.f32 %v1261_v19, %v1281_v34  ;;  %v1283_v47 = vpop.f32.mrb[25].mxu1 }
 0x15a   : > { %v1559_v46 = vmax.f32 %v1150_v20, %v1170_v41  ;;  %v1172_v50 = vpop.f32.mrb[26].mxu0  ;;  %v1561_v17 = vmax.f32 %v1263_v21, %v1283_v47  ;;  %v1285_v12 = vpop.f32.mrb[26].mxu1 }
 0x15b   : > { %v1590_v51 = vmax.f32 %v1526_v45, %v1558_v22  ;;  %v1566_v13 = vmax.f32 %v1152_v23, %v1172_v50  ;;  %v1174_v9 = vpop.f32.mrb[27].mxu0  ;;  %v1592_v8 = vmax.f32 %v1528_v48, %v1560_v44  ;;  %v1568_v3 = vmax.f32 %v1265_v24, %v1285_v12  ;;  %v1287_v61 = vpop.f32.mrb[27].mxu1 }
 0x15c   : > { %v1591_v4 = vmax.f32 %v1527_v49, %v1559_v46  ;;  %v1567_v63 = vmax.f32 %v1154_v25, %v1174_v9  ;;  %v1593_v18 = vmax.f32 %v1529_v53, %v1561_v17  ;;  %v1569_v20 = vmax.f32 %v1267_v26, %v1287_v61 }
 0x15d   : > { %v1646_v14 = vadd.f32 %v2601_v0, %v1590_v51  ;;  %v1598_v19 = vmax.f32 %v1534_v54, %v1566_v13  ;;  %v1648_v45 = vadd.f32 %v2601_v0, %v1592_v8  ;;  %v1600_v48 = vmax.f32 %v1536_v57, %v1568_v3 }
 0x15e   : > { %v1647_v34 = vadd.f32 %v2601_v0, %v1591_v4  ;;  %v2843_v49 = vmax.f32 %v2510_v59, %v2543_v56  ;;  %v1649_v12 = vadd.f32 %v2601_v0, %v1593_v18  ;;  %v2844_v54 = vmax.f32 %v2512_v7, %v2549_v60  ;;  %v2620_v4 = vpop.permute.xlu1 %1638 }
 0x15f   : > { %v1678_v53 = vmax.f32 %v1646_v14, 0.0  ;;  %v1654_v13 = vadd.f32 %v2603_v58, %v1598_v19  ;;  %v1680_v17 = vmax.f32 %v1648_v45, 0.0  ;;  %v1656_v55 = vadd.f32 %v2603_v58, %v1600_v48 }
 0x160   : > { %v1599_v9 = vmax.f32 %v2843_v49, %v1567_v63  ;;  %v1601_v61 = vmax.f32 %v2844_v54, %v1569_v20  ;;  %v1679_v8 = vmax.f32 %v1647_v34, 0.0  ;;  %v1178_v57 = vpop.f32.mrb[28].mxu0  ;;  %v1681_v59 = vmax.f32 %v1649_v12, 0.0  ;;  %v1291_v63 = vpop.f32.mrb[28].mxu1 }
 0x161   : > { %v1686_v56 = vmax.f32 %v1654_v13, 0.0  ;;  %v1574_v60 = vmax.f32 %v2585_v28, %v1178_v57  ;;  %v1180_v3 = vpop.f32.mrb[29].mxu0  ;;  %v1688_v24 = vmax.f32 %v1656_v55, 0.0  ;;  %v1576_v25 = vmax.f32 %v2587_v29, %v1291_v63  ;;  %v1293_v26 = vpop.f32.mrb[29].mxu1 }
 0x162   : > { %v1655_v52 = vadd.f32 %v2603_v58, %v1599_v9  ;;  %v1657_v7 = vadd.f32 %v2603_v58, %v1601_v61  ;;  %v2082_v21 = vpack.c.bf16 %v1679_v8, %v1678_v53  ;;  %v1182_v22 = vpop.f32.mrb[30].mxu0  ;;  %v2083_v41 = vpack.c.bf16 %v1681_v59, %v1680_v17  ;;  %v1295_v28 = vpop.f32.mrb[30].mxu1 }
 0x163   : > { %v2845_v46 = vmax.f32 %v2514_v15, %v2553_v62  ;;  %v1575_v50 = vmax.f32 %v2589_v30, %v1180_v3  ;;  %v1184_v51 = vpop.f32.mrb[31].mxu0  ;;  %v2846_v14 = vmax.f32 %v2516_v27, %v2557_v1  ;;  %v1577_v19 = vmax.f32 %v2591_v31, %v1293_v26  ;;  %v1297_v34 = vpop.f32.mrb[31].mxu1 }
 0x164   : > { %v1687_v23 = vmax.f32 %v1655_v52, 0.0  ;;  %v1689_v44 = vmax.f32 %v1657_v7, 0.0  ;;  %1806 = vst [vmem:[%s2627_s16] sm:$0xff] %v2082_v21  ;;  %v1582_v20 = vmax.f32 %v2593_v32, %v1182_v22  ;;  %1807 = vst [vmem:[%s2627_s16 + $0x8] sm:$0xff] %v2083_v41  ;;  %v2847_v62 = vmax.f32 %v2518_v35, %v2559_v2  ;;  %v2648_v49 = vpop.permute.xlu1 %1643 }
 0x165   : > { %v1606_v47 = vmax.f32 %v2845_v46, %v1574_v60  ;;  %v1608_v29 = vmax.f32 %v2846_v14, %v1576_v25  ;;  %v1584_v48 = vmax.f32 %v2595_v33, %v1295_v28  ;;  %v2848_v27 = vmax.f32 %v2520_v38, %v2565_v5 }
 0x166   : > { %v2086_v18 = vpack.c.bf16 %v1687_v23, %v1686_v56  ;;  %v2087_v15 = vpack.c.bf16 %v1689_v44, %v1688_v24  ;;  %v1607_v30 = vmax.f32 %v2847_v62, %v1575_v50  ;;  %v2849_v32 = vmax.f32 %v2522_v39, %v2567_v6 }
 0x167   : > { %v1662_v45 = vadd.f32 %v2620_v4, %v1606_v47  ;;  %v1609_v1 = vmax.f32 %v2848_v27, %v1577_v19  ;;  %v1664_v31 = vadd.f32 %v2620_v4, %v1608_v29  ;;  %v1583_v35 = vmax.f32 %v2597_v36, %v1184_v51 }
 0x168   : > { %1810 = vst [vmem:[%s2627_s16 + $0x20] sm:$0xff] %v2086_v18  ;;  %v1614_v9 = vmax.f32 %v2849_v32, %v1582_v20  ;;  %1811 = vst [vmem:[%s2627_s16 + $0x28] sm:$0xff] %v2087_v15  ;;  %v1663_v2 = vadd.f32 %v2620_v4, %v1607_v30  ;;  %v2850_v33 = vmax.f32 %v2524_v40, %v2573_v10  ;;  %v2670_v36 = vpop.f32.mrb[32].mxu0  ;;  %v2676_v10 = vpop.f32.mrb[32].mxu1 }
 0x169   : > { %v1694_v12 = vmax.f32 %v1662_v45, 0.0  ;;  %v1585_v54 = vmax.f32 %v2599_v37, %v1297_v34  ;;  %v1665_v38 = vadd.f32 %v2620_v4, %v1609_v1  ;;  %v1696_v5 = vmax.f32 %v1664_v31, 0.0  ;;  %v2678_v37 = vpop.f32.mrb[33].mxu0  ;;  %v2681_v55 = vpop.f32.mrb[33].mxu1 }
 0x16a   : > { %v1616_v53 = vmax.f32 %v2850_v33, %v1584_v48  ;;  %v2851_v61 = vmax.f32 %v2526_v42, %v2575_v11  ;;  %v1670_v6 = vadd.f32 %v2648_v49, %v1614_v9  ;;  %v1695_v13 = vmax.f32 %v1663_v2, 0.0  ;;  %v2683_v57 = vpop.f32.mrb[34].mxu0  ;;  %v2686_v7 = vpop.f32.mrb[34].mxu1 }
 0x16b   : > { %v2852_v8 = vmax.f32 %v2528_v43, %v2581_v16  ;;  %v1697_v52 = vmax.f32 %v1665_v38, 0.0  ;;  %v2688_v56 = vpop.f32.mrb[35].mxu0  ;;  %v2690_v3 = vpop.f32.mrb[35].mxu1 }
 0x16c   : > { %v1615_v39 = vmax.f32 %v2851_v61, %v1583_v35  ;;  %v1672_v40 = vadd.f32 %v2648_v49, %v1616_v53  ;;  %v1702_v11 = vmax.f32 %v1670_v6, 0.0  ;;  %v2090_v43 = vpack.c.bf16 %v1695_v13, %v1694_v12 }
 0x16d   : > { %v1617_v17 = vmax.f32 %v2852_v8, %v1585_v54  ;;  %v2091_v60 = vpack.c.bf16 %v1697_v52, %v1696_v5 }
 0x16e   : > { %v1671_v42 = vadd.f32 %v2648_v49, %v1615_v39  ;;  %v1704_v59 = vmax.f32 %v1672_v40, 0.0  ;;  %1814 = vst [vmem:[%s2627_s16 + $0x40] sm:$0xff] %v2090_v43 }
 0x16f   : > { %v1673_v16 = vadd.f32 %v2648_v49, %v1617_v17  ;;  %1815 = vst [vmem:[%s2627_s16 + $0x48] sm:$0xff] %v2091_v60 }
 0x170   : > { %v1703_v63 = vmax.f32 %v1671_v42, 0.0  ;;  %v2695_v25 = vpop.f32.mrb[36].mxu0  ;;  %v2698_v26 = vpop.f32.mrb[36].mxu1 }
 0x171   : > { %v1705_v21 = vmax.f32 %v1673_v16, 0.0  ;;  %v2700_v22 = vpop.f32.mrb[37].mxu0  ;;  %v2702_v41 = vpop.f32.mrb[37].mxu1 }
 0x172   : > { %v2094_v23 = vpack.c.bf16 %v1703_v63, %v1702_v11  ;;  %v2704_v44 = vpop.f32.mrb[38].mxu0  ;;  %v2706_v46 = vpop.f32.mrb[38].mxu1 }
 0x173   : > { %v2095_v24 = vpack.c.bf16 %v1705_v21, %v1704_v59  ;;  %v2708_v47 = vpop.f32.mrb[39].mxu0  ;;  %v2710_v50 = vpop.f32.mrb[39].mxu1 }
 0x174   : > { %1818 = vst [vmem:[%s2627_s16 + $0x60] sm:$0xff] %v2094_v23 }
 0x175   : > { %1819 = vst [vmem:[%s2627_s16 + $0x68] sm:$0xff] %v2095_v24 }
 0x178   : > { %v1354_v28 = vpop.f32.mrb[40].mxu0  ;;  %v1467_v18 = vpop.f32.mrb[40].mxu1 }
 0x179   : > { %v1530_v51 = vmax.f32 %v2670_v36, %v1354_v28  ;;  %v1356_v14 = vpop.f32.mrb[41].mxu0  ;;  %v1532_v29 = vmax.f32 %v2676_v10, %v1467_v18  ;;  %v1469_v20 = vpop.f32.mrb[41].mxu1 }
 0x17a   : > { %v1531_v19 = vmax.f32 %v2678_v37, %v1356_v14  ;;  %v1358_v34 = vpop.f32.mrb[42].mxu0  ;;  %v1533_v15 = vmax.f32 %v2681_v55, %v1469_v20  ;;  %v2717_v30 = vpop.f32.mrb[42].mxu1 }
 0x17b   : > { %v1538_v62 = vmax.f32 %v2683_v57, %v1358_v34  ;;  %v2719_v45 = vpop.f32.mrb[43].mxu0  ;;  %v1540_v48 = vmax.f32 %v2686_v7, %v2717_v30  ;;  %v2725_v1 = vpop.f32.mrb[43].mxu1 }
 0x17c   : > { %v1539_v27 = vmax.f32 %v2688_v56, %v2719_v45  ;;  %v1541_v31 = vmax.f32 %v2690_v3, %v2725_v1 }
 0x180   : > { %v2729_v32 = vpop.f32.mrb[44].mxu0  ;;  %v2733_v35 = vpop.f32.mrb[44].mxu1 }
 0x181   : > { %v2735_v2 = vpop.f32.mrb[45].mxu0  ;;  %v2741_v53 = vpop.f32.mrb[45].mxu1 }
 0x182   : > { %v2743_v54 = vpop.f32.mrb[46].mxu0  ;;  %v2749_v61 = vpop.f32.mrb[46].mxu1 }
 0x183   : > { %v2751_v39 = vpop.f32.mrb[47].mxu0  ;;  %v2757_v13 = vpop.f32.mrb[47].mxu1 }
 0x188   : > { %v1374_v17 = vpop.f32.mrb[48].mxu0  ;;  %v1487_v40 = vpop.f32.mrb[48].mxu1 }
 0x189   : > { %v1376_v10 = vpop.f32.mrb[49].mxu0  ;;  %v1489_v37 = vpop.f32.mrb[49].mxu1 }
 0x18a   : > { %v1378_v52 = vpop.f32.mrb[50].mxu0  ;;  %v1491_v42 = vpop.f32.mrb[50].mxu1 }
 0x18b   : > { %v1380_v11 = vpop.f32.mrb[51].mxu0  ;;  %v1493_v55 = vpop.f32.mrb[51].mxu1 }
 0x190   : > { %v1384_v57 = vpop.f32.mrb[52].mxu0  ;;  %v2761_v43 = vpop.f32.mrb[52].mxu1 }
 0x191   : > { %v2763_v16 = vpop.f32.mrb[53].mxu0  ;;  %v2765_v59 = vpop.f32.mrb[53].mxu1 }
 0x192   : > { %v2767_v7 = vpop.f32.mrb[54].mxu0  ;;  %v2769_v56 = vpop.f32.mrb[54].mxu1 }
 0x193   : > { %v2771_v60 = vpop.f32.mrb[55].mxu0  ;;  %v2773_v63 = vpop.f32.mrb[55].mxu1 }
 0x198   : > { %v1394_v3 = vpop.f32.mrb[56].mxu0  ;;  %v1507_v23 = vpop.f32.mrb[56].mxu1 }
 0x199   : > { %v1562_v21 = vmax.f32 %v1374_v17, %v1394_v3  ;;  %v1396_v24 = vpop.f32.mrb[57].mxu0  ;;  %v1564_v28 = vmax.f32 %v1487_v40, %v1507_v23  ;;  %v1509_v14 = vpop.f32.mrb[57].mxu1 }
 0x19a   : > { %v1563_v18 = vmax.f32 %v1376_v10, %v1396_v24  ;;  %v1398_v20 = vpop.f32.mrb[58].mxu0  ;;  %v1565_v30 = vmax.f32 %v1489_v37, %v1509_v14  ;;  %v1511_v1 = vpop.f32.mrb[58].mxu1 }
 0x19b   : > { %v1594_v34 = vmax.f32 %v1530_v51, %v1562_v21  ;;  %v1570_v45 = vmax.f32 %v1378_v52, %v1398_v20  ;;  %v1400_v8 = vpop.f32.mrb[59].mxu0  ;;  %v1596_v36 = vmax.f32 %v1532_v29, %v1564_v28  ;;  %v1572_v5 = vmax.f32 %v1491_v42, %v1511_v1  ;;  %v1513_v33 = vpop.f32.mrb[59].mxu1 }
 0x19c   : > { %v1595_v6 = vmax.f32 %v1531_v19, %v1563_v18  ;;  %v1571_v38 = vmax.f32 %v1380_v11, %v1400_v8  ;;  %v1597_v9 = vmax.f32 %v1533_v15, %v1565_v30  ;;  %v1573_v3 = vmax.f32 %v1493_v55, %v1513_v33 }
 0x19d   : > { %v1650_v12 = vadd.f32 %v2601_v0, %v1594_v34  ;;  %v1602_v17 = vmax.f32 %v1538_v62, %v1570_v45  ;;  %v1652_v40 = vadd.f32 %v2601_v0, %v1596_v36  ;;  %v1604_v23 = vmax.f32 %v1540_v48, %v1572_v5 }
 0x19e   : > { %v1651_v10 = vadd.f32 %v2601_v0, %v1595_v6  ;;  %v1603_v51 = vmax.f32 %v1539_v27, %v1571_v38  ;;  %v1653_v52 = vadd.f32 %v2601_v0, %v1597_v9  ;;  %v1605_v19 = vmax.f32 %v1541_v31, %v1573_v3 }
 0x19f   : > { %v1682_v37 = vmax.f32 %v1650_v12, 0.0  ;;  %v1658_v29 = vadd.f32 %v2603_v58, %v1602_v17  ;;  %v1684_v42 = vmax.f32 %v1652_v40, 0.0  ;;  %v1660_v11 = vadd.f32 %v2603_v58, %v1604_v23 }
 0x1a0   : > { %v1683_v8 = vmax.f32 %v1651_v10, 0.0  ;;  %v1659_v15 = vadd.f32 %v2603_v58, %v1603_v51  ;;  %v1404_v62 = vpop.f32.mrb[60].mxu0  ;;  %v1685_v33 = vmax.f32 %v1653_v52, 0.0  ;;  %v1661_v36 = vadd.f32 %v2603_v58, %v1605_v19  ;;  %v1517_v27 = vpop.f32.mrb[60].mxu1 }
 0x1a1   : > { %v1690_v55 = vmax.f32 %v1658_v29, 0.0  ;;  %v1578_v48 = vmax.f32 %v1384_v57, %v1404_v62  ;;  %v1406_v12 = vpop.f32.mrb[61].mxu0  ;;  %v1692_v0 = vmax.f32 %v1660_v11, 0.0  ;;  %v1580_v31 = vmax.f32 %v2761_v43, %v1517_v27  ;;  %v1519_v5 = vpop.f32.mrb[61].mxu1 }
 0x1a2   : > { %v2084_v38 = vpack.c.bf16 %v1683_v8, %v1682_v37  ;;  %v1691_v9 = vmax.f32 %v1659_v15, 0.0  ;;  %v1408_v6 = vpop.f32.mrb[62].mxu0  ;;  %v2085_v21 = vpack.c.bf16 %v1685_v33, %v1684_v42  ;;  %v1693_v24 = vmax.f32 %v1661_v36, 0.0  ;;  %v1521_v57 = vpop.f32.mrb[62].mxu1 }
 0x1a3   : > { %v2853_v28 = vmax.f32 %v2695_v25, %v2729_v32  ;;  %v1579_v58 = vmax.f32 %v2763_v16, %v1406_v12  ;;  %v1410_v14 = vpop.f32.mrb[63].mxu0  ;;  %v2854_v34 = vmax.f32 %v2698_v26, %v2733_v35  ;;  %v1581_v30 = vmax.f32 %v2765_v59, %v1519_v5  ;;  %v1523_v1 = vpop.f32.mrb[63].mxu1 }
 0x1a4   : > { %1808 = vst [vmem:[%s2627_s16 + $0x10] sm:$0xff] %v2084_v38  ;;  %v2088_v20 = vpack.c.bf16 %v1691_v9, %v1690_v55  ;;  %v1586_v45 = vmax.f32 %v2767_v7, %v1408_v6  ;;  %1809 = vst [vmem:[%s2627_s16 + $0x18] sm:$0xff] %v2085_v21  ;;  %v2089_v25 = vpack.c.bf16 %v1693_v24, %v1692_v0 }
 0x1a5   : > { %v1610_v18 = vmax.f32 %v2853_v28, %v1578_v48  ;;  %v1612_v43 = vmax.f32 %v2854_v34, %v1580_v31  ;;  %v2855_v16 = vmax.f32 %v2700_v22, %v2735_v2  ;;  %v1588_v3 = vmax.f32 %v2769_v56, %v1521_v57 }
 0x1a6   : > { %1812 = vst [vmem:[%s2627_s16 + $0x30] sm:$0xff] %v2088_v20  ;;  %v2856_v26 = vmax.f32 %v2702_v41, %v2741_v53  ;;  %v2857_v59 = vmax.f32 %v2704_v44, %v2743_v54  ;;  %v1587_v10 = vmax.f32 %v2771_v60, %v1410_v14  ;;  %1813 = vst [vmem:[%s2627_s16 + $0x38] sm:$0xff] %v2089_v25 }
 0x1a7   : > { %v1666_v32 = vadd.f32 %v2620_v4, %v1610_v18  ;;  %v1611_v17 = vmax.f32 %v2855_v16, %v1579_v58  ;;  %v1668_v40 = vadd.f32 %v2620_v4, %v1612_v43  ;;  %v2858_v2 = vmax.f32 %v2706_v46, %v2749_v61 }
 0x1a8   : > { %v1613_v35 = vmax.f32 %v2856_v26, %v1581_v30  ;;  %v1618_v7 = vmax.f32 %v2857_v59, %v1586_v45  ;;  %v1589_v51 = vmax.f32 %v2773_v63, %v1523_v1  ;;  %v2859_v53 = vmax.f32 %v2708_v47, %v2751_v39 }
 0x1a9   : > { %v1698_v23 = vmax.f32 %v1666_v32, 0.0  ;;  %v1667_v22 = vadd.f32 %v2620_v4, %v1611_v17  ;;  %v1620_v56 = vmax.f32 %v2858_v2, %v1588_v3  ;;  %v1700_v37 = vmax.f32 %v1668_v40, 0.0 }
 0x1aa   : > { %v1669_v41 = vadd.f32 %v2620_v4, %v1613_v35  ;;  %v1674_v44 = vadd.f32 %v2648_v49, %v1618_v7  ;;  %v1619_v54 = vmax.f32 %v2859_v53, %v1587_v10  ;;  %v2860_v46 = vmax.f32 %v2710_v50, %v2757_v13 }
 0x1ab   : > { %v1699_v60 = vmax.f32 %v1667_v22, 0.0  ;;  %v1676_v52 = vadd.f32 %v2648_v49, %v1620_v56 }
 0x1ac   : > { %v1621_v61 = vmax.f32 %v2860_v46, %v1589_v51  ;;  %v1701_v63 = vmax.f32 %v1669_v41, 0.0  ;;  %v1706_v29 = vmax.f32 %v1674_v44, 0.0  ;;  %v1675_v4 = vadd.f32 %v2648_v49, %v1619_v54 }
 0x1ad   : > { %v2092_v19 = vpack.c.bf16 %v1699_v60, %v1698_v23  ;;  %v1708_v42 = vmax.f32 %v1676_v52, 0.0 }
 0x1ae   : > { %v1677_v8 = vadd.f32 %v2648_v49, %v1621_v61  ;;  %v2093_v11 = vpack.c.bf16 %v1701_v63, %v1700_v37  ;;  %v1707_v47 = vmax.f32 %v1675_v4, 0.0 }
 0x1af   : > { %1816 = vst [vmem:[%s2627_s16 + $0x50] sm:$0xff] %v2092_v19 }
 0x1b0   : > { %v1709_v39 = vmax.f32 %v1677_v8, 0.0  ;;  %1817 = vst [vmem:[%s2627_s16 + $0x58] sm:$0xff] %v2093_v11  ;;  %v2096_v15 = vpack.c.bf16 %v1707_v47, %v1706_v29 }
 0x1b2   : > { %v2097_v62 = vpack.c.bf16 %v1709_v39, %v1708_v42  ;;  %1820 = vst [vmem:[%s2627_s16 + $0x70] sm:$0xff] %v2096_v15 }
 0x1b4   : > { %1821 = vst [vmem:[%s2627_s16 + $0x78] sm:$0xff] %v2097_v62 }
 0x1b5 PF: > { %s13_s14 = sadd.s32 1, %s2171_s14   ;;  %s2861_s12 = smov %s2167_s13 }
 0x1b6   : > { %p10_p5 = scmp.ge.s32.totalorder %s13_s14, 4   ;;  %s2862_s13 = smov %s2864_s15 }
 0x1b8   :  { %12 = sbr.rel (!%p10_p5) target bundleno = 2 (0x2), region = 62 }

// kernel: laryngeal_cnn_forward.5
= control target key start
LH: loop header
LB: loop body
LE: loop exit
PB: predicated region body
PF: predicated region fallthrough
CT: control target
= control target key end

     0   :  { %s4452_s15 = smov 0   ;;  %s4454_s16 = smov 0   ;;  %s4852_s0 = inlined_call_operand.vmem [shape: bf16[2,32768], index: 0, kind: input, shape index: {}]   ;;  %s4853_s1 = inlined_call_operand.vmem [shape: bf16[2,32768,64], index: 1, kind: input, shape index: {}]   ;;  %s4854_s2 = inlined_call_operand.vmem [shape: f32[2,1,64], index: 2, kind: input, shape index: {}]   ;;  %s4855_s3 = inlined_call_operand.vmem [shape: f32[2,64,4], index: 3, kind: input, shape index: {}]   ;;  %s4856_s4 = inlined_call_operand.vmem [shape: f32[2,2,4], index: 4, kind: output, shape index: {}]  }
   0x1   :  { %s4456_s17 = smov 0   ;;  %s4458_s18 = smov 0  }
   0x2   :  { %s4460_s19 = smov 0  }
   0x3 LB: > { %s23_s20 = sadd.s32 1, %s4412_s17  ;;  %s26_s21 = sadd.s32 1, %s4416_s18  ;;  %s4420_s19 = sphi %s4460_s19, %s14_s19   ;;  %s4416_s18 = sphi %s4458_s18, %s4860_s18   ;;  %s4412_s17 = sphi %s4456_s17, %s4859_s17   ;;  %s4408_s16 = sphi %s4454_s16, %s4858_s16   ;;  %s4404_s15 = sphi %s4452_s15, %s4857_s15  }
   0x4   : > { %p24_p0 = scmp.ge.s32.totalorder %s23_s20, 8  ;;  %p3414_p1 = scmp.ge.s32.totalorder %s4420_s19, 1 }
   0x5   : > { %p209_p2 = scmp.lt.s32.totalorder %s4420_s19, 17 }
   0x6   : > { %s4862_s20 = smov (%p24_p0, %s23_s20), 0  ;;  %s4864_s21 = smov (!%p24_p0, %s26_s21), %s4416_s18 }
   0x7   : > { %p210_p3 = pnand %p3414_p1, %p209_p2  ;;  %p28_p4 = scmp.ge.s32.totalorder %s4864_s21, 2 }
   0x8   : > { %s3415_s22 = sshll.u32 (!%p210_p3), %s4404_s15, 5  ;;  %s3416_s23 = sshll.u32 (!%p210_p3), %s4404_s15, 9 }
   0x9   : > { %s4866_s21 = smov (%p28_p4, %s4864_s21), 0  ;;  %213 = sbr.rel (%p210_p3) target bundleno = 733 (0x2dd), region = 36 }
   0xa   : > { %p251_p5 = scmp.lt.s32.totalorder (!%p210_p3), %s3415_s22, 255  ;;  %p256_p6 = scmp.lt.s32.totalorder (!%p210_p3), %s4408_s16, 1 }
   0xb   : > { %p258_p7 = scmp.lt.s32.totalorder (!%p210_p3), %s3416_s23, 4095  ;;  %p3422_p8 = scmp.ne.s32.totalorder (!%p210_p3), %s4404_s15, 0 }
  0x10   : > { %s4868_s22 = smov (!%p251_p5, %s3415_s22), 255  ;;  %s4870_s16 = smov (!%p256_p6, %s4408_s16), 1 }
  0x11   : > { %s4491_s26 = scalar_lea.vmem %s4852_s0, %s4868_s22  ;;  %s4872_s23 = smov (!%p258_p7, %s3416_s23), 4095  ;;  %vm282_vm0 = vcmask (!%p3422_p8), 517120   ;;  %v4422_v0 = vmov (!%p3422_p8), 0.0  }
  0x12   : > { %s3417_s27 = sshll.u32 %s4870_s16, 12  ;;  %s267_s30 = scalar_lea.vmem %s4854_s2, %s4870_s16  ;;  %283 = vst.msk [vmem:[#allocation2] sm:$0x3] (!%p3422_p8), %vm282_vm0, %v4422_v0 }
  0x13   : > { %s261_s5 = sadd.s32 %s3417_s27, %s4872_s23  ;;  %s3684_s6 = sshll.u32 %s4870_s16, 6 }
  0x14   : > { %s3418_s7 = sshll.u32 %s261_s5, 2  ;;  %s4502_s10 = scalar_lea.vmem %s4855_s3, %s3684_s6 }
  0x15   : > { %s4507_s13 = scalar_lea.vmem %s4853_s1, %s3418_s7  ;;  %s3421_s14 = sshll.u32 %s4870_s16, 1 }
  0x16   : > { %s4513_s25 = scalar_lea.vmem %s4856_s4, %s3421_s14  ;;  %281 = sbr.rel (%p3422_p8) target bundleno = 29 (0x1d), region = 40 }
  0x1d PF: > { %v4122_v1 = vld [vmem:[%s4507_s13 + $0x40] sm:$0xff]   ;;  %v4126_v5 = vld [vmem:[%s4507_s13 + $0x48] sm:$0xff]   ;;  %v4130_v9 = vld [vmem:[%s4507_s13 + $0x50] sm:$0xff]   ;;  %v809_v29 = vlaneseq  ;;  %v4423_v37 = vmov 1966171168   ;;  %vm3210_vm1 = vcmask 517120  }
  0x1e   : > { %v4123_v2 = vld [vmem:[%s4507_s13 + $0xc0] sm:$0xff]   ;;  %3685 = vmatprep.subr.bf16.mxu0 %v4122_v1  ;;  %v4127_v6 = vld [vmem:[%s4507_s13 + $0xc8] sm:$0xff]   ;;  %v4131_v10 = vld [vmem:[%s4507_s13 + $0xd0] sm:$0xff]   ;;  %v807_v38 = vunpack.c.l.s4 %v4423_v37  ;;  %p3679_p9 = scmp.ne.s32.totalorder %s4404_s15, 7 }
  0x1f   : > { %v4124_v3 = vld [vmem:[%s4507_s13] sm:$0xff]   ;;  %3707 = vmatprep.subr.bf16.mxu1 %v4123_v2  ;;  %v4128_v7 = vld [vmem:[%s4507_s13 + $0x8] sm:$0xff]   ;;  %v4132_v11 = vld [vmem:[%s4507_s13 + $0x10] sm:$0xff]   ;;  %v810_v34 = vshrl.u32 %v809_v29, 7  ;;  %vm4425_vm2 = vmmov (!%p3679_p9), 0   ;;  %vm3234_vm3 = vcmask (!%p3679_p9), 523264  }
  0x20   : > { %v4125_v4 = vld [vmem:[%s4507_s13 + $0x80] sm:$0xff]   ;;  %3686 = vmatpush3.bf16.msra.mxu0 %v4124_v3  ;;  %v4129_v8 = vld [vmem:[%s4507_s13 + $0x88] sm:$0xff]   ;;  %v4133_v12 = vld [vmem:[%s4507_s13 + $0x90] sm:$0xff]   ;;  %v808_v41 = vunpack.c.0.s8 %v807_v38  ;;  %vm3308_vm4 = vcmask (!%p3679_p9), 25600  }
  0x21   : > { %3708 = vmatpush3.bf16.msra.mxu1 %v4125_v4  ;;  %3687 = vmatprep.subr.bf16.mxu0 %v4126_v5  ;;  %v4134_v13 = vld [vmem:[%s4507_s13 + $0x58] sm:$0xff]   ;;  %v4138_v17 = vld [vmem:[%s4507_s13 + $0x60] sm:$0xff]   ;;  %v4142_v21 = vld [vmem:[%s4507_s13 + $0x68] sm:$0xff]  }
  0x22   : > { %3709 = vmatprep.subr.bf16.mxu1 %v4127_v6  ;;  %v4135_v14 = vld [vmem:[%s4507_s13 + $0xd8] sm:$0xff]   ;;  %v4139_v18 = vld [vmem:[%s4507_s13 + $0xe0] sm:$0xff]   ;;  %v4143_v22 = vld [vmem:[%s4507_s13 + $0xe8] sm:$0xff]   ;;  %v4551_v42 = vsub.s32 %v808_v41, %v810_v34 }
  0x23   : > { %v4136_v15 = vld [vmem:[%s4507_s13 + $0x18] sm:$0xff]   ;;  %v4140_v19 = vld [vmem:[%s4507_s13 + $0x20] sm:$0xff]   ;;  %v4144_v23 = vld [vmem:[%s4507_s13 + $0x28] sm:$0xff]  }
  0x24   : > { %3688 = vmatpush3.bf16.msra.mxu0 %v4128_v7  ;;  %v4137_v16 = vld [vmem:[%s4507_s13 + $0x98] sm:$0xff]   ;;  %v4141_v20 = vld [vmem:[%s4507_s13 + $0xa0] sm:$0xff]   ;;  %v4145_v24 = vld [vmem:[%s4507_s13 + $0xa8] sm:$0xff]  }
  0x25   : > { %3710 = vmatpush3.bf16.msra.mxu1 %v4129_v8  ;;  %3689 = vmatprep.subr.bf16.mxu0 %v4130_v9  ;;  %v4146_v25 = vld [vmem:[%s4507_s13 + $0x70] sm:$0xff]   ;;  %v4150_v30 = vld [vmem:[%s4507_s13 + $0x78] sm:$0xff]   ;;  %v285_v35 = vld [vmem:[%s4491_s26] sm:$0xff] }
  0x26   : > { %3711 = vmatprep.subr.bf16.mxu1 %v4131_v10  ;;  %v4147_v26 = vld [vmem:[%s4507_s13 + $0xf0] sm:$0xff]   ;;  %v4151_v31 = vld [vmem:[%s4507_s13 + $0xf8] sm:$0xff]   ;;  %v4155_v36 = vld [vmem:[%s4507_s13 + $0x140] sm:$0xff]   ;;  %v805_v40 = vcombine.high %v285_v35, %v285_v35  ;;  %v812_v43 = vrot.slane %v285_v35, %v4551_v42 }
  0x27   : > { %v4148_v27 = vld [vmem:[%s4507_s13 + $0x30] sm:$0xff]   ;;  %v4152_v32 = vld [vmem:[%s4507_s13 + $0x38] sm:$0xff]   ;;  %v4156_v39 = vld [vmem:[%s4507_s13 + $0x1c0] sm:$0xff]  }
  0x28   : > { %3690 = vmatpush3.bf16.msra.mxu0 %v4132_v11  ;;  %v4149_v28 = vld [vmem:[%s4507_s13 + $0xb0] sm:$0xff]   ;;  %v4153_v33 = vld [vmem:[%s4507_s13 + $0xb8] sm:$0xff]   ;;  %v4555_v44 = vrot.slane %v805_v40, %v4551_v42  ;;  %v820_v45 = vcombine.high %v812_v43, %v812_v43  ;;  %v828_v46 = vrot.slane %v812_v43, %v4551_v42  ;;  %v4157_v48 = vld [vmem:[%s4507_s13 + $0x100] sm:$0xff]  }
  0x29   : > { %3712 = vmatpush3.bf16.msra.mxu1 %v4133_v12  ;;  %3691 = vmatprep.subr.bf16.mxu0 %v4134_v13  ;;  %v4158_v50 = vld [vmem:[%s4507_s13 + $0x180] sm:$0xff]   ;;  %v4159_v53 = vld [vmem:[%s4507_s13 + $0x148] sm:$0xff]   ;;  %v4163_v59 = vld [vmem:[%s4507_s13 + $0x150] sm:$0xff]  }
  0x2a   : > { %3713 = vmatprep.subr.bf16.mxu1 %v4135_v14  ;;  %v821_v47 = vcombine.high %v4555_v44, %v4555_v44  ;;  %v842_v49 = vrot.slane %v820_v45, %v4551_v42  ;;  %v850_v52 = vcombine.high %v828_v46, %v828_v46  ;;  %v4160_v55 = vld [vmem:[%s4507_s13 + $0x1c8] sm:$0xff]   ;;  %v4164_v60 = vld [vmem:[%s4507_s13 + $0x1d0] sm:$0xff]   ;;  %v4167_v63 = vld [vmem:[%s4507_s13 + $0x158] sm:$0xff]  }
  0x2b   : > { %v4161_v56 = vld [vmem:[%s4507_s13 + $0x108] sm:$0xff]   ;;  %v4165_v61 = vld [vmem:[%s4507_s13 + $0x110] sm:$0xff]   ;;  %v4168_v0 = vld [vmem:[%s4507_s13 + $0x1d8] sm:$0xff]  }
  0x2c   : > { %3692 = vmatpush3.bf16.msra.mxu0 %v4136_v15  ;;  %v849_v51 = vrot.slane %v821_v47, %v4551_v42  ;;  %2601 = vmatprep.mubr.bf16.mxu0 %v842_v49  ;;  %v852_v54 = vcombine.high %v842_v49, %v842_v49  ;;  %v4162_v58 = vld [vmem:[%s4507_s13 + $0x188] sm:$0xff]   ;;  %v4166_v62 = vld [vmem:[%s4507_s13 + $0x190] sm:$0xff]   ;;  %v4169_v1 = vld [vmem:[%s4507_s13 + $0x118] sm:$0xff]  }
  0x2d   : > { %3714 = vmatpush3.bf16.msra.mxu1 %v4137_v16  ;;  %3693 = vmatprep.subr.bf16.mxu0 %v4138_v17  ;;  %v4170_v2 = vld [vmem:[%s4507_s13 + $0x198] sm:$0xff]   ;;  %v4171_v3 = vld [vmem:[%s4507_s13 + $0x160] sm:$0xff]   ;;  %v4175_v7 = vld [vmem:[%s4507_s13 + $0x168] sm:$0xff]  }
  0x2e   : > { %3715 = vmatprep.subr.bf16.mxu1 %v4139_v18  ;;  %v853_v57 = vcombine.high %v849_v51, %v849_v51  ;;  %2641 = vmatprep.mubr.bf16.mxu1 %v852_v54  ;;  %v4172_v4 = vld [vmem:[%s4507_s13 + $0x1e0] sm:$0xff]   ;;  %v4176_v8 = vld [vmem:[%s4507_s13 + $0x1e8] sm:$0xff]   ;;  %v4179_v11 = vld [vmem:[%s4507_s13 + $0x170] sm:$0xff]  }
  0x2f   : > { %v4173_v5 = vld [vmem:[%s4507_s13 + $0x120] sm:$0xff]   ;;  %v4177_v9 = vld [vmem:[%s4507_s13 + $0x128] sm:$0xff]   ;;  %v4180_v12 = vld [vmem:[%s4507_s13 + $0x1f0] sm:$0xff]  }
  0x30   : > { %3694 = vmatpush3.bf16.msra.mxu0 %v4140_v19  ;;  %v4174_v6 = vld [vmem:[%s4507_s13 + $0x1a0] sm:$0xff]   ;;  %v4178_v10 = vld [vmem:[%s4507_s13 + $0x1a8] sm:$0xff]   ;;  %v4181_v13 = vld [vmem:[%s4507_s13 + $0x130] sm:$0xff]   ;;  %v835_v19 = vrot.slane %v4555_v44, %v4551_v42 }
  0x31   : > { %3716 = vmatpush3.bf16.msra.mxu1 %v4141_v20  ;;  %3695 = vmatprep.subr.bf16.mxu0 %v4142_v21  ;;  %v4182_v14 = vld [vmem:[%s4507_s13 + $0x1b0] sm:$0xff]   ;;  %v4183_v15 = vld [vmem:[%s4507_s13 + $0x178] sm:$0xff]   ;;  %v4187_v20 = vld [vmem:[%s4507_s13 + $0x240] sm:$0xff]  }
  0x32   : > { %3717 = vmatprep.subr.bf16.mxu1 %v4143_v22  ;;  %v4184_v16 = vld [vmem:[%s4507_s13 + $0x1f8] sm:$0xff]   ;;  %v4188_v21 = vld [vmem:[%s4507_s13 + $0x2c0] sm:$0xff]   ;;  %v4195_v29 = vld [vmem:[%s4507_s13 + $0x250] sm:$0xff]  }
  0x33   : > { %v4185_v17 = vld [vmem:[%s4507_s13 + $0x138] sm:$0xff]   ;;  %v4189_v22 = vld [vmem:[%s4507_s13 + $0x200] sm:$0xff]   ;;  %v4207_v41 = vld [vmem:[%s4507_s13 + $0x268] sm:$0xff]  }
  0x34   : > { %3696 = vmatpush3.bf16.msra.mxu0 %v4144_v23  ;;  %v4186_v18 = vld [vmem:[%s4507_s13 + $0x1b8] sm:$0xff]   ;;  %v4190_v23 = vld [vmem:[%s4507_s13 + $0x280] sm:$0xff]   ;;  %v4208_v43 = vld [vmem:[%s4507_s13 + $0x2e8] sm:$0xff]  }
  0x35   : > { %3718 = vmatpush3.bf16.msra.mxu1 %v4145_v24  ;;  %3697 = vmatprep.subr.bf16.mxu0 %v4146_v25  ;;  %v851_v24 = vcombine.high %v835_v19, %v835_v19  ;;  %v4191_v25 = vld [vmem:[%s4507_s13 + $0x248] sm:$0xff]   ;;  %v4200_v34 = vld [vmem:[%s4507_s13 + $0x2d8] sm:$0xff]   ;;  %v4203_v37 = vld [vmem:[%s4507_s13 + $0x260] sm:$0xff]  }
  0x36   : > { %3719 = vmatprep.subr.bf16.mxu1 %v4147_v26  ;;  %v4192_v26 = vld [vmem:[%s4507_s13 + $0x2c8] sm:$0xff]   ;;  %v4201_v35 = vld [vmem:[%s4507_s13 + $0x218] sm:$0xff]   ;;  %v4204_v38 = vld [vmem:[%s4507_s13 + $0x2e0] sm:$0xff]  }
  0x37   : > { %v4206_v40 = vld [vmem:[%s4507_s13 + $0x2a0] sm:$0xff]   ;;  %v4209_v44 = vld [vmem:[%s4507_s13 + $0x228] sm:$0xff]  }
  0x38   : > { %3698 = vmatpush3.bf16.msra.mxu0 %v4148_v27  ;;  %v4193_v27 = vld [vmem:[%s4507_s13 + $0x208] sm:$0xff]  }
  0x39   : > { %3720 = vmatpush3.bf16.msra.mxu1 %v4149_v28  ;;  %3699 = vmatprep.subr.bf16.mxu0 %v4150_v30  ;;  %v4194_v28 = vld [vmem:[%s4507_s13 + $0x288] sm:$0xff]   ;;  %v4196_v30 = vld [vmem:[%s4507_s13 + $0x2d0] sm:$0xff]  }
  0x3a   : > { %3721 = vmatprep.subr.bf16.mxu1 %v4151_v31  ;;  %v4197_v31 = vld [vmem:[%s4507_s13 + $0x210] sm:$0xff]   ;;  %v4210_v45 = vld [vmem:[%s4507_s13 + $0x2a8] sm:$0xff]  }
  0x3b   : > { %v286_v47 = vld [vmem:[%s4491_s26 + $0x8] sm:$0xff] }
  0x3c   : > { %3700 = vmatpush3.bf16.msra.mxu0 %v4152_v32  ;;  %v4198_v32 = vld [vmem:[%s4507_s13 + $0x290] sm:$0xff]   ;;  %v861_v49 = vrot.slane %v286_v47, %v4551_v42 }
  0x3d   : > { %3722 = vmatpush3.bf16.msra.mxu1 %v4153_v33  ;;  %3729 = vmatprep.subr.bf16.mxu0 %v4155_v36  ;;  %v4199_v33 = vld [vmem:[%s4507_s13 + $0x258] sm:$0xff]  }
  0x3e   : > { %3751 = vmatprep.subr.bf16.mxu1 %v4156_v39  ;;  %v4202_v36 = vld [vmem:[%s4507_s13 + $0x298] sm:$0xff]   ;;  %v4205_v39 = vld [vmem:[%s4507_s13 + $0x220] sm:$0xff]  }
  0x3f   : > { %2602 = vmatmul.mubr.bf16.vlgmr.msra.gmra.mrb[0].mxu0 %v828_v46  ;;  %v4211_v46 = vld [vmem:[%s4507_s13 + $0x270] sm:$0xff]  }
  0x40   : > { %3730 = vmatpush3.bf16.msra.mxu0 %v4157_v48  ;;  %2642 = vmatmul.mubr.bf16.vlgmr.msra.gmra.mrb[0].mxu1 %v850_v52  ;;  %v4212_v48 = vld [vmem:[%s4507_s13 + $0x2f0] sm:$0xff]  }
  0x41   : > { %3731 = vmatprep.subr.bf16.mxu0 %v4159_v53  ;;  %3752 = vmatpush3.bf16.msra.mxu1 %v4158_v50  ;;  %v854_v50 = vcombine.high %v286_v47, %v286_v47  ;;  %v4214_v52 = vld [vmem:[%s4507_s13 + $0x2b0] sm:$0xff]   ;;  %v869_v53 = vcombine.high %v861_v49, %v861_v49 }
  0x42   : > { %2681 = vmatprep.mubr.bf16.mxu0 %v849_v51  ;;  %3753 = vmatprep.subr.bf16.mxu1 %v4160_v55  ;;  %v4213_v51 = vld [vmem:[%s4507_s13 + $0x230] sm:$0xff]   ;;  %v4215_v55 = vld [vmem:[%s4507_s13 + $0x278] sm:$0xff]  }
  0x43   : > { %2721 = vmatprep.mubr.bf16.mxu1 %v853_v57  ;;  %v4625_v54 = vrot.slane %v854_v50, %v4551_v42  ;;  %v891_v57 = vrot.slane %v869_v53, %v4551_v42  ;;  %v4262_v47 = vld [vmem:[%s4507_s13 + $0x410] sm:$0xff]   ;;  %v4265_v50 = vld [vmem:[%s4507_s13 + $0x4d8] sm:$0xff]   ;;  %v4268_v53 = vld [vmem:[%s4507_s13 + $0x460] sm:$0xff]  }
  0x44   : > { %3732 = vmatpush3.bf16.msra.mxu0 %v4161_v56  ;;  %v4216_v56 = vld [vmem:[%s4507_s13 + $0x2f8] sm:$0xff]  }
  0x45   : > { %3733 = vmatprep.subr.bf16.mxu0 %v4163_v59  ;;  %3754 = vmatpush3.bf16.msra.mxu1 %v4162_v58  ;;  %v870_v58 = vcombine.high %v4625_v54, %v4625_v54  ;;  %v4217_v59 = vld [vmem:[%s4507_s13 + $0x238] sm:$0xff]  }
  0x46   : > { %3755 = vmatprep.subr.bf16.mxu1 %v4164_v60  ;;  %v4218_v60 = vld [vmem:[%s4507_s13 + $0x2b8] sm:$0xff]  }
  0x48   : > { %3734 = vmatpush3.bf16.msra.mxu0 %v4165_v61  ;;  %v901_v61 = vcombine.high %v891_v57, %v891_v57 }
  0x49   : > { %3735 = vmatprep.subr.bf16.mxu0 %v4167_v63  ;;  %3756 = vmatpush3.bf16.msra.mxu1 %v4166_v62  ;;  %v877_v62 = vrot.slane %v861_v49, %v4551_v42  ;;  %v4219_v63 = vld [vmem:[%s4507_s13 + $0x340] sm:$0xff]   ;;  %v4264_v49 = vld [vmem:[%s4507_s13 + $0x458] sm:$0xff]  }
  0x4a   : > { %3757 = vmatprep.subr.bf16.mxu1 %v4168_v0  ;;  %v4220_v0 = vld [vmem:[%s4507_s13 + $0x3c0] sm:$0xff]  }
  0x4c   : > { %3736 = vmatpush3.bf16.msra.mxu0 %v4169_v1  ;;  %v898_v1 = vrot.slane %v870_v58, %v4551_v42  ;;  %v4273_v58 = vld [vmem:[%s4507_s13 + $0x4e8] sm:$0xff]  }
  0x4d   : > { %3737 = vmatprep.subr.bf16.mxu0 %v4171_v3  ;;  %3758 = vmatpush3.bf16.msra.mxu1 %v4170_v2  ;;  %v4221_v2 = vld [vmem:[%s4507_s13 + $0x300] sm:$0xff]  }
  0x4e   : > { %3759 = vmatprep.subr.bf16.mxu1 %v4172_v4  ;;  %v4222_v3 = vld [vmem:[%s4507_s13 + $0x380] sm:$0xff]   ;;  %v899_v4 = vcombine.high %v877_v62, %v877_v62 }
  0x50   : > { %3738 = vmatpush3.bf16.msra.mxu0 %v4173_v5  ;;  %v4223_v5 = vld [vmem:[%s4507_s13 + $0x348] sm:$0xff]  }
  0x51   : > { %3739 = vmatprep.subr.bf16.mxu0 %v4175_v7  ;;  %3760 = vmatpush3.bf16.msra.mxu1 %v4174_v6  ;;  %v4224_v6 = vld [vmem:[%s4507_s13 + $0x3c8] sm:$0xff]   ;;  %v902_v7 = vcombine.high %v898_v1, %v898_v1 }
  0x52   : > { %3761 = vmatprep.subr.bf16.mxu1 %v4176_v8  ;;  %v4225_v8 = vld [vmem:[%s4507_s13 + $0x308] sm:$0xff]  }
  0x54   : > { %3740 = vmatpush3.bf16.msra.mxu0 %v4177_v9  ;;  %v4226_v9 = vld [vmem:[%s4507_s13 + $0x388] sm:$0xff]  }
  0x55   : > { %3741 = vmatprep.subr.bf16.mxu0 %v4179_v11  ;;  %3762 = vmatpush3.bf16.msra.mxu1 %v4178_v10  ;;  %v4227_v10 = vld [vmem:[%s4507_s13 + $0x350] sm:$0xff]  }
  0x56   : > { %3763 = vmatprep.subr.bf16.mxu1 %v4180_v12  ;;  %v4228_v11 = vld [vmem:[%s4507_s13 + $0x3d0] sm:$0xff]  }
  0x57   : > { %v4229_v12 = vld [vmem:[%s4507_s13 + $0x310] sm:$0xff]  }
  0x58   : > { %3742 = vmatpush3.bf16.msra.mxu0 %v4181_v13  ;;  %v4230_v13 = vld [vmem:[%s4507_s13 + $0x390] sm:$0xff]  }
  0x59   : > { %3743 = vmatprep.subr.bf16.mxu0 %v4183_v15  ;;  %3764 = vmatpush3.bf16.msra.mxu1 %v4182_v14  ;;  %v4231_v14 = vld [vmem:[%s4507_s13 + $0x358] sm:$0xff]  }
  0x5a   : > { %3765 = vmatprep.subr.bf16.mxu1 %v4184_v16  ;;  %v4232_v15 = vld [vmem:[%s4507_s13 + $0x3d8] sm:$0xff]  }
  0x5b   : > { %v4233_v16 = vld [vmem:[%s4507_s13 + $0x318] sm:$0xff]  }
  0x5c   : > { %3744 = vmatpush3.bf16.msra.mxu0 %v4185_v17  ;;  %v4234_v17 = vld [vmem:[%s4507_s13 + $0x398] sm:$0xff]  }
  0x5d   : > { %3773 = vmatprep.subr.bf16.mxu0 %v4187_v20  ;;  %3766 = vmatpush3.bf16.msra.mxu1 %v4186_v18  ;;  %v4235_v18 = vld [vmem:[%s4507_s13 + $0x360] sm:$0xff]  }
  0x5e   : > { %3795 = vmatprep.subr.bf16.mxu1 %v4188_v21  ;;  %v4237_v20 = vld [vmem:[%s4507_s13 + $0x320] sm:$0xff]  }
  0x5f   : > { %2682 = vmatmul.mubr.bf16.vlgmr.msra.gmra.mrb[4].mxu0 %v835_v19  ;;  %v4236_v19 = vld [vmem:[%s4507_s13 + $0x3e0] sm:$0xff]  }
  0x60   : > { %3774 = vmatpush3.bf16.msra.mxu0 %v4189_v22  ;;  %2722 = vmatmul.mubr.bf16.vlgmr.msra.gmra.mrb[4].mxu1 %v851_v24  ;;  %v4238_v21 = vld [vmem:[%s4507_s13 + $0x3a0] sm:$0xff]   ;;  %v4239_v22 = vld [vmem:[%s4507_s13 + $0x368] sm:$0xff]  }
  0x61   : > { %3775 = vmatprep.subr.bf16.mxu0 %v4191_v25  ;;  %3796 = vmatpush3.bf16.msra.mxu1 %v4190_v23  ;;  %v4240_v23 = vld [vmem:[%s4507_s13 + $0x3e8] sm:$0xff]  }
  0x62   : > { %3797 = vmatprep.subr.bf16.mxu1 %v4192_v26  ;;  %2761 = vmatprep.mubr.bf16.mxu0 %v891_v57  ;;  %v4241_v24 = vld [vmem:[%s4507_s13 + $0x328] sm:$0xff]   ;;  %v4243_v26 = vld [vmem:[%s4507_s13 + $0x370] sm:$0xff]  }
  0x63   : > { %2801 = vmatprep.mubr.bf16.mxu1 %v901_v61  ;;  %v4242_v25 = vld [vmem:[%s4507_s13 + $0x3a8] sm:$0xff]   ;;  %v4276_v61 = vld [vmem:[%s4507_s13 + $0x470] sm:$0xff]  }
  0x64   : > { %3776 = vmatpush3.bf16.msra.mxu0 %v4193_v27  ;;  %v4244_v27 = vld [vmem:[%s4507_s13 + $0x3f0] sm:$0xff]   ;;  %v4272_v57 = vld [vmem:[%s4507_s13 + $0x468] sm:$0xff]  }
  0x65   : > { %3777 = vmatprep.subr.bf16.mxu0 %v4195_v29  ;;  %3798 = vmatpush3.bf16.msra.mxu1 %v4194_v28  ;;  %v4245_v28 = vld [vmem:[%s4507_s13 + $0x330] sm:$0xff]  }
  0x66   : > { %3799 = vmatprep.subr.bf16.mxu1 %v4196_v30  ;;  %v4246_v29 = vld [vmem:[%s4507_s13 + $0x3b0] sm:$0xff]   ;;  %v4247_v30 = vld [vmem:[%s4507_s13 + $0x378] sm:$0xff]  }
  0x68   : > { %3778 = vmatpush3.bf16.msra.mxu0 %v4197_v31  ;;  %v4248_v31 = vld [vmem:[%s4507_s13 + $0x3f8] sm:$0xff]  }
  0x69   : > { %3779 = vmatprep.subr.bf16.mxu0 %v4199_v33  ;;  %3800 = vmatpush3.bf16.msra.mxu1 %v4198_v32  ;;  %v4249_v32 = vld [vmem:[%s4507_s13 + $0x338] sm:$0xff]  }
  0x6a   : > { %3801 = vmatprep.subr.bf16.mxu1 %v4200_v34  ;;  %v4250_v33 = vld [vmem:[%s4507_s13 + $0x3b8] sm:$0xff]   ;;  %v884_v34 = vrot.slane %v4625_v54, %v4551_v42  ;;  %v4269_v54 = vld [vmem:[%s4507_s13 + $0x4e0] sm:$0xff]  }
  0x6c   : > { %3780 = vmatpush3.bf16.msra.mxu0 %v4201_v35  ;;  %v4252_v35 = vld [vmem:[%s4507_s13 + $0x440] sm:$0xff]  }
  0x6d   : > { %3781 = vmatprep.subr.bf16.mxu0 %v4203_v37  ;;  %3802 = vmatpush3.bf16.msra.mxu1 %v4202_v36  ;;  %v4253_v36 = vld [vmem:[%s4507_s13 + $0x4c0] sm:$0xff]  }
  0x6e   : > { %3803 = vmatprep.subr.bf16.mxu1 %v4204_v38  ;;  %v4254_v37 = vld [vmem:[%s4507_s13 + $0x400] sm:$0xff]  }
  0x6f   : > { %v4255_v38 = vld [vmem:[%s4507_s13 + $0x480] sm:$0xff]  }
  0x70   : > { %3782 = vmatpush3.bf16.msra.mxu0 %v4205_v39  ;;  %v900_v39 = vcombine.high %v884_v34, %v884_v34 }
  0x71   : > { %3783 = vmatprep.subr.bf16.mxu0 %v4207_v41  ;;  %3804 = vmatpush3.bf16.msra.mxu1 %v4206_v40  ;;  %v4256_v40 = vld [vmem:[%s4507_s13 + $0x448] sm:$0xff]  }
  0x72   : > { %3805 = vmatprep.subr.bf16.mxu1 %v4208_v43  ;;  %v4257_v41 = vld [vmem:[%s4507_s13 + $0x4c8] sm:$0xff]  }
  0x73   : > { %v4258_v43 = vld [vmem:[%s4507_s13 + $0x408] sm:$0xff]  }
  0x74   : > { %3784 = vmatpush3.bf16.msra.mxu0 %v4209_v44  ;;  %v4259_v44 = vld [vmem:[%s4507_s13 + $0x488] sm:$0xff]  }
  0x75   : > { %3785 = vmatprep.subr.bf16.mxu0 %v4211_v46  ;;  %3806 = vmatpush3.bf16.msra.mxu1 %v4210_v45  ;;  %v4260_v45 = vld [vmem:[%s4507_s13 + $0x450] sm:$0xff]  }
  0x76   : > { %3807 = vmatprep.subr.bf16.mxu1 %v4212_v48  ;;  %v4261_v46 = vld [vmem:[%s4507_s13 + $0x4d0] sm:$0xff]  }
  0x77   : > { %v4263_v48 = vld [vmem:[%s4507_s13 + $0x490] sm:$0xff]  }
  0x78   : > { %3786 = vmatpush3.bf16.msra.mxu0 %v4213_v51  ;;  %v4266_v51 = vld [vmem:[%s4507_s13 + $0x418] sm:$0xff]  }
  0x79   : > { %3787 = vmatprep.subr.bf16.mxu0 %v4215_v55  ;;  %3808 = vmatpush3.bf16.msra.mxu1 %v4214_v52  ;;  %v4267_v52 = vld [vmem:[%s4507_s13 + $0x498] sm:$0xff]   ;;  %v4270_v55 = vld [vmem:[%s4507_s13 + $0x420] sm:$0xff]  }
  0x7a   : > { %3809 = vmatprep.subr.bf16.mxu1 %v4216_v56  ;;  %v4271_v56 = vld [vmem:[%s4507_s13 + $0x4a0] sm:$0xff]  }
  0x7c   : > { %3788 = vmatpush3.bf16.msra.mxu0 %v4217_v59  ;;  %v4274_v59 = vld [vmem:[%s4507_s13 + $0x428] sm:$0xff]  }
  0x7d   : > { %3817 = vmatprep.subr.bf16.mxu0 %v4219_v63  ;;  %3810 = vmatpush3.bf16.msra.mxu1 %v4218_v60  ;;  %v4275_v60 = vld [vmem:[%s4507_s13 + $0x4a8] sm:$0xff]   ;;  %v4277_v63 = vld [vmem:[%s4507_s13 + $0x4f0] sm:$0xff]  }
  0x7e   : > { %3839 = vmatprep.subr.bf16.mxu1 %v4220_v0 }
  0x7f   : > { %2762 = vmatmul.mubr.bf16.vlgmr.msra.gmra.mrb[8].mxu0 %v877_v62  ;;  %v287_v62 = vld [vmem:[%s4491_s26 + $0x10] sm:$0xff] }
  0x80   : > { %3818 = vmatpush3.bf16.msra.mxu0 %v4221_v2  ;;  %2841 = vmatprep.mubr.bf16.mxu0 %v898_v1  ;;  %v910_v0 = vrot.slane %v287_v62, %v4551_v42  ;;  %v903_v1 = vcombine.high %v287_v62, %v287_v62  ;;  %v4278_v2 = vld [vmem:[%s4507_s13 + $0x430] sm:$0xff]  }
  0x81   : > { %2802 = vmatmul.mubr.bf16.vlgmr.msra.gmra.mrb[8].mxu1 %v899_v4  ;;  %3819 = vmatprep.subr.bf16.mxu0 %v4223_v5  ;;  %v4327_v62 = vld [vmem:[%s4507_s13 + $0x610] sm:$0xff]  }
  0x82   : > { %3840 = vmatpush3.bf16.msra.mxu1 %v4222_v3  ;;  %2881 = vmatprep.mubr.bf16.mxu1 %v902_v7  ;;  %v4279_v3 = vld [vmem:[%s4507_s13 + $0x4b0] sm:$0xff]   ;;  %v918_v4 = vcombine.high %v910_v0, %v910_v0  ;;  %v4701_v5 = vrot.slane %v903_v1, %v4551_v42  ;;  %v4281_v7 = vld [vmem:[%s4507_s13 + $0x4f8] sm:$0xff]  }
  0x83   : > { %3841 = vmatprep.subr.bf16.mxu1 %v4224_v6  ;;  %v4280_v6 = vld [vmem:[%s4507_s13 + $0x478] sm:$0xff]  }
  0x84   : > { %3820 = vmatpush3.bf16.msra.mxu0 %v4225_v8  ;;  %v940_v8 = vrot.slane %v918_v4, %v4551_v42  ;;  %v4330_v1 = vld [vmem:[%s4507_s13 + $0x6d8] sm:$0xff]   ;;  %v4333_v4 = vld [vmem:[%s4507_s13 + $0x660] sm:$0xff]  }
  0x85   : > { %3821 = vmatprep.subr.bf16.mxu0 %v4227_v10  ;;  %v4282_v10 = vld [vmem:[%s4507_s13 + $0x438] sm:$0xff]  }
  0x86   : > { %3842 = vmatpush3.bf16.msra.mxu1 %v4226_v9  ;;  %v919_v9 = vcombine.high %v4701_v5, %v4701_v5 }
  0x87   : > { %3843 = vmatprep.subr.bf16.mxu1 %v4228_v11  ;;  %v4283_v11 = vld [vmem:[%s4507_s13 + $0x4b8] sm:$0xff]  }
  0x88   : > { %3822 = vmatpush3.bf16.msra.mxu0 %v4229_v12  ;;  %v950_v12 = vcombine.high %v940_v8, %v940_v8 }
  0x89   : > { %3823 = vmatprep.subr.bf16.mxu0 %v4231_v14  ;;  %v4284_v14 = vld [vmem:[%s4507_s13 + $0x540] sm:$0xff]  }
  0x8a   : > { %3844 = vmatpush3.bf16.msra.mxu1 %v4230_v13  ;;  %v926_v13 = vrot.slane %v910_v0, %v4551_v42  ;;  %v4329_v0 = vld [vmem:[%s4507_s13 + $0x658] sm:$0xff]  }
  0x8b   : > { %3845 = vmatprep.subr.bf16.mxu1 %v4232_v15  ;;  %v4285_v15 = vld [vmem:[%s4507_s13 + $0x5c0] sm:$0xff]  }
  0x8c   : > { %3824 = vmatpush3.bf16.msra.mxu0 %v4233_v16  ;;  %v947_v16 = vrot.slane %v919_v9, %v4551_v42  ;;  %v4338_v9 = vld [vmem:[%s4507_s13 + $0x6e8] sm:$0xff]  }
  0x8d   : > { %3825 = vmatprep.subr.bf16.mxu0 %v4235_v18  ;;  %v4287_v18 = vld [vmem:[%s4507_s13 + $0x580] sm:$0xff]  }
  0x8e   : > { %3846 = vmatpush3.bf16.msra.mxu1 %v4234_v17  ;;  %v4286_v17 = vld [vmem:[%s4507_s13 + $0x500] sm:$0xff]  }
  0x8f   : > { %3847 = vmatprep.subr.bf16.mxu1 %v4236_v19  ;;  %v948_v19 = vcombine.high %v926_v13, %v926_v13 }
  0x90   : > { %3826 = vmatpush3.bf16.msra.mxu0 %v4237_v20  ;;  %v4288_v20 = vld [vmem:[%s4507_s13 + $0x548] sm:$0xff]  }
  0x91   : > { %3827 = vmatprep.subr.bf16.mxu0 %v4239_v22  ;;  %v951_v22 = vcombine.high %v947_v16, %v947_v16 }
  0x92   : > { %3848 = vmatpush3.bf16.msra.mxu1 %v4238_v21  ;;  %v4289_v21 = vld [vmem:[%s4507_s13 + $0x5c8] sm:$0xff]  }
  0x93   : > { %3849 = vmatprep.subr.bf16.mxu1 %v4240_v23  ;;  %v4290_v23 = vld [vmem:[%s4507_s13 + $0x508] sm:$0xff]  }
  0x94   : > { %3828 = vmatpush3.bf16.msra.mxu0 %v4241_v24  ;;  %v4291_v24 = vld [vmem:[%s4507_s13 + $0x588] sm:$0xff]  }
  0x95   : > { %3829 = vmatprep.subr.bf16.mxu0 %v4243_v26  ;;  %v4293_v26 = vld [vmem:[%s4507_s13 + $0x5d0] sm:$0xff]  }
  0x96   : > { %3850 = vmatpush3.bf16.msra.mxu1 %v4242_v25  ;;  %v4292_v25 = vld [vmem:[%s4507_s13 + $0x550] sm:$0xff]  }
  0x97   : > { %3851 = vmatprep.subr.bf16.mxu1 %v4244_v27  ;;  %v4294_v27 = vld [vmem:[%s4507_s13 + $0x510] sm:$0xff]  }
  0x98   : > { %3830 = vmatpush3.bf16.msra.mxu0 %v4245_v28  ;;  %v4295_v28 = vld [vmem:[%s4507_s13 + $0x590] sm:$0xff]  }
  0x99   : > { %3831 = vmatprep.subr.bf16.mxu0 %v4247_v30  ;;  %v4297_v30 = vld [vmem:[%s4507_s13 + $0x5d8] sm:$0xff]  }
  0x9a   : > { %3852 = vmatpush3.bf16.msra.mxu1 %v4246_v29  ;;  %v4296_v29 = vld [vmem:[%s4507_s13 + $0x558] sm:$0xff]  }
  0x9b   : > { %3853 = vmatprep.subr.bf16.mxu1 %v4248_v31  ;;  %v4298_v31 = vld [vmem:[%s4507_s13 + $0x518] sm:$0xff]  }
  0x9c   : > { %3832 = vmatpush3.bf16.msra.mxu0 %v4249_v32  ;;  %v4299_v32 = vld [vmem:[%s4507_s13 + $0x598] sm:$0xff]  }
  0x9d   : > { %3861 = vmatprep.subr.bf16.mxu0 %v4252_v35  ;;  %v4302_v35 = vld [vmem:[%s4507_s13 + $0x520] sm:$0xff]  }
  0x9e   : > { %3854 = vmatpush3.bf16.msra.mxu1 %v4250_v33  ;;  %v4300_v33 = vld [vmem:[%s4507_s13 + $0x560] sm:$0xff]  }
  0x9f   : > { %2842 = vmatmul.mubr.bf16.vlgmr.msra.gmra.mrb[12].mxu0 %v884_v34  ;;  %3883 = vmatprep.subr.bf16.mxu1 %v4253_v36  ;;  %v4301_v34 = vld [vmem:[%s4507_s13 + $0x5e0] sm:$0xff]  }
  0xa0   : > { %3862 = vmatpush3.bf16.msra.mxu0 %v4254_v37  ;;  %2921 = vmatprep.mubr.bf16.mxu0 %v940_v8  ;;  %v4303_v36 = vld [vmem:[%s4507_s13 + $0x5a0] sm:$0xff]   ;;  %v4304_v37 = vld [vmem:[%s4507_s13 + $0x568] sm:$0xff]  }
  0xa1   : > { %2882 = vmatmul.mubr.bf16.vlgmr.msra.gmra.mrb[12].mxu1 %v900_v39  ;;  %3863 = vmatprep.subr.bf16.mxu0 %v4256_v40  ;;  %v4306_v39 = vld [vmem:[%s4507_s13 + $0x528] sm:$0xff]  }
  0xa2   : > { %3884 = vmatpush3.bf16.msra.mxu1 %v4255_v38  ;;  %2961 = vmatprep.mubr.bf16.mxu1 %v950_v12  ;;  %v4305_v38 = vld [vmem:[%s4507_s13 + $0x5e8] sm:$0xff]   ;;  %v4341_v12 = vld [vmem:[%s4507_s13 + $0x670] sm:$0xff]  }
  0xa3   : > { %3885 = vmatprep.subr.bf16.mxu1 %v4257_v41  ;;  %v4307_v40 = vld [vmem:[%s4507_s13 + $0x5a8] sm:$0xff]   ;;  %v4308_v41 = vld [vmem:[%s4507_s13 + $0x570] sm:$0xff]  }
  0xa4   : > { %3864 = vmatpush3.bf16.msra.mxu0 %v4258_v43  ;;  %v4309_v43 = vld [vmem:[%s4507_s13 + $0x5f0] sm:$0xff]   ;;  %v4337_v8 = vld [vmem:[%s4507_s13 + $0x668] sm:$0xff]  }
  0xa5   : > { %3865 = vmatprep.subr.bf16.mxu0 %v4260_v45  ;;  %v4311_v45 = vld [vmem:[%s4507_s13 + $0x5b0] sm:$0xff]  }
  0xa6   : > { %3886 = vmatpush3.bf16.msra.mxu1 %v4259_v44  ;;  %v4310_v44 = vld [vmem:[%s4507_s13 + $0x530] sm:$0xff]  }
  0xa7   : > { %3887 = vmatprep.subr.bf16.mxu1 %v4261_v46  ;;  %v4312_v46 = vld [vmem:[%s4507_s13 + $0x578] sm:$0xff]  }
  0xa8   : > { %3866 = vmatpush3.bf16.msra.mxu0 %v4262_v47  ;;  %v4313_v47 = vld [vmem:[%s4507_s13 + $0x5f8] sm:$0xff]  }
  0xa9   : > { %3867 = vmatprep.subr.bf16.mxu0 %v4264_v49  ;;  %v4315_v49 = vld [vmem:[%s4507_s13 + $0x5b8] sm:$0xff]  }
  0xaa   : > { %3888 = vmatpush3.bf16.msra.mxu1 %v4263_v48  ;;  %v4314_v48 = vld [vmem:[%s4507_s13 + $0x538] sm:$0xff]  }
  0xab   : > { %3889 = vmatprep.subr.bf16.mxu1 %v4265_v50  ;;  %v933_v50 = vrot.slane %v4701_v5, %v4551_v42  ;;  %v4334_v5 = vld [vmem:[%s4507_s13 + $0x6e0] sm:$0xff]  }
  0xac   : > { %3868 = vmatpush3.bf16.msra.mxu0 %v4266_v51  ;;  %v4317_v51 = vld [vmem:[%s4507_s13 + $0x640] sm:$0xff]  }
  0xad   : > { %3869 = vmatprep.subr.bf16.mxu0 %v4268_v53  ;;  %v4319_v53 = vld [vmem:[%s4507_s13 + $0x600] sm:$0xff]  }
  0xae   : > { %3890 = vmatpush3.bf16.msra.mxu1 %v4267_v52  ;;  %v4318_v52 = vld [vmem:[%s4507_s13 + $0x6c0] sm:$0xff]  }
  0xaf   : > { %3891 = vmatprep.subr.bf16.mxu1 %v4269_v54  ;;  %v4320_v54 = vld [vmem:[%s4507_s13 + $0x680] sm:$0xff]  }
  0xb0   : > { %3870 = vmatpush3.bf16.msra.mxu0 %v4270_v55  ;;  %v949_v55 = vcombine.high %v933_v50, %v933_v50 }
  0xb1   : > { %3871 = vmatprep.subr.bf16.mxu0 %v4272_v57  ;;  %v4322_v57 = vld [vmem:[%s4507_s13 + $0x6c8] sm:$0xff]  }
  0xb2   : > { %3892 = vmatpush3.bf16.msra.mxu1 %v4271_v56  ;;  %v4321_v56 = vld [vmem:[%s4507_s13 + $0x648] sm:$0xff]  }
  0xb3   : > { %3893 = vmatprep.subr.bf16.mxu1 %v4273_v58  ;;  %v4323_v58 = vld [vmem:[%s4507_s13 + $0x608] sm:$0xff]  }
  0xb4   : > { %3872 = vmatpush3.bf16.msra.mxu0 %v4274_v59  ;;  %v4324_v59 = vld [vmem:[%s4507_s13 + $0x688] sm:$0xff]  }
  0xb5   : > { %3873 = vmatprep.subr.bf16.mxu0 %v4276_v61  ;;  %v4326_v61 = vld [vmem:[%s4507_s13 + $0x6d0] sm:$0xff]  }
  0xb6   : > { %3894 = vmatpush3.bf16.msra.mxu1 %v4275_v60  ;;  %v4325_v60 = vld [vmem:[%s4507_s13 + $0x650] sm:$0xff]  }
  0xb7   : > { %3895 = vmatprep.subr.bf16.mxu1 %v4277_v63  ;;  %v4328_v63 = vld [vmem:[%s4507_s13 + $0x690] sm:$0xff]  }
  0xb8   : > { %3874 = vmatpush3.bf16.msra.mxu0 %v4278_v2  ;;  %v4331_v2 = vld [vmem:[%s4507_s13 + $0x618] sm:$0xff]  }
  0xb9   : > { %3875 = vmatprep.subr.bf16.mxu0 %v4280_v6  ;;  %v4335_v6 = vld [vmem:[%s4507_s13 + $0x620] sm:$0xff]  }
  0xba   : > { %3896 = vmatpush3.bf16.msra.mxu1 %v4279_v3  ;;  %v4332_v3 = vld [vmem:[%s4507_s13 + $0x698] sm:$0xff]  }
  0xbb   : > { %3897 = vmatprep.subr.bf16.mxu1 %v4281_v7  ;;  %v4336_v7 = vld [vmem:[%s4507_s13 + $0x6a0] sm:$0xff]  }
  0xbc   : > { %3876 = vmatpush3.bf16.msra.mxu0 %v4282_v10  ;;  %v4339_v10 = vld [vmem:[%s4507_s13 + $0x628] sm:$0xff]  }
  0xbd   : > { %3905 = vmatprep.subr.bf16.mxu0 %v4284_v14  ;;  %v4342_v14 = vld [vmem:[%s4507_s13 + $0x6f0] sm:$0xff]  }
  0xbe   : > { %3898 = vmatpush3.bf16.msra.mxu1 %v4283_v11  ;;  %v4340_v11 = vld [vmem:[%s4507_s13 + $0x6a8] sm:$0xff]  }
  0xbf   : > { %2922 = vmatmul.mubr.bf16.vlgmr.msra.gmra.mrb[16].mxu0 %v926_v13  ;;  %3927 = vmatprep.subr.bf16.mxu1 %v4285_v15  ;;  %v288_v13 = vld [vmem:[%s4491_s26 + $0x18] sm:$0xff] }
  0xc0   : > { %3906 = vmatpush3.bf16.msra.mxu0 %v4286_v17  ;;  %3001 = vmatprep.mubr.bf16.mxu0 %v947_v16  ;;  %v959_v15 = vrot.slane %v288_v13, %v4551_v42  ;;  %v952_v16 = vcombine.high %v288_v13, %v288_v13  ;;  %v4343_v17 = vld [vmem:[%s4507_s13 + $0x630] sm:$0xff]  }
  0xc1   : > { %2962 = vmatmul.mubr.bf16.vlgmr.msra.gmra.mrb[16].mxu1 %v948_v19  ;;  %3907 = vmatprep.subr.bf16.mxu0 %v4288_v20 }
  0xc2   : > { %3928 = vmatpush3.bf16.msra.mxu1 %v4287_v18  ;;  %3041 = vmatprep.mubr.bf16.mxu1 %v951_v22  ;;  %v4345_v18 = vld [vmem:[%s4507_s13 + $0x678] sm:$0xff]   ;;  %v967_v19 = vcombine.high %v959_v15, %v959_v15  ;;  %v4777_v20 = vrot.slane %v952_v16, %v4551_v42 }
  0xc3   : > { %3929 = vmatprep.subr.bf16.mxu1 %v4289_v21  ;;  %v4344_v21 = vld [vmem:[%s4507_s13 + $0x6b0] sm:$0xff]   ;;  %v4346_v22 = vld [vmem:[%s4507_s13 + $0x6f8] sm:$0xff]  }
  0xc4   : > { %3908 = vmatpush3.bf16.msra.mxu0 %v4290_v23  ;;  %v989_v23 = vrot.slane %v967_v19, %v4551_v42 }
  0xc5   : > { %3909 = vmatprep.subr.bf16.mxu0 %v4292_v25  ;;  %v4347_v25 = vld [vmem:[%s4507_s13 + $0x638] sm:$0xff]  }
  0xc6   : > { %3930 = vmatpush3.bf16.msra.mxu1 %v4291_v24  ;;  %v968_v24 = vcombine.high %v4777_v20, %v4777_v20 }
  0xc7   : > { %3931 = vmatprep.subr.bf16.mxu1 %v4293_v26  ;;  %v999_v26 = vcombine.high %v989_v23, %v989_v23 }
  0xc8   : > { %3910 = vmatpush3.bf16.msra.mxu0 %v4294_v27  ;;  %v975_v27 = vrot.slane %v959_v15, %v4551_v42 }
  0xc9   : > { %3911 = vmatprep.subr.bf16.mxu0 %v4296_v29  ;;  %v4348_v29 = vld [vmem:[%s4507_s13 + $0x6b8] sm:$0xff]  }
  0xca   : > { %3932 = vmatpush3.bf16.msra.mxu1 %v4295_v28  ;;  %v4349_v28 = vld [vmem:[%s4507_s13 + $0x740] sm:$0xff]  }
  0xcb   : > { %3933 = vmatprep.subr.bf16.mxu1 %v4297_v30  ;;  %v996_v30 = vrot.slane %v968_v24, %v4551_v42 }
  0xcc   : > { %3912 = vmatpush3.bf16.msra.mxu0 %v4298_v31  ;;  %v4350_v31 = vld [vmem:[%s4507_s13 + $0x7c0] sm:$0xff]  }
  0xcd   : > { %3913 = vmatprep.subr.bf16.mxu0 %v4300_v33  ;;  %v997_v33 = vcombine.high %v975_v27, %v975_v27 }
  0xce   : > { %3934 = vmatpush3.bf16.msra.mxu1 %v4299_v32  ;;  %v4351_v32 = vld [vmem:[%s4507_s13 + $0x700] sm:$0xff]  }
  0xcf   : > { %3935 = vmatprep.subr.bf16.mxu1 %v4301_v34  ;;  %v4353_v34 = vld [vmem:[%s4507_s13 + $0x748] sm:$0xff]  }
  0xd0   : > { %3914 = vmatpush3.bf16.msra.mxu0 %v4302_v35  ;;  %v4352_v35 = vld [vmem:[%s4507_s13 + $0x780] sm:$0xff]  }
  0xd1   : > { %3915 = vmatprep.subr.bf16.mxu0 %v4304_v37  ;;  %v4354_v37 = vld [vmem:[%s4507_s13 + $0x7c8] sm:$0xff]  }
  0xd2   : > { %3936 = vmatpush3.bf16.msra.mxu1 %v4303_v36  ;;  %v1000_v36 = vcombine.high %v996_v30, %v996_v30 }
  0xd3   : > { %3937 = vmatprep.subr.bf16.mxu1 %v4305_v38  ;;  %v4355_v38 = vld [vmem:[%s4507_s13 + $0x708] sm:$0xff]  }
  0xd4   : > { %3916 = vmatpush3.bf16.msra.mxu0 %v4306_v39  ;;  %v4357_v39 = vld [vmem:[%s4507_s13 + $0x750] sm:$0xff]  }
  0xd5   : > { %3917 = vmatprep.subr.bf16.mxu0 %v4308_v41  ;;  %v4358_v41 = vld [vmem:[%s4507_s13 + $0x7d0] sm:$0xff]  }
  0xd6   : > { %3938 = vmatpush3.bf16.msra.mxu1 %v4307_v40  ;;  %v4356_v40 = vld [vmem:[%s4507_s13 + $0x788] sm:$0xff]  }
  0xd7   : > { %3939 = vmatprep.subr.bf16.mxu1 %v4309_v43  ;;  %v4359_v43 = vld [vmem:[%s4507_s13 + $0x710] sm:$0xff]  }
  0xd8   : > { %3918 = vmatpush3.bf16.msra.mxu0 %v4310_v44  ;;  %v4361_v44 = vld [vmem:[%s4507_s13 + $0x758] sm:$0xff]  }
  0xd9   : > { %3919 = vmatprep.subr.bf16.mxu0 %v4312_v46  ;;  %v4362_v46 = vld [vmem:[%s4507_s13 + $0x7d8] sm:$0xff]  }
  0xda   : > { %3940 = vmatpush3.bf16.msra.mxu1 %v4311_v45  ;;  %v4360_v45 = vld [vmem:[%s4507_s13 + $0x790] sm:$0xff]  }
  0xdb   : > { %3941 = vmatprep.subr.bf16.mxu1 %v4313_v47  ;;  %v4363_v47 = vld [vmem:[%s4507_s13 + $0x718] sm:$0xff]  }
  0xdc   : > { %3920 = vmatpush3.bf16.msra.mxu0 %v4314_v48  ;;  %v4365_v48 = vld [vmem:[%s4507_s13 + $0x760] sm:$0xff]  }
  0xdd   : > { %3949 = vmatprep.subr.bf16.mxu0 %v4317_v51  ;;  %v4367_v51 = vld [vmem:[%s4507_s13 + $0x720] sm:$0xff]  }
  0xde   : > { %3942 = vmatpush3.bf16.msra.mxu1 %v4315_v49  ;;  %v4364_v49 = vld [vmem:[%s4507_s13 + $0x798] sm:$0xff]  }
  0xdf   : > { %3002 = vmatmul.mubr.bf16.vlgmr.msra.gmra.mrb[20].mxu0 %v933_v50  ;;  %3971 = vmatprep.subr.bf16.mxu1 %v4318_v52  ;;  %v4366_v50 = vld [vmem:[%s4507_s13 + $0x7e0] sm:$0xff]   ;;  %v4369_v52 = vld [vmem:[%s4507_s13 + $0x768] sm:$0xff]  }
  0xe0   : > { %3950 = vmatpush3.bf16.msra.mxu0 %v4319_v53  ;;  %3081 = vmatprep.mubr.bf16.mxu0 %v989_v23  ;;  %v4368_v53 = vld [vmem:[%s4507_s13 + $0x7a0] sm:$0xff]  }
  0xe1   : > { %3042 = vmatmul.mubr.bf16.vlgmr.msra.gmra.mrb[20].mxu1 %v949_v55  ;;  %3951 = vmatprep.subr.bf16.mxu0 %v4321_v56  ;;  %v4371_v55 = vld [vmem:[%s4507_s13 + $0x728] sm:$0xff]   ;;  %v4373_v56 = vld [vmem:[%s4507_s13 + $0x770] sm:$0xff]  }
  0xe2   : > { %3972 = vmatpush3.bf16.msra.mxu1 %v4320_v54  ;;  %3121 = vmatprep.mubr.bf16.mxu1 %v999_v26  ;;  %v4370_v54 = vld [vmem:[%s4507_s13 + $0x7e8] sm:$0xff]  }
  0xe3   : > { %3973 = vmatprep.subr.bf16.mxu1 %v4322_v57 }
  0xe4   : > { %3952 = vmatpush3.bf16.msra.mxu0 %v4323_v58  ;;  %v4372_v58 = vld [vmem:[%s4507_s13 + $0x7a8] sm:$0xff]  }
  0xe5   : > { %3953 = vmatprep.subr.bf16.mxu0 %v4325_v60  ;;  %v4374_v60 = vld [vmem:[%s4507_s13 + $0x7f0] sm:$0xff]  }
  0xe6   : > { %3974 = vmatpush3.bf16.msra.mxu1 %v4324_v59 }
  0xe7   : > { %3975 = vmatprep.subr.bf16.mxu1 %v4326_v61 }
  0xe8   : > { %3954 = vmatpush3.bf16.msra.mxu0 %v4327_v62 }
  0xe9   : > { %3955 = vmatprep.subr.bf16.mxu0 %v4329_v0  ;;  %v4375_v0 = vld [vmem:[%s4507_s13 + $0x730] sm:$0xff]  }
  0xea   : > { %3976 = vmatpush3.bf16.msra.mxu1 %v4328_v63 }
  0xeb   : > { %3977 = vmatprep.subr.bf16.mxu1 %v4330_v1 }
  0xec   : > { %3956 = vmatpush3.bf16.msra.mxu0 %v4331_v2 }
  0xed   : > { %3957 = vmatprep.subr.bf16.mxu0 %v4333_v4 }
  0xee   : > { %3978 = vmatpush3.bf16.msra.mxu1 %v4332_v3  ;;  %v4377_v3 = vld [vmem:[%s4507_s13 + $0x778] sm:$0xff]  }
  0xef   : > { %3979 = vmatprep.subr.bf16.mxu1 %v4334_v5 }
  0xf0   : > { %3958 = vmatpush3.bf16.msra.mxu0 %v4335_v6  ;;  %v4376_v6 = vld [vmem:[%s4507_s13 + $0x7b0] sm:$0xff]  }
  0xf1   : > { %3959 = vmatprep.subr.bf16.mxu0 %v4337_v8  ;;  %v4378_v8 = vld [vmem:[%s4507_s13 + $0x7f8] sm:$0xff]  }
  0xf2   : > { %3980 = vmatpush3.bf16.msra.mxu1 %v4336_v7 }
  0xf3   : > { %3981 = vmatprep.subr.bf16.mxu1 %v4338_v9 }
  0xf4   : > { %3960 = vmatpush3.bf16.msra.mxu0 %v4339_v10  ;;  %v4379_v10 = vld [vmem:[%s4507_s13 + $0x738] sm:$0xff]  }
  0xf5   : > { %3961 = vmatprep.subr.bf16.mxu0 %v4341_v12  ;;  %v4380_v12 = vld [vmem:[%s4507_s13 + $0x7b8] sm:$0xff]  }
  0xf6   : > { %3982 = vmatpush3.bf16.msra.mxu1 %v4340_v11  ;;  %v982_v11 = vrot.slane %v4777_v20, %v4551_v42 }
  0xf7   : > { %3983 = vmatprep.subr.bf16.mxu1 %v4342_v14 }
  0xf8   : > { %3962 = vmatpush3.bf16.msra.mxu0 %v4343_v17  ;;  %v998_v13 = vcombine.high %v982_v11, %v982_v11 }
  0xf9   : > { %3963 = vmatprep.subr.bf16.mxu0 %v4345_v18 }
  0xfa   : > { %3984 = vmatpush3.bf16.msra.mxu1 %v4344_v21 }
  0xfb   : > { %3985 = vmatprep.subr.bf16.mxu1 %v4346_v22 }
  0xfc   : > { %3964 = vmatpush3.bf16.msra.mxu0 %v4347_v25 }
  0xfd   : > { %3993 = vmatprep.subr.bf16.mxu0 %v4349_v28 }
  0xfe   : > { %3986 = vmatpush3.bf16.msra.mxu1 %v4348_v29 }
  0xff   : > { %3082 = vmatmul.mubr.bf16.vlgmr.msra.gmra.mrb[24].mxu0 %v975_v27  ;;  %4015 = vmatprep.subr.bf16.mxu1 %v4350_v31 }
 0x100   : > { %3994 = vmatpush3.bf16.msra.mxu0 %v4351_v32  ;;  %3161 = vmatprep.mubr.bf16.mxu0 %v996_v30 }
 0x101   : > { %3122 = vmatmul.mubr.bf16.vlgmr.msra.gmra.mrb[24].mxu1 %v997_v33  ;;  %3995 = vmatprep.subr.bf16.mxu0 %v4353_v34 }
 0x102   : > { %4016 = vmatpush3.bf16.msra.mxu1 %v4352_v35  ;;  %3201 = vmatprep.mubr.bf16.mxu1 %v1000_v36 }
 0x103   : > { %4017 = vmatprep.subr.bf16.mxu1 %v4354_v37 }
 0x104   : > { %3996 = vmatpush3.bf16.msra.mxu0 %v4355_v38 }
 0x105   : > { %3997 = vmatprep.subr.bf16.mxu0 %v4357_v39 }
 0x106   : > { %4018 = vmatpush3.bf16.msra.mxu1 %v4356_v40 }
 0x107   : > { %4019 = vmatprep.subr.bf16.mxu1 %v4358_v41 }
 0x108   : > { %3998 = vmatpush3.bf16.msra.mxu0 %v4359_v43 }
 0x109   : > { %3999 = vmatprep.subr.bf16.mxu0 %v4361_v44 }
 0x10a   : > { %4020 = vmatpush3.bf16.msra.mxu1 %v4360_v45 }
 0x10b   : > { %4021 = vmatprep.subr.bf16.mxu1 %v4362_v46 }
 0x10c   : > { %4000 = vmatpush3.bf16.msra.mxu0 %v4363_v47 }
 0x10d   : > { %4001 = vmatprep.subr.bf16.mxu0 %v4365_v48 }
 0x10e   : > { %4022 = vmatpush3.bf16.msra.mxu1 %v4364_v49 }
 0x10f   : > { %4023 = vmatprep.subr.bf16.mxu1 %v4366_v50 }
 0x110   : > { %4002 = vmatpush3.bf16.msra.mxu0 %v4367_v51 }
 0x111   : > { %4003 = vmatprep.subr.bf16.mxu0 %v4369_v52 }
 0x112   : > { %4024 = vmatpush3.bf16.msra.mxu1 %v4368_v53  ;;  %v3701_v57 = vpop.f32.mrb[0].mxu0 }
 0x113   : > { %v3702_v59 = vpop.f32.mrb[1].mxu0  ;;  %4025 = vmatprep.subr.bf16.mxu1 %v4370_v54  ;;  %v3723_v61 = vpop.f32.mrb[0].mxu1 }
 0x114   : > { %v3703_v62 = vadd.f32 %v3702_v59, %v3701_v57  ;;  %v3704_v63 = vpop.f32.mrb[2].mxu0  ;;  %4004 = vmatpush3.bf16.msra.mxu0 %v4371_v55  ;;  %v3724_v1 = vpop.f32.mrb[1].mxu1 }
 0x115   : > { %v3705_v2 = vpop.f32.mrb[3].mxu0  ;;  %4005 = vmatprep.subr.bf16.mxu0 %v4373_v56  ;;  %v3725_v4 = vadd.f32 %v3724_v1, %v3723_v61  ;;  %v3726_v5 = vpop.f32.mrb[2].mxu1 }
 0x116   : > { %4026 = vmatpush3.bf16.msra.mxu1 %v4372_v58  ;;  %v3727_v7 = vpop.f32.mrb[3].mxu1 }
 0x117   : > { %4027 = vmatprep.subr.bf16.mxu1 %v4374_v60  ;;  %v2644_v9 = vadd.f32 %v3725_v4, %v3703_v62 }
 0x118   : > { %4006 = vmatpush3.bf16.msra.mxu0 %v4375_v0 }
 0x119   : > { %4007 = vmatprep.subr.bf16.mxu0 %v4377_v3 }
 0x11a   : > { %4028 = vmatpush3.bf16.msra.mxu1 %v4376_v6 }
 0x11b   : > { %4029 = vmatprep.subr.bf16.mxu1 %v4378_v8 }
 0x11c   : > { %4008 = vmatpush3.bf16.msra.mxu0 %v4379_v10 }
 0x11e   : > { %4030 = vmatpush3.bf16.msra.mxu1 %v4380_v12 }
 0x11f   : > { %3162 = vmatmul.mubr.bf16.vlgmr.msra.gmra.mrb[28].mxu0 %v982_v11 }
 0x121   : > { %3202 = vmatmul.mubr.bf16.vlgmr.msra.gmra.mrb[28].mxu1 %v998_v13 }
 0x132   : > { %v3745_v14 = vpop.f32.mrb[4].mxu0 }
 0x133   : > { %v3746_v15 = vpop.f32.mrb[5].mxu0  ;;  %v3767_v16 = vpop.f32.mrb[4].mxu1 }
 0x134   : > { %v3747_v17 = vadd.f32 %v3746_v15, %v3745_v14  ;;  %v3748_v18 = vpop.f32.mrb[6].mxu0  ;;  %v3768_v19 = vpop.f32.mrb[5].mxu1 }
 0x135   : > { %v3749_v21 = vpop.f32.mrb[7].mxu0  ;;  %v3769_v23 = vadd.f32 %v3768_v19, %v3767_v16  ;;  %v3770_v24 = vpop.f32.mrb[6].mxu1 }
 0x136   : > { %v2684_v22 = vadd.f32 %v3747_v17, %v2644_v9  ;;  %v3771_v25 = vpop.f32.mrb[7].mxu1 }
 0x138   : > { %v2724_v42 = vadd.f32 %v3769_v23, %v2684_v22 }
 0x152   : > { %v3789_v20 = vpop.f32.mrb[8].mxu0 }
 0x153   : > { %v3790_v26 = vpop.f32.mrb[9].mxu0 }
 0x154   : > { %v3811_v27 = vpop.f32.mrb[8].mxu1  ;;  %v3791_v28 = vadd.f32 %v3790_v26, %v3789_v20  ;;  %v3792_v29 = vpop.f32.mrb[10].mxu0 }
 0x155   : > { %v3812_v30 = vpop.f32.mrb[9].mxu1  ;;  %v3793_v31 = vpop.f32.mrb[11].mxu0 }
 0x156   : > { %v2764_v32 = vadd.f32 %v3791_v28, %v2724_v42  ;;  %v3813_v33 = vadd.f32 %v3812_v30, %v3811_v27  ;;  %v3814_v34 = vpop.f32.mrb[10].mxu1  ;;  %v284_v31 = vld [vmem:[#allocation2] sm:$0x3] }
 0x157   : > { %v3815_v35 = vpop.f32.mrb[11].mxu1 }
 0x158   : > { %v2804_v36 = vadd.f32 %v3813_v33, %v2764_v32  ;;  %v3226_v35 = vld [vmem:[%s4502_s10] sm:$0xff] (!%p3679_p9) }
 0x172   : > { %v3833_v37 = vpop.f32.mrb[12].mxu0 }
 0x173   : > { %v3834_v38 = vpop.f32.mrb[13].mxu0 }
 0x174   : > { %v3855_v39 = vpop.f32.mrb[12].mxu1  ;;  %v3835_v40 = vadd.f32 %v3834_v38, %v3833_v37  ;;  %v3836_v41 = vpop.f32.mrb[14].mxu0  ;;  %v3228_v37 = vld [vmem:[%s4502_s10 + $0x10] sm:$0xff] (!%p3679_p9)  ;;  %v4424_v38 = vmov (!%p3679_p9), 0.0|0.0  }
 0x175   : > { %v3856_v43 = vpop.f32.mrb[13].mxu1  ;;  %v3837_v44 = vpop.f32.mrb[15].mxu0  ;;  %4065 = vmatprep.subr.bf16.mxu0 (!%p3679_p9), %v4424_v38  ;;  %v4426_v41 = vmov (!%p3679_p9), 0.0  }
 0x176   : > { %v2844_v45 = vadd.f32 %v3835_v40, %v2804_v36  ;;  %v3857_v46 = vadd.f32 %v3856_v43, %v3855_v39  ;;  %v3858_v47 = vpop.f32.mrb[14].mxu1  ;;  %v3227_v36 = vld [vmem:[%s4502_s10 + $0x8] sm:$0xff] (!%p3679_p9)  ;;  %v3229_v40 = vld [vmem:[%s4502_s10 + $0x18] sm:$0xff] (!%p3679_p9)  ;;  %4062 = vmatprep.mubr.msk.f32.mxu0 (!%p3679_p9), %vm4425_vm2, %v4426_v41  ;;  %v3230_v44 = vld [vmem:[%s4502_s10 + $0x20] sm:$0xff] (!%p3679_p9) }
 0x177   : > { %v3859_v48 = vpop.f32.mrb[15].mxu1  ;;  %v4066_v39 = vpack.c.bf16 (!%p3679_p9), %v3227_v36, %v3226_v35  ;;  %v4069_v43 = vpack.c.bf16 (!%p3679_p9), %v3229_v40, %v3228_v37 }
 0x178   : > { %v2884_v49 = vadd.f32 %v3857_v46, %v2844_v45  ;;  %v3231_v45 = vld [vmem:[%s4502_s10 + $0x28] sm:$0xff] (!%p3679_p9)  ;;  %v3680_v48 = vld [vmem:[%s267_s30] ss:$0 sm:$0xff] (!%p3679_p9) }
 0x179   : > { %4067 = vmatpush3.bf16.msra.mxu0 (!%p3679_p9), %v4066_v39  ;;  %v4072_v46 = vpack.c.bf16 (!%p3679_p9), %v3231_v45, %v3230_v44 }
 0x17a   : > { %4068 = vmatprep.subr.bf16.mxu0 (!%p3679_p9), %v4424_v38 }
 0x17d   : > { %4070 = vmatpush3.bf16.msra.mxu0 (!%p3679_p9), %v4069_v43 }
 0x17e   : > { %4071 = vmatprep.subr.bf16.mxu0 (!%p3679_p9), %v4424_v38 }
 0x181   : > { %4073 = vmatpush3.bf16.msra.mxu0 (!%p3679_p9), %v4072_v46 }
 0x182   : > { %4074 = vmatprep.subr.bf16.mxu0 (!%p3679_p9), %v4424_v38 }
 0x192   : > { %v3877_v50 = vpop.f32.mrb[16].mxu0 }
 0x193   : > { %v3878_v51 = vpop.f32.mrb[17].mxu0 }
 0x194   : > { %v3899_v52 = vpop.f32.mrb[16].mxu1  ;;  %v3879_v53 = vadd.f32 %v3878_v51, %v3877_v50  ;;  %v3880_v54 = vpop.f32.mrb[18].mxu0  ;;  %v3233_v50 = vld [vmem:[%s4502_s10 + $0x38] sm:$0xff] (!%p3679_p9) }
 0x195   : > { %v3900_v55 = vpop.f32.mrb[17].mxu1  ;;  %v3881_v56 = vpop.f32.mrb[19].mxu0 }
 0x196   : > { %v2924_v57 = vadd.f32 %v3879_v53, %v2884_v49  ;;  %v3901_v58 = vadd.f32 %v3900_v55, %v3899_v52  ;;  %v3902_v59 = vpop.f32.mrb[18].mxu1  ;;  %v3232_v49 = vld [vmem:[%s4502_s10 + $0x30] sm:$0xff] (!%p3679_p9) }
 0x197   : > { %v3903_v60 = vpop.f32.mrb[19].mxu1  ;;  %v4075_v52 = vpack.c.bf16 (!%p3679_p9), %v3233_v50, %v3232_v49 }
 0x198   : > { %v2964_v61 = vadd.f32 %v3901_v58, %v2924_v57 }
 0x199   : > { %4076 = vmatpush3.bf16.msra.mxu0 (!%p3679_p9), %v4075_v52 }
 0x1b2   : > { %v3921_v62 = vpop.f32.mrb[20].mxu0 }
 0x1b3   : > { %v3922_v63 = vpop.f32.mrb[21].mxu0 }
 0x1b4   : > { %v3943_v0 = vpop.f32.mrb[20].mxu1  ;;  %v3923_v1 = vadd.f32 %v3922_v63, %v3921_v62  ;;  %v3924_v2 = vpop.f32.mrb[22].mxu0 }
 0x1b5   : > { %v3944_v3 = vpop.f32.mrb[21].mxu1  ;;  %v3925_v4 = vpop.f32.mrb[23].mxu0 }
 0x1b6   : > { %v3004_v5 = vadd.f32 %v3923_v1, %v2964_v61  ;;  %v3945_v6 = vadd.f32 %v3944_v3, %v3943_v0  ;;  %v3946_v7 = vpop.f32.mrb[22].mxu1 }
 0x1b7   : > { %v3947_v8 = vpop.f32.mrb[23].mxu1 }
 0x1b8   : > { %v3044_v9 = vadd.f32 %v3945_v6, %v3004_v5 }
 0x1d2   : > { %v3965_v10 = vpop.f32.mrb[24].mxu0 }
 0x1d3   : > { %v3966_v11 = vpop.f32.mrb[25].mxu0 }
 0x1d4   : > { %v3987_v12 = vpop.f32.mrb[24].mxu1  ;;  %v3967_v13 = vadd.f32 %v3966_v11, %v3965_v10  ;;  %v3968_v14 = vpop.f32.mrb[26].mxu0 }
 0x1d5   : > { %v3988_v15 = vpop.f32.mrb[25].mxu1  ;;  %v3969_v16 = vpop.f32.mrb[27].mxu0 }
 0x1d6   : > { %v3084_v17 = vadd.f32 %v3967_v13, %v3044_v9  ;;  %v3989_v18 = vadd.f32 %v3988_v15, %v3987_v12  ;;  %v3990_v19 = vpop.f32.mrb[26].mxu1 }
 0x1d7   : > { %v3991_v21 = vpop.f32.mrb[27].mxu1 }
 0x1d8   : > { %v3124_v22 = vadd.f32 %v3989_v18, %v3084_v17 }
 0x1f2   : > { %v4009_v23 = vpop.f32.mrb[28].mxu0 }
 0x1f3   : > { %v4010_v24 = vpop.f32.mrb[29].mxu0 }
 0x1f4   : > { %v4031_v25 = vpop.f32.mrb[28].mxu1  ;;  %v4011_v42 = vadd.f32 %v4010_v24, %v4009_v23  ;;  %v4012_v20 = vpop.f32.mrb[30].mxu0 }
 0x1f5   : > { %v4032_v26 = vpop.f32.mrb[29].mxu1  ;;  %v4013_v27 = vpop.f32.mrb[31].mxu0 }
 0x1f6   : > { %v3164_v28 = vadd.f32 %v4011_v42, %v3124_v22  ;;  %v4033_v29 = vadd.f32 %v4032_v26, %v4031_v25  ;;  %v4034_v30 = vpop.f32.mrb[30].mxu1  ;;  %3215 = sbr.rel (%p3679_p9) target bundleno = 733 (0x2dd), region = 44 }
 0x1f7   : > { %v4035_v32 = vpop.f32.mrb[31].mxu1 }
 0x1f8   : > { %v3204_v33 = vadd.f32 %v4033_v29, %v3164_v28 }
 0x1fa   : > { %v3209_v34 = vadd.f32 %v3204_v33, %v284_v31 }
 0x1fc   : > { %3211 = vst.msk [vmem:[#allocation2] sm:$0x3] %vm3210_vm1, %v3209_v34 }
 0x203   : > { %v3216_v47 = vld [vmem:[#allocation2] sm:$0x3] }
 0x204   : > { %v3224_v51 = vadd.f32 %v3680_v48, %v3216_v47 }
 0x206   : > { %v3225_v53 = vmax.f32 %v3224_v51, 0.0 }
 0x208   : > { %4063 = vmatmul.mubr.msk.f32.vlgmr.msra.gmra.mrb[0].mxu0 %vm3234_vm3, %v3225_v53 }
 0x2db   : > { %v3304_v54 = vpop.f32.mrb[0].mxu0 }
 0x2dc   : > { %3309 = vst.msk [vmem:[%s4513_s25] sm:$0x3] %vm3308_vm4, %v3304_v54  ;;  %v4064_v55 = vpop.f32.mrb[1].mxu0 }
 0x2dd PF: > { %s14_s19 = sadd.s32 1, %s4420_s19   ;;  %s4857_s15 = smov %s4412_s17 }
 0x2de   : > { %p11_p10 = scmp.ge.s32.totalorder %s14_s19, 18   ;;  %s4858_s16 = smov %s4416_s18 }
 0x2df   : > { %s4859_s17 = smov %s4862_s20  ;;  %s4860_s18 = smov %s4866_s21 }
 0x2e0   :  { %13 = sbr.rel (!%p11_p10) target bundleno = 3 (0x3), region = 83 }

</bundles_post_ra>
